<compile_context>
chip_gen: v6e
topology: v6e:2x2x1
jax: 0.10.0
libtpu: 0.0.40
codegen_flags: <defaults>
</compile_context>

<pallas_src>
import functools

import jax
import jax.numpy as jnp
from jax.experimental import pallas as pl
from jax.experimental.pallas import tpu as pltpu


def _self_attention_kernel(
    area_ref,          # VMEM (TB, 1)    f32 : area_ratio for this block of ROIs
    rot_ref,           # VMEM (TB, C, S) bf16: rot feats, channel-major (native NCHW)
    hori_ref,          # VMEM (TB, C, S) bf16: hori feats, channel-major
    wq_ref, bq_ref,    # VMEM (C, C) bf16, (1, C) f32    (1/sqrt(hd) scale folded in)
    wkv_ref, bkv_ref,  # VMEM (C, 2C) bf16, (1, 2C) f32  (key | value fused)
    wc_ref, bc_ref,    # VMEM (1, C) f32, (1, C) f32     condition_layer: Linear(1, C)
    wo_ref, bo_ref,    # VMEM (C, C) bf16, (1, C) f32
    out_ref,           # VMEM (TB, C, S) f32
    *, num_heads,
):
    TB, C, S = rot_ref.shape
    H = num_heads
    hd = C // H
    M = TB * S
    f32 = jnp.float32
    bf16 = jnp.bfloat16

    # condition_layer(area_ratio) in rows layout (C in lanes): cond = area * wc + bc.
    scale_rows = 1.0 + (area_ref[...] * wc_ref[...] + bc_ref[...])       # (TB, C) f32

    # channel-major -> rows ((b, s) rows, C lanes); transposes run on bf16 data.
    rot_rows = jnp.transpose(rot_ref[...], (0, 2, 1)).reshape(M, C)      # (M, C) bf16
    hori_rows3 = jnp.transpose(hori_ref[...], (0, 2, 1)).astype(f32)     # (TB, S, C) f32
    # Condition scaling in rows layout: C already in lanes, broadcast over S (sublanes).
    hori_adj = (hori_rows3 * scale_rows[:, None, :]).reshape(M, C)       # (M, C) f32

    # Projections on the MXU (bf16 operands, f32 accumulation), M = TB*S rows each.
    q = jnp.dot(rot_rows, wq_ref[...],
                preferred_element_type=f32) + bq_ref[...]                # (M, C), pre-scaled
    kv = jnp.dot(hori_adj.astype(bf16), wkv_ref[...],
                 preferred_element_type=f32) + bkv_ref[...]              # (M, 2C)

    # Head split via channel-major form; (TB, C, S) -> (TB*H, hd, S) is a tile-aligned
    # sublane regroup (free) for f32 data.
    q_cm = jnp.transpose(q.reshape(TB, S, C), (0, 2, 1))                 # (TB, C, S) f32
    q_t = q_cm.reshape(TB * H, hd, S)                                    # (TB*H, hd, S)
    kv_cm = jnp.transpose(kv.reshape(TB, S, 2 * C), (0, 2, 1))           # (TB, 2C, S) f32
    k_t = kv_cm[:, :C, :].reshape(TB * H, hd, S)                         # (TB*H, hd, S)
    v_t = kv_cm[:, C:, :].reshape(TB * H, hd, S)                         # (TB*H, hd, S)

    # Only Q needs the (S, hd)-minor form for the scores matmul.
    q_h = jnp.transpose(q_t, (0, 2, 1)).astype(bf16)                     # (TB*H, S, hd)

    # Attention scores + softmax (softmax math in f32).
    scores = jnp.einsum('bqd,bdk->bqk', q_h, k_t.astype(bf16),
                        preferred_element_type=f32)                      # (TB*H, S, S)
    scores = scores - jnp.max(scores, axis=-1, keepdims=True)
    p = jnp.exp(scores)
    denom = jnp.sum(p, axis=-1, keepdims=True)
    attn = (p * pl.reciprocal(denom, approx=True)).astype(bf16)

    # Attention output directly in per-head channel-major form.
    o_t = jnp.einsum('bdk,bqk->bdq', v_t.astype(bf16), attn,
                     preferred_element_type=f32)                         # (TB*H, hd, S)

    # Merge heads -> rows; cast to bf16 before the transpose (it feeds a bf16 matmul).
    o_rows = jnp.transpose(o_t.reshape(TB, C, S).astype(bf16),
                           (0, 2, 1)).reshape(M, C)                      # (M, C) bf16
    out = jnp.dot(o_rows, wo_ref[...],
                  preferred_element_type=f32) + bo_ref[...]              # (M, C) f32

    # Rows -> channel-major (TB, C, S) == (B, C, 7, 7) layout; no wrapper transpose.
    out_ref[...] = jnp.transpose(out.reshape(TB, S, C), (0, 2, 1)).astype(out_ref.dtype)


def _auto_vmem_limit():
    """~3/4 of physical VMEM, capped to 96 MiB (fits v6e/v5e raise, v7x's 64 MiB)."""
    try:
        cap = int(pltpu.get_tpu_info().vmem_capacity_bytes)
        if cap <= 0:
            raise ValueError(cap)
        return max(32 * 1024 * 1024, min((cap * 3) // 4, 96 * 1024 * 1024))
    except Exception:
        return 48 * 1024 * 1024


def self_attention_forward(rot_feats, hori_feats, area_ratio, params, num_heads,
                           block_b=32, vmem_limit_bytes=None):
    """rot_feats, hori_feats: (B, C, 7, 7) float32; area_ratio: (B,) float32."""
    B, C, Hs, Ws = rot_feats.shape
    S = Hs * Ws
    assert C % num_heads == 0
    head_dim = C // num_heads

    # Native channel-major layout (pure reshape); bf16 for the input DMA.
    rot_cm = rot_feats.reshape(B, C, S).astype(jnp.bfloat16)
    hori_cm = hori_feats.reshape(B, C, S).astype(jnp.bfloat16)
    area = area_ratio.reshape(B, 1).astype(jnp.float32)

    # Batch blocking: TB ROIs per grid step; keep grid even when >1 (megacore balance).
    if B <= block_b:
        TB, grid = B, 1
    else:
        TB = max(8, (block_b // 8) * 8)
        grid = pl.cdiv(B, TB)
        if grid % 2:
            grid += 1
    B_pad = TB * grid
    if B_pad != B:
        pad = B_pad - B
        rot_cm = jnp.pad(rot_cm, ((0, pad), (0, 0), (0, 0)))
        hori_cm = jnp.pad(hori_cm, ((0, pad), (0, 0), (0, 0)))
        area = jnp.pad(area, ((0, pad), (0, 0)))

    scale = 1.0 / float(head_dim) ** 0.5

    # PyTorch Linear stores W as (out, in); pre-transpose to (in, out).
    # Fold the 1/sqrt(head_dim) attention scale into the query projection.
    wq = (params['wq'].T * scale).astype(jnp.bfloat16)                                    # (C, C)
    bq = (params['bq'] * scale).reshape(1, C).astype(jnp.float32)
    wkv = jnp.concatenate([params['wk'].T, params['wv'].T], axis=1).astype(jnp.bfloat16)  # (C, 2C)
    bkv = jnp.concatenate([params['bk'], params['bv']]).reshape(1, 2 * C).astype(jnp.float32)
    wo = params['wo'].T.astype(jnp.bfloat16)                                              # (C, C)
    bo = params['bo'].reshape(1, C).astype(jnp.float32)
    wc = params['wc'].reshape(1, C).astype(jnp.float32)    # Linear(1,C) weight (C,1) -> (1,C)
    bc = params['bc'].reshape(1, C).astype(jnp.float32)

    if vmem_limit_bytes is None:
        vmem_limit_bytes = _auto_vmem_limit()

    kernel = functools.partial(_self_attention_kernel, num_heads=num_heads)

    blk_cm = pl.BlockSpec((TB, C, S), lambda i: (i, 0, 0))

    def full(shape):
        return pl.BlockSpec(shape, lambda i: (0,) * len(shape))

    out_cm = pl.pallas_call(
        kernel,
        out_shape=jax.ShapeDtypeStruct((B_pad, C, S), jnp.float32),
        grid_spec=pltpu.PrefetchScalarGridSpec(
            num_scalar_prefetch=0,
            grid=(grid,),
            in_specs=[
                pl.BlockSpec((TB, 1), lambda i: (i, 0)),     # area
                blk_cm,                                      # rot  (channel-major, bf16)
                blk_cm,                                      # hori (channel-major, bf16)
                full((C, C)), full((1, C)),                  # wq, bq (scaled)
                full((C, 2 * C)), full((1, 2 * C)),          # wkv, bkv (fused K|V)
                full((1, C)), full((1, C)),                  # wc, bc
                full((C, C)), full((1, C)),                  # wo, bo
            ],
            out_specs=blk_cm,
        ),
        compiler_params=pltpu.CompilerParams(
            dimension_semantics=("parallel",),
            vmem_limit_bytes=int(vmem_limit_bytes)),
    )(area, rot_cm, hori_cm, wq, bq, wkv, bkv, wc, bc, wo, bo)

    # (B, C, S) -> (B, C, 7, 7): a pure reshape (same bytes), no transpose needed.
    return out_cm[:B].reshape(B, C, Hs, Ws)


def _reference_forward(rot_feats, hori_feats, area_ratio, params, num_heads):
    """Pure-JAX f32 reference matching the PyTorch module."""
    B, C, Hs, Ws = rot_feats.shape
    S = Hs * Ws
    hd = C // num_heads
    rot = rot_feats.reshape(B, C, S).transpose(0, 2, 1)            # (B, S, C)
    hori = hori_feats.reshape(B, C, S).transpose(0, 2, 1)
    cond = area_ratio[:, None] * params['wc'][:, 0][None, :] + params['bc'][None, :]
    hori_adj = hori * (1.0 + cond[:, None, :])
    q = rot @ params['wq'].T + params['bq']
    k = hori_adj @ params['wk'].T + params['bk']
    v = hori_adj @ params['wv'].T + params['bv']

    def split(x):
        return x.reshape(B, S, num_heads, hd).transpose(0, 2, 1, 3)

    qh, kh, vh = split(q), split(k), split(v)
    scores = (qh @ kh.transpose(0, 1, 3, 2)) / (hd ** 0.5)
    attn = jax.nn.softmax(scores, axis=-1)
    o = (attn @ vh).transpose(0, 2, 1, 3).reshape(B, S, C)
    out = o @ params['wo'].T + params['bo']
    return out.transpose(0, 2, 1).reshape(B, C, Hs, Ws)


def init_params(key, input_dim):
    ks = jax.random.split(key, 10)
    scale = 0.05
    return {
        'wq': scale * jax.random.normal(ks[0], (input_dim, input_dim), jnp.float32),
        'bq': scale * jax.random.normal(ks[1], (input_dim,), jnp.float32),
        'wk': scale * jax.random.normal(ks[2], (input_dim, input_dim), jnp.float32),
        'bk': scale * jax.random.normal(ks[3], (input_dim,), jnp.float32),
        'wv': scale * jax.random.normal(ks[4], (input_dim, input_dim), jnp.float32),
        'bv': scale * jax.random.normal(ks[5], (input_dim,), jnp.float32),
        'wc': scale * jax.random.normal(ks[6], (input_dim, 1), jnp.float32),
        'bc': scale * jax.random.normal(ks[7], (input_dim,), jnp.float32),
        'wo': scale * jax.random.normal(ks[8], (input_dim, input_dim), jnp.float32),
        'bo': scale * jax.random.normal(ks[9], (input_dim,), jnp.float32),
    }


if __name__ == "__main__":
    key = jax.random.PRNGKey(0)
    k_rot, k_hori, k_area, k_params = jax.random.split(key, 4)

    B, C, H, W = 2, 32, 7, 7      # input_dim = 32, spatial fixed at 7x7 by the module
    num_heads = 4

    rot_feats = jax.random.normal(k_rot, (B, C, H, W), jnp.float32)
    hori_feats = jax.random.normal(k_hori, (B, C, H, W), jnp.float32)
    area_ratio = jax.random.uniform(k_area, (B,), jnp.float32)

    params = init_params(k_params, C)

    out = self_attention_forward(rot_feats, hori_feats, area_ratio, params, num_heads)
    out = jax.block_until_ready(out)
    assert out.shape == (B, C, 7, 7)
    assert bool(jnp.all(jnp.isfinite(out)))

    # Tolerance check vs. pure-JAX f32 reference (bf16 MXU + approx reciprocal => loose tol).
    ref = _reference_forward(rot_feats, hori_feats, area_ratio, params, num_heads)
    max_err = float(jnp.max(jnp.abs(out - ref)))
    assert max_err < 5e-2, f"max abs error {max_err}"

    print("KERNEL_OK")
</pallas_src>

<mosaic_0001>
module attributes {stable_mosaic.version = 11 : i64} {
  func.func @_self_attention_kernel(%arg0: i32, %arg1: memref<2x1xf32, #tpu.memory_space<vmem>>, %arg2: memref<2x32x49xbf16, #tpu.memory_space<vmem>>, %arg3: memref<2x32x49xbf16, #tpu.memory_space<vmem>>, %arg4: memref<32x32xbf16, #tpu.memory_space<vmem>>, %arg5: memref<1x32xf32, #tpu.memory_space<vmem>>, %arg6: memref<32x64xbf16, #tpu.memory_space<vmem>>, %arg7: memref<1x64xf32, #tpu.memory_space<vmem>>, %arg8: memref<1x32xf32, #tpu.memory_space<vmem>>, %arg9: memref<1x32xf32, #tpu.memory_space<vmem>>, %arg10: memref<32x32xbf16, #tpu.memory_space<vmem>>, %arg11: memref<1x32xf32, #tpu.memory_space<vmem>>, %arg12: memref<2x32x49xf32, #tpu.memory_space<vmem>>) attributes {dimension_semantics = [#tpu.dimension_semantics<parallel>], iteration_bounds = array<i64: 1>, scalar_prefetch = 0 : i64, scratch_operands = 0 : i64, tpu.core_type = #tpu.core_type<tc>, window_params = [{transform_indices = @transform_0, window_bounds = array<i64: 2, 1>}, {transform_indices = @transform_1, window_bounds = array<i64: 2, 32, 49>}, {transform_indices = @transform_2, window_bounds = array<i64: 2, 32, 49>}, {pipeline_mode = #tpu.pipeline_mode<synchronous>, transform_indices = @transform_3, window_bounds = array<i64: 32, 32>}, {pipeline_mode = #tpu.pipeline_mode<synchronous>, transform_indices = @transform_4, window_bounds = array<i64: 1, 32>}, {pipeline_mode = #tpu.pipeline_mode<synchronous>, transform_indices = @transform_5, window_bounds = array<i64: 32, 64>}, {pipeline_mode = #tpu.pipeline_mode<synchronous>, transform_indices = @transform_6, window_bounds = array<i64: 1, 64>}, {pipeline_mode = #tpu.pipeline_mode<synchronous>, transform_indices = @transform_7, window_bounds = array<i64: 1, 32>}, {pipeline_mode = #tpu.pipeline_mode<synchronous>, transform_indices = @transform_8, window_bounds = array<i64: 1, 32>}, {pipeline_mode = #tpu.pipeline_mode<synchronous>, transform_indices = @transform_9, window_bounds = array<i64: 32, 32>}, {pipeline_mode = #tpu.pipeline_mode<synchronous>, transform_indices = @transform_10, window_bounds = array<i64: 1, 32>}, {transform_indices = @transform_11, window_bounds = array<i64: 2, 32, 49>}]} {
    %c0 = arith.constant 0 : index
    %c0_0 = arith.constant 0 : index
    %0 = vector.load %arg1[%c0, %c0_0] : memref<2x1xf32, #tpu.memory_space<vmem>>, vector<2x1xf32>
    %c0_1 = arith.constant 0 : index
    %c0_2 = arith.constant 0 : index
    %1 = vector.load %arg8[%c0_1, %c0_2] : memref<1x32xf32, #tpu.memory_space<vmem>>, vector<1x32xf32>
    %2 = vector.broadcast %0 : vector<2x1xf32> to vector<2x32xf32>
    %3 = vector.broadcast %1 : vector<1x32xf32> to vector<2x32xf32>
    %4 = arith.mulf %2, %3 : vector<2x32xf32>
    %c0_3 = arith.constant 0 : index
    %c0_4 = arith.constant 0 : index
    %5 = vector.load %arg9[%c0_3, %c0_4] : memref<1x32xf32, #tpu.memory_space<vmem>>, vector<1x32xf32>
    %6 = vector.broadcast %5 : vector<1x32xf32> to vector<2x32xf32>
    %7 = arith.addf %4, %6 : vector<2x32xf32>
    %cst = arith.constant 1.000000e+00 : f32
    %8 = vector.broadcast %cst : f32 to vector<2x32xf32>
    %9 = arith.addf %8, %7 : vector<2x32xf32>
    %c0_5 = arith.constant 0 : index
    %c0_6 = arith.constant 0 : index
    %c0_7 = arith.constant 0 : index
    %10 = vector.load %arg2[%c0_5, %c0_6, %c0_7] : memref<2x32x49xbf16, #tpu.memory_space<vmem>>, vector<2x32x49xbf16>
    %11 = tpu.transpose %10, [0, 2, 1] : vector<2x32x49xbf16> -> vector<2x49x32xbf16>
    %12 = vector.shape_cast %11 : vector<2x49x32xbf16> to vector<98x32xbf16>
    %c0_8 = arith.constant 0 : index
    %c0_9 = arith.constant 0 : index
    %c0_10 = arith.constant 0 : index
    %13 = vector.load %arg3[%c0_8, %c0_9, %c0_10] : memref<2x32x49xbf16, #tpu.memory_space<vmem>>, vector<2x32x49xbf16>
    %14 = tpu.transpose %13, [0, 2, 1] : vector<2x32x49xbf16> -> vector<2x49x32xbf16>
    %15 = arith.extf %14 : vector<2x49x32xbf16> to vector<2x49x32xf32>
    %16 = vector.shape_cast %9 : vector<2x32xf32> to vector<2x1x32xf32>
    %17 = vector.broadcast %16 : vector<2x1x32xf32> to vector<2x49x32xf32>
    %18 = arith.mulf %15, %17 : vector<2x49x32xf32>
    %19 = vector.shape_cast %18 : vector<2x49x32xf32> to vector<98x32xf32>
    %c0_11 = arith.constant 0 : index
    %c0_12 = arith.constant 0 : index
    %20 = vector.load %arg4[%c0_11, %c0_12] : memref<32x32xbf16, #tpu.memory_space<vmem>>, vector<32x32xbf16>
    %cst_13 = arith.constant dense<0.000000e+00> : vector<98x32xf32>
    %21 = tpu.matmul %12, %20, %cst_13 {dimension_numbers = #tpu.dot_dimension_numbers<[1], [0], [0], [1], [0, 0, 1, 1], [], []>} : vector<98x32xbf16>, vector<32x32xbf16>, vector<98x32xf32> -> vector<98x32xf32>
    %c0_14 = arith.constant 0 : index
    %c0_15 = arith.constant 0 : index
    %22 = vector.load %arg5[%c0_14, %c0_15] : memref<1x32xf32, #tpu.memory_space<vmem>>, vector<1x32xf32>
    %23 = vector.broadcast %22 : vector<1x32xf32> to vector<98x32xf32>
    %24 = arith.addf %21, %23 : vector<98x32xf32>
    %25 = arith.truncf %19 : vector<98x32xf32> to vector<98x32xbf16>
    %c0_16 = arith.constant 0 : index
    %c0_17 = arith.constant 0 : index
    %26 = vector.load %arg6[%c0_16, %c0_17] : memref<32x64xbf16, #tpu.memory_space<vmem>>, vector<32x64xbf16>
    %cst_18 = arith.constant dense<0.000000e+00> : vector<98x64xf32>
    %27 = tpu.matmul %25, %26, %cst_18 {dimension_numbers = #tpu.dot_dimension_numbers<[1], [0], [0], [1], [0, 0, 1, 1], [], []>} : vector<98x32xbf16>, vector<32x64xbf16>, vector<98x64xf32> -> vector<98x64xf32>
    %c0_19 = arith.constant 0 : index
    %c0_20 = arith.constant 0 : index
    %28 = vector.load %arg7[%c0_19, %c0_20] : memref<1x64xf32, #tpu.memory_space<vmem>>, vector<1x64xf32>
    %29 = vector.broadcast %28 : vector<1x64xf32> to vector<98x64xf32>
    %30 = arith.addf %27, %29 : vector<98x64xf32>
    %31 = vector.shape_cast %24 : vector<98x32xf32> to vector<2x49x32xf32>
    %32 = tpu.transpose %31, [0, 2, 1] : vector<2x49x32xf32> -> vector<2x32x49xf32>
    %33 = vector.shape_cast %32 : vector<2x32x49xf32> to vector<8x8x49xf32>
    %34 = vector.shape_cast %30 : vector<98x64xf32> to vector<2x49x64xf32>
    %35 = tpu.transpose %34, [0, 2, 1] : vector<2x49x64xf32> -> vector<2x64x49xf32>
    %36 = vector.extract_strided_slice %35 {offsets = [0, 0, 0], sizes = [2, 32, 49], strides = [1, 1, 1]} : vector<2x64x49xf32> to vector<2x32x49xf32>
    %37 = vector.shape_cast %36 : vector<2x32x49xf32> to vector<8x8x49xf32>
    %38 = vector.extract_strided_slice %35 {offsets = [0, 32, 0], sizes = [2, 32, 49], strides = [1, 1, 1]} : vector<2x64x49xf32> to vector<2x32x49xf32>
    %39 = vector.shape_cast %38 : vector<2x32x49xf32> to vector<8x8x49xf32>
    %40 = tpu.transpose %33, [0, 2, 1] : vector<8x8x49xf32> -> vector<8x49x8xf32>
    %41 = arith.truncf %40 : vector<8x49x8xf32> to vector<8x49x8xbf16>
    %42 = arith.truncf %37 : vector<8x8x49xf32> to vector<8x8x49xbf16>
    "tpu.trace_start"() <{level = 10 : i32, message = "bqd,bdk->bqk"}> : () -> ()
    %cst_21 = arith.constant dense<0.000000e+00> : vector<8x49x49xf32>
    %43 = tpu.matmul %41, %42, %cst_21 {dimension_numbers = #tpu.dot_dimension_numbers<[2], [1], [1], [2], [0, 0, 0, 1, 1, 2], [0], [0]>} : vector<8x49x8xbf16>, vector<8x8x49xbf16>, vector<8x49x49xf32> -> vector<8x49x49xf32>
    "tpu.trace_stop"() : () -> ()
    %cst_22 = arith.constant dense<0xFF800000> : vector<8x49xf32>
    %44 = vector.multi_reduction <maximumf>, %43, %cst_22 [2] : vector<8x49x49xf32> to vector<8x49xf32>
    %45 = vector.shape_cast %44 : vector<8x49xf32> to vector<8x49x1xf32>
    %46 = vector.broadcast %45 : vector<8x49x1xf32> to vector<8x49x49xf32>
    %47 = arith.subf %43, %46 : vector<8x49x49xf32>
    %48 = math.exp %47 : vector<8x49x49xf32>
    %cst_23 = arith.constant dense<0.000000e+00> : vector<8x49xf32>
    %49 = vector.multi_reduction <add>, %48, %cst_23 [2] : vector<8x49x49xf32> to vector<8x49xf32>
    %50 = vector.shape_cast %49 : vector<8x49xf32> to vector<8x49x1xf32>
    %51 = tpu.reciprocal %50 {approx = true} : vector<8x49x1xf32> -> vector<8x49x1xf32>
    %52 = vector.broadcast %51 : vector<8x49x1xf32> to vector<8x49x49xf32>
    %53 = arith.mulf %48, %52 : vector<8x49x49xf32>
    %54 = arith.truncf %53 : vector<8x49x49xf32> to vector<8x49x49xbf16>
    %55 = arith.truncf %39 : vector<8x8x49xf32> to vector<8x8x49xbf16>
    "tpu.trace_start"() <{level = 10 : i32, message = "bdk,bqk->bdq"}> : () -> ()
    %cst_24 = arith.constant dense<0.000000e+00> : vector<8x8x49xf32>
    %56 = tpu.matmul %55, %54, %cst_24 {dimension_numbers = #tpu.dot_dimension_numbers<[2], [2], [1], [1], [0, 0, 0, 1, 1, 1], [0], [0]>} : vector<8x8x49xbf16>, vector<8x49x49xbf16>, vector<8x8x49xf32> -> vector<8x8x49xf32>
    "tpu.trace_stop"() : () -> ()
    %57 = vector.shape_cast %56 : vector<8x8x49xf32> to vector<2x32x49xf32>
    %58 = arith.truncf %57 : vector<2x32x49xf32> to vector<2x32x49xbf16>
    %59 = tpu.transpose %58, [0, 2, 1] : vector<2x32x49xbf16> -> vector<2x49x32xbf16>
    %60 = vector.shape_cast %59 : vector<2x49x32xbf16> to vector<98x32xbf16>
    %c0_25 = arith.constant 0 : index
    %c0_26 = arith.constant 0 : index
    %61 = vector.load %arg10[%c0_25, %c0_26] : memref<32x32xbf16, #tpu.memory_space<vmem>>, vector<32x32xbf16>
    %cst_27 = arith.constant dense<0.000000e+00> : vector<98x32xf32>
    %62 = tpu.matmul %60, %61, %cst_27 {dimension_numbers = #tpu.dot_dimension_numbers<[1], [0], [0], [1], [0, 0, 1, 1], [], []>} : vector<98x32xbf16>, vector<32x32xbf16>, vector<98x32xf32> -> vector<98x32xf32>
    %c0_28 = arith.constant 0 : index
    %c0_29 = arith.constant 0 : index
    %63 = vector.load %arg11[%c0_28, %c0_29] : memref<1x32xf32, #tpu.memory_space<vmem>>, vector<1x32xf32>
    %64 = vector.broadcast %63 : vector<1x32xf32> to vector<98x32xf32>
    %65 = arith.addf %62, %64 : vector<98x32xf32>
    %66 = vector.shape_cast %65 : vector<98x32xf32> to vector<2x49x32xf32>
    %67 = tpu.transpose %66, [0, 2, 1] : vector<2x49x32xf32> -> vector<2x32x49xf32>
    %c0_30 = arith.constant 0 : index
    %c0_31 = arith.constant 0 : index
    %c0_32 = arith.constant 0 : index
    %68 = vector.load %arg12[%c0_30, %c0_31, %c0_32] : memref<2x32x49xf32, #tpu.memory_space<vmem>>, vector<2x32x49xf32>
    tpu.vector_store %arg12[%c0_30, %c0_31, %c0_32], %67 {strides = array<i32>} : memref<2x32x49xf32, #tpu.memory_space<vmem>>, vector<2x32x49xf32>,
    return
  }
  func.func @transform_0(%arg0: i32) -> (i32, i32) {
    %c0_i32 = arith.constant 0 : i32
    %c0_i32_0 = arith.constant 0 : i32
    return %arg0, %c0_i32 : i32, i32
  }
  func.func @transform_1(%arg0: i32) -> (i32, i32, i32) {
    %c0_i32 = arith.constant 0 : i32
    %c0_i32_0 = arith.constant 0 : i32
    %c0_i32_1 = arith.constant 0 : i32
    return %arg0, %c0_i32, %c0_i32_0 : i32, i32, i32
  }
  func.func @transform_2(%arg0: i32) -> (i32, i32, i32) {
    %c0_i32 = arith.constant 0 : i32
    %c0_i32_0 = arith.constant 0 : i32
    %c0_i32_1 = arith.constant 0 : i32
    return %arg0, %c0_i32, %c0_i32_0 : i32, i32, i32
  }
  func.func @transform_3(%arg0: i32) -> (i32, i32) {
    %c0_i32 = arith.constant 0 : i32
    %c0_i32_0 = arith.constant 0 : i32
    %c0_i32_1 = arith.constant 0 : i32
    return %c0_i32, %c0_i32_0 : i32, i32
  }
  func.func @transform_4(%arg0: i32) -> (i32, i32) {
    %c0_i32 = arith.constant 0 : i32
    %c0_i32_0 = arith.constant 0 : i32
    %c0_i32_1 = arith.constant 0 : i32
    return %c0_i32, %c0_i32_0 : i32, i32
  }
  func.func @transform_5(%arg0: i32) -> (i32, i32) {
    %c0_i32 = arith.constant 0 : i32
    %c0_i32_0 = arith.constant 0 : i32
    %c0_i32_1 = arith.constant 0 : i32
    return %c0_i32, %c0_i32_0 : i32, i32
  }
  func.func @transform_6(%arg0: i32) -> (i32, i32) {
    %c0_i32 = arith.constant 0 : i32
    %c0_i32_0 = arith.constant 0 : i32
    %c0_i32_1 = arith.constant 0 : i32
    return %c0_i32, %c0_i32_0 : i32, i32
  }
  func.func @transform_7(%arg0: i32) -> (i32, i32) {
    %c0_i32 = arith.constant 0 : i32
    %c0_i32_0 = arith.constant 0 : i32
    %c0_i32_1 = arith.constant 0 : i32
    return %c0_i32, %c0_i32_0 : i32, i32
  }
  func.func @transform_8(%arg0: i32) -> (i32, i32) {
    %c0_i32 = arith.constant 0 : i32
    %c0_i32_0 = arith.constant 0 : i32
    %c0_i32_1 = arith.constant 0 : i32
    return %c0_i32, %c0_i32_0 : i32, i32
  }
  func.func @transform_9(%arg0: i32) -> (i32, i32) {
    %c0_i32 = arith.constant 0 : i32
    %c0_i32_0 = arith.constant 0 : i32
    %c0_i32_1 = arith.constant 0 : i32
    return %c0_i32, %c0_i32_0 : i32, i32
  }
  func.func @transform_10(%arg0: i32) -> (i32, i32) {
    %c0_i32 = arith.constant 0 : i32
    %c0_i32_0 = arith.constant 0 : i32
    %c0_i32_1 = arith.constant 0 : i32
    return %c0_i32, %c0_i32_0 : i32, i32
  }
  func.func @transform_11(%arg0: i32) -> (i32, i32, i32) {
    %c0_i32 = arith.constant 0 : i32
    %c0_i32_0 = arith.constant 0 : i32
    %c0_i32_1 = arith.constant 0 : i32
    return %arg0, %c0_i32, %c0_i32_0 : i32, i32, i32
  }
}

</mosaic_0001>

<bundles_post_ra>
// kernel: tpu_custom_call.1
= control target key start
LH: loop header
LB: loop body
LE: loop exit
PB: predicated region body
PF: predicated region fallthrough
CT: control target
= control target key end

     0   :  { %16 = vsyncpa [#allocation3], 0  ;;  %s13360_s0 = inlined_call_operand.vmem [shape: f32[2,1], index: 0, kind: input, shape index: {}]   ;;  %s13361_s1 = inlined_call_operand.hbm [shape: bf16[2,32,49], index: 1, kind: input, shape index: {}]   ;;  %s13362_s2 = inlined_call_operand.hbm [shape: bf16[2,32,49], index: 2, kind: input, shape index: {}]   ;;  %s13363_s3 = inlined_call_operand.hbm [shape: bf16[32,32], index: 3, kind: input, shape index: {}]   ;;  %s13364_s4 = inlined_call_operand.vmem [shape: f32[1,32], index: 4, kind: input, shape index: {}]   ;;  %s13365_s5 = inlined_call_operand.hbm [shape: bf16[32,64], index: 5, kind: input, shape index: {}]   ;;  %s13366_s6 = inlined_call_operand.vmem [shape: f32[1,64], index: 6, kind: input, shape index: {}]   ;;  %s13367_s7 = inlined_call_operand.vmem [shape: f32[1,32], index: 7, kind: input, shape index: {}]   ;;  %s13368_s8 = inlined_call_operand.hbm [shape: f32[1,32], index: 8, kind: input, shape index: {}]   ;;  %s13369_s9 = inlined_call_operand.vmem [shape: bf16[32,32], index: 9, kind: input, shape index: {}]   ;;  %s13370_s10 = inlined_call_operand.vmem [shape: f32[1,32], index: 10, kind: input, shape index: {}]   ;;  %s13371_s11 = inlined_call_operand.hbm [shape: f32[2,32,49], index: 11, kind: output, shape index: {}]  }
   0x1   :  { %17 = vsyncpa [#allocation6], 0 }
   0x2   :  { %18 = vsyncpa [#allocation9], 0 }
   0x3   :  { %19 = vsyncpa [#allocation4], 0  ;;  %s10690_s17 = smov [#allocation5]   ;;  %s10691_s19 = smov [#allocation8]  }
   0x4   :  { %s39_s18 = sshll.u32 %s10690_s17, 4  ;;  %s65_s20 = sshll.u32 %s10691_s19, 4  ;;  %s40_s18 = int_to_ptr.vmem [resolvable:$true] %s39_s18  ;;  %s66_s20 = int_to_ptr.vmem [resolvable:$true] %s65_s20 }
   0x5   :  { %s10570_s21 = scalar_lea.vmem %s40_s18, 512  ;;  %p10575_p1 = scmp.lt.s32.totalorder %s40_s18, %s40_s18 }
   0x6   :  { %p10571_p0 = scmp.ne.s32.totalorder %s40_s18, %s10570_s21  ;;  %p10576_p2 = scmp.lt.s32.totalorder %s10570_s21, %s10570_s21 }
   0x8   :  { %p10577_p3 = por %p10576_p2, %p10575_p1 }
   0xa   :  { %p10578_p4 = pnand %p10577_p3, %p10571_p0 }
   0xc   :  { %10581 = shalt.err (!%p10578_p4)
}
   0xd   :  { %s10692_s22 = smov 64   ;;  %s10693_s23 = smov 4  }
   0xe   :  { %45 = dma.hbm_to_vmem [thread:$0]  %s13362_s2, 512, %s40_s18, [#allocation6], %s10692_s22, %s10692_s22, %s10693_s23  }
   0xf   :  { %s10590_s26 = scalar_lea.vmem %s66_s20, 256  ;;  %p10595_p6 = scmp.lt.s32.totalorder %s66_s20, %s66_s20 }
  0x10   :  { %p10591_p5 = scmp.ne.s32.totalorder %s66_s20, %s10590_s26  ;;  %p10596_p7 = scmp.lt.s32.totalorder %s10590_s26, %s10590_s26 }
  0x12   :  { %p10597_p8 = por %p10596_p7, %p10595_p6 }
  0x14   :  { %p10598_p9 = pnand %p10597_p8, %p10591_p5 }
  0x16   :  { %10601 = shalt.err (!%p10598_p9)
}
  0x17   :  { %71 = dma.hbm_to_vmem [thread:$0]  %s13365_s5, 256, %s66_s20, [#allocation9], %s10692_s22, %s10692_s22, %s10693_s23  }
  0x18   :  { %s10694_s29 = smov [#allocation2]   ;;  %s10695_s12 = smov [#allocation7]  }
  0x19   :  { %s27_s30 = sshll.u32 %s10694_s29, 4  ;;  %s51_s13 = sshll.u32 %s10695_s12, 4  ;;  %s28_s30 = int_to_ptr.vmem [resolvable:$true] %s27_s30  ;;  %s52_s13 = int_to_ptr.vmem [resolvable:$true] %s51_s13 }
  0x1a   :  { %s10610_s2 = scalar_lea.vmem %s28_s30, 512  ;;  %p10615_p11 = scmp.lt.s32.totalorder %s28_s30, %s28_s30 }
  0x1b   :  { %p10611_p10 = scmp.ne.s32.totalorder %s28_s30, %s10610_s2  ;;  %p10616_p12 = scmp.lt.s32.totalorder %s10610_s2, %s10610_s2 }
  0x1d   :  { %p10617_p13 = por %p10616_p12, %p10615_p11 }
  0x1f   :  { %p10618_p0 = pnand %p10617_p13, %p10611_p10 }
  0x21   :  { %10621 = shalt.err (!%p10618_p0)
}
  0x22   :  { %33 = dma.hbm_to_vmem [thread:$0]  %s13361_s1, 512, %s28_s30, [#allocation3], %s10692_s22, %s10692_s22, %s10693_s23  }
  0x23   :  { %s10630_s5 = scalar_lea.vmem %s52_s13, 256  ;;  %p10635_p2 = scmp.lt.s32.totalorder %s52_s13, %s52_s13 }
  0x24   :  { %p10631_p1 = scmp.ne.s32.totalorder %s52_s13, %s10630_s5  ;;  %p10636_p3 = scmp.lt.s32.totalorder %s10630_s5, %s10630_s5 }
  0x26   :  { %p10637_p4 = por %p10636_p3, %p10635_p2 }
  0x28   :  { %p10638_p5 = pnand %p10637_p4, %p10631_p1 }
  0x2a   :  { %10641 = shalt.err (!%p10638_p5)
}
  0x2b   :  { %57 = dma.hbm_to_vmem [thread:$0]  %s13363_s3, 256, %s52_s13, [#allocation6], %s10692_s22, %s10692_s22, %s10693_s23  }
  0x2c   :  { %s10696_s18 = smov [#allocation10]  }
  0x2d   :  { %s82_s19 = sshll.u32 %s10696_s18, 4  ;;  %s83_s19 = int_to_ptr.vmem [resolvable:$true] %s82_s19 }
  0x2e   :  { %s10650_s20 = scalar_lea.vmem %s83_s19, 16  ;;  %s10654_s1 = scalar_lea.vmem %s83_s19, 32 }
  0x2f   :  { %p10651_p6 = scmp.ne.s32.totalorder %s83_s19, %s10650_s20  ;;  %p10655_p7 = scmp.lt.s32.totalorder %s83_s19, %s83_s19 }
  0x30   :  { %p10656_p8 = scmp.lt.s32.totalorder %s10654_s1, %s10650_s20 }
  0x32   :  { %p10657_p9 = por %p10656_p8, %p10655_p7 }
  0x34   :  { %p10658_p10 = pnand %p10657_p9, %p10651_p6 }
  0x36   :  { %10661 = shalt.err (!%p10658_p10)
}
  0x37   :  { %85 = dma.hbm_to_vmem [thread:$0]  %s13368_s8, 16, %s83_s19, [#allocation9]  }
  0x38   :  { %10682 = dma.done.wait [#allocation3], 512  }
  0x39   :  { %10683 = vsyncadd [#allocation3], 4294966784 }
  0x3a   :  { %10684 = dma.done.wait [#allocation6], 768  }
  0x3b   :  { %10685 = vsyncadd [#allocation6], 4294966528 }
  0x3c   :  { %10686 = dma.done.wait [#allocation9], 272  }
  0x3d   :  { %10687 = vsyncadd [#allocation9], 4294967024  ;;  %v10697_v0 = vmov 0   ;;  %v106_v1 = vld [vmem:[%s13360_s0] sm:$0x3]  ;;  %v10325_v3 = vld [vmem:[#allocation2 + $0x18] sm:$0xff]   ;;  %v205_v15 = vlaneseq }
  0x3e   :  { %10175 = vset.pattern.permute.xlu0 %v10697_v0  ;;  %v10324_v2 = vld [vmem:[#allocation2 + $0x10] sm:$0xff]   ;;  %v13372_v4 = vmov 0.0   ;;  %v10332_v5 = vld [vmem:[#allocation7 + $0x8] sm:$0xff]   ;;  %v10326_v6 = vld [vmem:[#allocation5] sm:$0xff]   ;;  %vm10699_vm0 = vmmov 0   ;;  %vm1756_vm1 = vcmask 261120  }
  0x3f   :  { %110 = vperm.xlu0 %10175, %v106_v1   ;;  %177 = vxpose.xlu1.c.b16.start [1/2] (short) (narrow) %v10324_v2, 64  ;;  %v10333_v7 = vld [vmem:[#allocation7] sm:$0xff]   ;;  %v10327_v8 = vld [vmem:[#allocation5 + $0x8] sm:$0xff]   ;;  %v10329_v9 = vld [vmem:[#allocation5 + $0x10] sm:$0xff]   ;;  %v10700_v13 = vmov 1966171168  }
  0x40   :  { %10149 = vmatprep.subr.bf16.mxu1 %v13372_v4  ;;  %9877 = vmatprep.subr.bf16.mxu0 %v13372_v4  ;;  %v10328_v10 = vld [vmem:[#allocation2] sm:$0xff]   ;;  %v10331_v11 = vld [vmem:[#allocation5 + $0x18] sm:$0xff]   ;;  %v10330_v12 = vld [vmem:[#allocation2 + $0x8] sm:$0xff]   ;;  %v203_v14 = vunpack.c.l.s4 %v10700_v13  ;;  %v10803_v17 = vshrl.u32 %v205_v15, 7  ;;  %vm5564_vm2 = vcmask 1043456   ;;  %vm5551_vm3 = vcmask 64512  }
  0x41   :  { %10151 = vmatpush3.bf16.msra.mxu1 %v10332_v5  ;;  %9878 = vmatpush3.bf16.msra.mxu0 %v10332_v5  ;;  %v9580_v5 = vld [vmem:[%s13367_s7] ss:$0 sm:$0xff]  ;;  %v9581_v15 = vld [vmem:[#allocation10] ss:$0 sm:$0xff]  ;;  %vm6185_vm4 = vcmask 400384   ;;  %vm6204_vm5 = vcmask 393216  }
  0x42   :  { %10150 = vmatprep.subr.bf16.mxu1 %v13372_v4  ;;  %9879 = vmatprep.subr.bf16.mxu0 %v13372_v4  ;;  %v204_v16 = vunpack.c.0.s8 %v203_v14  ;;  %v724_v46 = vsub.s32 0, %v10803_v17 }
  0x43   :  { %178 = vxpose.xlu1.c.b16.end [2/2] (short) (narrow) %v10325_v3, 64  ;;  %9897 = vmatprep.mubr.msk.bf16.mxu1 %vm10699_vm0, %v13372_v4 }
  0x44   :  { %9881 = vmatprep.mubr.msk.bf16.mxu0 %vm10699_vm0, %v13372_v4  ;;  %v10806_v19 = vsub.s32 %v204_v16, %v10803_v17 }
  0x45   :  { %10152 = vmatpush3.bf16.msra.mxu1 %v10333_v7  ;;  %9880 = vmatpush3.bf16.msra.mxu0 %v10333_v7 }
  0x46   :  { %9909 = vmatprep.subr.bf16.mxu1 %v13372_v4  ;;  %13404 = vst [vmem:[#allocation16_spill] sm:$0xff] %v10806_v19 }
  0x4c   :  { %653 = vxpose.xlu1.c.b16.start [1/2] (short) (narrow) %v10326_v6, 64 }
  0x50   :  { %654 = vxpose.xlu1.c.b16.end [2/2] (short) (narrow) %v10327_v8, 64 }
  0x59   :  { %669 = vxpose.xlu1.c.b16.start [1/2] (short) (narrow) %v10329_v9, 64 }
  0x5d   :  { %161 = vxpose.xlu0.c.b16.start [1/2] (short) (narrow) %v10328_v10, 64  ;;  %670 = vxpose.xlu1.c.b16.end [2/2] (short) (narrow) %v10331_v11, 64 }
  0x61   :  { %162 = vxpose.xlu0.c.b16.end [2/2] (short) (narrow) %v10330_v12, 64 }
  0xa1   :  { %v185_v18 = vpop.trf.xlu1 }
  0xa2   :  { %v362_v20 = vcombine.high %v185_v18, %v185_v18  ;;  %v369_v22 = vrot.slane %v185_v18, %v10806_v19 }
  0xa4   :  { %v376_v23 = vrot.slane %v362_v20, %v10806_v19  ;;  %v377_v25 = vcombine.high %v369_v22, %v369_v22  ;;  %v10812_v29 = vrot.slane %v369_v22, %v10806_v19 }
  0xa5   :  { %v186_v21 = vpop.trf.xlu1 }
  0xa6   :  { %v418_v26 = vrot.slane %v186_v21, %v10806_v19  ;;  %v378_v27 = vcombine.high %v376_v23, %v376_v23  ;;  %v411_v28 = vcombine.high %v186_v21, %v186_v21  ;;  %v10817_v31 = vrot.slane %v377_v25, %v10806_v19 }
  0xa7   :  { %v392_v35 = vrot.slane %v376_v23, %v10806_v19  ;;  %v407_v36 = vcombine.high %v10812_v29, %v10812_v29 }
  0xa8   :  { %v426_v32 = vcombine.high %v418_v26, %v418_v26  ;;  %v406_v33 = vrot.slane %v378_v27, %v10806_v19  ;;  %v425_v34 = vrot.slane %v411_v28, %v10806_v19  ;;  %v434_v37 = vrot.slane %v418_v26, %v10806_v19 }
  0xa9   :  { %v187_v24 = vpop.trf.xlu1  ;;  %v409_v38 = vcombine.high %v10817_v31, %v10817_v31  ;;  %v408_v44 = vcombine.high %v392_v35, %v392_v35  ;;  %v575_v48 = vunpack.i.h.s16 %v10817_v31  ;;  %v577_v49 = vunpack.i.h.s16 %v407_v36 }
  0xaa   :  { %v448_v39 = vrot.slane %v426_v32, %v10806_v19  ;;  %v410_v40 = vcombine.high %v406_v33, %v406_v33  ;;  %v427_v41 = vcombine.high %v425_v34, %v425_v34  ;;  %v441_v42 = vrot.slane %v425_v34, %v10806_v19 }
  0xab   :  { %v460_v45 = vcombine.high %v187_v24, %v187_v24  ;;  %v456_v50 = vcombine.high %v434_v37, %v434_v37  ;;  %v579_v51 = vunpack.i.h.s16 %v409_v38  ;;  %v581_v52 = vunpack.i.h.s16 %v392_v35 }
  0xac   :  { %v458_v53 = vcombine.high %v448_v39, %v448_v39  ;;  %v467_v54 = vrot.slane %v187_v24, %v10806_v19  ;;  %v583_v55 = vunpack.i.h.s16 %v406_v33  ;;  %v587_v56 = vunpack.i.h.s16 %v410_v40 }
  0xad   :  { %v10814_v30 = vpop.trf.xlu1  ;;  %v455_v57 = vrot.slane %v427_v41, %v10806_v19  ;;  %v457_v58 = vcombine.high %v441_v42, %v441_v42  ;;  %v585_v59 = vunpack.i.h.s16 %v408_v44  ;;  %v589_v60 = vunpack.i.h.s16 %v434_v37 }
  0xae   :  { %v591_v61 = vunpack.i.h.s16 %v448_v39  ;;  %v474_v62 = vrot.slane %v460_v45, %v10806_v19  ;;  %v10837_v63 = vpack.i.b16 %v407_v36, %v575_v48  ;;  %v10839_v0 = vpack.i.b16 %v409_v38, %v577_v49 }
  0xaf   :  { %v593_v1 = vunpack.i.h.s16 %v456_v50  ;;  %v597_v2 = vunpack.i.h.s16 %v441_v42  ;;  %v10846_v7 = vpack.i.b16 %v392_v35, %v579_v51  ;;  %v10848_v8 = vpack.i.b16 %v406_v33, %v581_v52 }
  0xb0   :  { %v595_v9 = vunpack.i.h.s16 %v458_v53  ;;  %v475_v10 = vcombine.high %v467_v54, %v467_v54  ;;  %v10850_v11 = vpack.i.b16 %v408_v44, %v583_v55  ;;  %v599_v12 = vunpack.i.h.s16 %v455_v57 }
  0xb1   :  { %v10829_v43 = vpop.trf.xlu1  ;;  %v601_v13 = vunpack.i.h.s16 %v457_v58  ;;  %v10852_v14 = vpack.i.b16 %v434_v37, %v587_v56  ;;  %v10854_v16 = vpack.i.b16 %v448_v39, %v589_v60  ;;  %v10856_v18 = vpack.i.b16 %v456_v50, %v591_v61 }
  0xb2   :  { %v476_v20 = vcombine.high %v474_v62, %v474_v62  ;;  %v10858_v22 = vpack.i.b16 %v458_v53, %v593_v1  ;;  %v10860_v23 = vpack.i.b16 %v455_v57, %v597_v2  ;;  %v483_v24 = vrot.slane %v467_v54, %v10806_v19 }
  0xb3   :  { %v490_v25 = vrot.slane %v474_v62, %v10806_v19  ;;  %v10864_v26 = vpack.i.b16 %v441_v42, %v595_v9  ;;  %v459_v27 = vcombine.high %v455_v57, %v455_v57  ;;  %v497_v28 = vrot.slane %v475_v10, %v10806_v19 }
  0xb4   :  { %v10871_v35 = vpack.i.b16 %v410_v40, %v585_v59  ;;  %v515_v36 = vrot.slane %v10814_v30, %v10806_v19  ;;  %v10875_v39 = vpack.i.b16 %v457_v58, %v599_v12  ;;  %v1632_v41 = vcombine.low %v10852_v14, %v10854_v16 }
  0xb5   :  { %v10841_v3 = vpop.trf.xlu1  ;;  %v504_v42 = vrot.slane %v476_v20, %v10806_v19  ;;  %v1633_v45 = vcombine.low %v10856_v18, %v10858_v22  ;;  %v603_v48 = vunpack.i.h.s16 %v459_v27  ;;  %v505_v49 = vcombine.high %v483_v24, %v483_v24 }
  0xb6   :  { %v506_v40 = vcombine.high %v490_v25, %v490_v25  ;;  %v1634_v50 = vcombine.low %v10864_v26, %v10860_v23  ;;  %v10884_v30 = vpack.i.b16 %v459_v27, %v601_v13  ;;  %v507_v51 = vcombine.high %v497_v28, %v497_v28 }
  0xb7   :  { %v605_v53 = vunpack.i.h.s16 %v483_v24  ;;  %v522_v54 = vrot.slane %v515_v36, %v10806_v19  ;;  %v613_v57 = vunpack.i.h.s16 %v490_v25  ;;  %v508_v58 = vcombine.high %v504_v42, %v504_v42 }
  0xb8   :  { %v607_v61 = vunpack.i.h.s16 %v497_v28  ;;  %v609_v62 = vunpack.i.h.s16 %v505_v49  ;;  %v615_v1 = vunpack.i.h.s16 %v504_v42  ;;  %v617_v2 = vunpack.i.h.s16 %v506_v40 }
  0xb9   :  { %v663_v37 = vpop.trf.xlu1  ;;  %v611_v9 = vunpack.i.h.s16 %v507_v51  ;;  %v10890_v10 = vpack.i.b16 %v483_v24, %v603_v48  ;;  %v619_v12 = vunpack.i.h.s16 %v508_v58 }
  0xba   :  { %v111_v6 = vpop.permute.xlu0 %110  ;;  %v10903_v24 = vpack.i.b16 %v505_v49, %v607_v61  ;;  %v10905_v48 = vpack.i.b16 %v507_v51, %v609_v62 }
  0xbb   :  { %v119_v21 = vmul.f32 %v9580_v5, %v111_v6 }
  0xbd   :  { %v127_v32 = vadd.f32 %v9581_v15, %v119_v21  ;;  %v664_v5 = vpop.trf.xlu1  ;;  %v10893_v15 = vpack.i.b16 %v497_v28, %v605_v53  ;;  %v689_v21 = vunpack.c.l.bf16 %v663_v37  ;;  %v10909_v28 = vpack.i.b16 %v508_v58, %v617_v2 }
  0xbe   :  { %v10911_v53 = vpack.i.b16 %v490_v25, %v611_v9 }
  0xbf   :  { %v169_v38 = vpop.trf.xlu0  ;;  %v128_v44 = vadd.f32 1.0, %v127_v32  ;;  %v10900_v32 = vpack.i.b16 %v504_v42, %v613_v57 }
  0xc0   :  { %v201_v56 = vcombine.high %v169_v38, %v169_v38  ;;  %v208_v13 = vrot.slane %v169_v38, %v10806_v19  ;;  %v10907_v38 = vpack.i.b16 %v506_v40, %v615_v1  ;;  %v691_v1 = vunpack.c.l.bf16 %v664_v5 }
  0xc1   :  { %v706_v52 = vrot.slane %v128_v44, %v10806_v19  ;;  %v690_v44 = vunpack.c.h.bf16 %v663_v37  ;;  %v677_v51 = vpop.trf.xlu1  ;;  %v1642_v5 = vrot.slane %v1632_v41, %v10806_v19 }
  0xc2   :  { %v215_v27 = vrot.slane %v201_v56, %v10806_v19  ;;  %v216_v34 = vcombine.high %v208_v13, %v208_v13  ;;  %v692_v58 = vunpack.c.l.bf16 %v677_v51 }
  0xc3   :  { %v707_v59 = vcombine.high %v706_v52, %v706_v52  ;;  %v714_v60 = vrot.slane %v706_v52, %v10806_v19  ;;  %v170_v6 = vpop.trf.xlu0 }
  0xc4   :  { %v250_v52 = vcombine.high %v170_v6, %v170_v6  ;;  %v257_v42 = vrot.slane %v170_v6, %v10806_v19  ;;  %v217_v57 = vcombine.high %v215_v27, %v215_v27  ;;  %v238_v2 = vrot.slane %v216_v34, %v10806_v19 }
  0xc5   :  { %v10897_v20 = vrot.slane %v714_v60, %v724_v46  ;;  %v721_v36 = vrot.slane %v707_v59, %v10806_v19  ;;  %v10913_v60 = vpack.i.b16 %v522_v54, %v619_v12  ;;  %v678_v55 = vpop.trf.xlu1 }
  0xc6   :  { %v264_v54 = vrot.slane %v250_v52, %v10806_v19  ;;  %v265_v6 = vcombine.high %v257_v42, %v257_v42  ;;  %v245_v12 = vrot.slane %v217_v57, %v10806_v19  ;;  %v231_v57 = vrot.slane %v215_v27, %v10806_v19 }
  0xc7   :  { %v736_v49 = vmul.f32 %v10897_v20, %v689_v21  ;;  %v10921_v40 = vrot.slane %v721_v36, %v724_v46  ;;  %v737_v25 = vmul.f32 %v10897_v20, %v690_v44  ;;  %v1635_v21 = vcombine.low %v10875_v39, %v10884_v30 }
  0xc8   :  { %v224_v44 = vrot.slane %v208_v13, %v10806_v19  ;;  %v266_v33 = vcombine.high %v264_v54, %v264_v54  ;;  %v10949_v46 = vrot.slane %v257_v42, %v10806_v19  ;;  %v738_v39 = vmul.f32 %v10897_v20, %v691_v1 }
  0xc9   :  { %13405 = vst [vmem:[#allocation17_spill] sm:$0xff] %v10921_v40  ;;  %v956_v9 = vcombine.high %v736_v49, %v736_v49  ;;  %v1005_v36 = vcombine.high %v737_v25, %v737_v25  ;;  %v739_v52 = vmul.f32 %v10921_v40, %v692_v58  ;;  %v963_v34 = vrot.slane %v736_v49, %v10806_v19 }
  0xca   :  { %v1012_v37 = vrot.slane %v737_v25, %v10806_v19  ;;  %v1436_v30 = vcombine.low %v224_v44, %v238_v2  ;;  %v9616_v14 = vcombine.high %v224_v44, %v238_v2  ;;  %v10953_v16 = vrot.slane %v265_v6, %v10806_v19 }
  0xcb   :  { %v970_v41 = vrot.slane %v956_v9, %v10806_v19  ;;  %v1438_v13 = vcombine.low %v231_v57, %v245_v12  ;;  %v9617_v58 = vcombine.high %v231_v57, %v245_v12  ;;  %v1649_v49 = vrot.slane %v1633_v45, %v10806_v19 }
  0xcc   :  { %v1019_v27 = vrot.slane %v1005_v36, %v10806_v19  ;;  %v1068_v42 = vcombine.high %v739_v52, %v739_v52  ;;  %v10962_v25 = vrot.slane %v264_v54, %v10806_v19  ;;  %v10965_v1 = vrot.slane %v266_v33, %v10806_v19 }
  0xcd   :  { %v971_v2 = vcombine.high %v963_v34, %v963_v34  ;;  %v1020_v6 = vcombine.high %v1012_v37, %v1012_v37  ;;  %v693_v44 = vunpack.c.h.bf16 %v677_v51  ;;  %v1656_v9 = vrot.slane %v1634_v50, %v10806_v19 }
  0xce   :  { %v1060_v18 = vrot.slane %v738_v39, %v10806_v19  ;;  %v10973_v22 = vrot.slane %v1436_v30, %v10806_v19  ;;  %v10976_v45 = vrot.slane %v9616_v14, %v10806_v19  ;;  %v972_v54 = vcombine.high %v970_v41, %v970_v41 }
  0xcf   :  { %v10981_v12 = vrot.slane %v1438_v13, %v10806_v19  ;;  %v10984_v51 = vrot.slane %v9617_v58, %v10806_v19  ;;  %v1075_v23 = vrot.slane %v739_v52, %v10806_v19  ;;  %v1021_v26 = vcombine.high %v1019_v27, %v1019_v27 }
  0xd0   :  { %v1082_v50 = vrot.slane %v1068_v42, %v10806_v19  ;;  %v9618_v36 = vcombine.high %v10949_v46, %v10953_v16  ;;  %v993_v39 = vrot.slane %v971_v2, %v10806_v19  ;;  %v1042_v30 = vrot.slane %v1020_v6, %v10806_v19 }
  0xd1   :  { %v740_v14 = vmul.f32 %v10921_v40, %v693_v44  ;;  %v979_v52 = vrot.slane %v963_v34, %v10806_v19  ;;  %v1028_v58 = vrot.slane %v1012_v37, %v10806_v19  ;;  %v11000_v42 = vrot.slane %v1060_v18, %v10806_v19 }
  0xd2   :  { %v1663_v56 = vrot.slane %v1635_v21, %v10806_v19  ;;  %v11004_v47 = vrot.slane %v970_v41, %v10806_v19  ;;  %v11007_v2 = vrot.slane %v972_v54, %v10806_v19  ;;  %v11010_v6 = vrot.slane %v1019_v27, %v10806_v19 }
  0xd3   :  { %v1083_v44 = vcombine.high %v1075_v23, %v1075_v23  ;;  %v11013_v34 = vrot.slane %v1021_v26, %v10806_v19  ;;  %v1084_v37 = vcombine.high %v1082_v50, %v1082_v50  ;;  %v1664_v62 = vcombine.low %v1642_v5, %v1649_v49 }
  0xd4   :  { %v1665_v18 = vcombine.low %v1656_v9, %v1663_v56  ;;  %v2062_v17 = vcombine.low %v979_v52, %v993_v39  ;;  %v9639_v61 = vcombine.high %v979_v52, %v993_v39  ;;  %v2111_v21 = vcombine.low %v1028_v58, %v1042_v30  ;;  %v10334_v39 = vld [vmem:[#allocation8 + $0x8] sm:$0xff]   ;;  %v679_v56 = vpop.trf.xlu1 }
  0xd5   :  { %13406 = vst [vmem:[#allocation18_spill] sm:$0xff] %v11013_v34  ;;  %v694_v59 = vunpack.c.l.bf16 %v678_v55  ;;  %v1117_v13 = vcombine.high %v740_v14, %v740_v14  ;;  %v1124_v41 = vrot.slane %v740_v14, %v10806_v19  ;;  %v1672_v54 = vrot.slane %v1664_v62, %v10806_v19 }
  0xd6   :  { %v1679_v57 = vrot.slane %v1665_v18, %v10806_v19  ;;  %v9641_v27 = vcombine.high %v1028_v58, %v1042_v30  ;;  %v1091_v33 = vrot.slane %v1075_v23, %v10806_v19  ;;  %v1105_v26 = vrot.slane %v1083_v44, %v10806_v19 }
  0xd7   :  { %v695_v4 = vunpack.c.h.bf16 %v678_v55  ;;  %v1098_v5 = vrot.slane %v1082_v50, %v10806_v19  ;;  %v1112_v49 = vrot.slane %v1084_v37, %v10806_v19  ;;  %v11027_v14 = vrot.slane %v2062_v17, %v10806_v19  ;;  %v171_v50 = vpop.trf.xlu0 }
  0xd8   :  { %v1680_v9 = vcombine.low %v1672_v54, %v1679_v57  ;;  %v11030_v23 = vrot.slane %v9639_v61, %v10806_v19  ;;  %v741_v55 = vmul.f32 %v10921_v40, %v694_v59  ;;  %v1131_v57 = vrot.slane %v1117_v13, %v10806_v19 }
  0xd9   :  { %13407 = vst [vmem:[#allocation19_spill] sm:$0xff] %v11027_v14  ;;  %v1132_v52 = vcombine.high %v1124_v41, %v1124_v41  ;;  %v11040_v58 = vrot.slane %v2111_v21, %v10806_v19  ;;  %v1113_v17 = vcombine.high %v1091_v33, %v1091_v33  ;;  %v1115_v44 = vcombine.high %v1105_v26, %v1105_v26 }
  0xda   :  { %13408 = vst [vmem:[#allocation20_spill] sm:$0xff] %v11030_v23  ;;  %9898 = vmatmul.mubr.msk.bf16.vlgmr.msra.gmra.mxu1 %vm1756_vm1, %v1680_v9  ;;  %v742_v61 = vmul.f32 %v10921_v40, %v695_v4  ;;  %v13410_v37 = vmov 0.0   ;;  %v11046_v59 = vrot.slane %v9641_v27, %v10806_v19  ;;  %v1114_v18 = vcombine.high %v1098_v5, %v1098_v5  ;;  %v10335_v9 = vld [vmem:[#allocation8] sm:$0xff]  }
  0xdb   :  { %13409 = vst [vmem:[#allocation21_spill] sm:$0xff] %v11040_v58  ;;  %9901 = vmatprep.mubr.msk.bf16.mxu1 %vm10699_vm0, %v13410_v37  ;;  %v1116_v54 = vcombine.high %v1112_v49, %v1112_v49  ;;  %v1140_v13 = vrot.slane %v1124_v41, %v10806_v19  ;;  %9910 = vmatpush3.bf16.msra.mxu1 %v10334_v39  ;;  %v696_v23 = vunpack.c.l.bf16 %v679_v56 }
  0xdc   :  { %13411 = vst [vmem:[#allocation22_spill] sm:$0xff] %v11046_v59  ;;  %v2160_v21 = vcombine.low %v11000_v42, %v1091_v33  ;;  %v13412_v30 = vcombine.low %v10949_v46, %v10953_v16  ;;  %v11057_v62 = vrot.slane %v9618_v36, %v10806_v19  ;;  %v1166_v27 = vcombine.high %v741_v55, %v741_v55 }
  0xdd   :  { %9911 = vmatprep.subr.bf16.mxu1 %v13410_v37  ;;  %v1133_v58 = vcombine.high %v1131_v57, %v1131_v57  ;;  %v1147_v41 = vrot.slane %v1131_v57, %v10806_v19  ;;  %v1154_v39 = vrot.slane %v1132_v52, %v10806_v19  ;;  %v1173_v33 = vrot.slane %v741_v55, %v10806_v19 }
  0xde   :  { %v11054_v4 = vrot.slane %v13412_v30, %v10806_v19  ;;  %v11063_v42 = vcombine.low %v1105_v26, %v1113_v17  ;;  %v11065_v59 = vcombine.low %v1115_v44, %v1098_v5  ;;  %v1215_v46 = vcombine.high %v742_v61, %v742_v61 }
  0xdf   :  { %v299_v16 = vcombine.high %v171_v50, %v171_v50  ;;  %v1162_v30 = vcombine.high %v1140_v13, %v1140_v13  ;;  %v11067_v36 = vcombine.low %v1112_v49, %v1114_v18  ;;  %v11069_v14 = vcombine.low %v1116_v54, %v1140_v13  ;;  %9912 = vmatpush3.bf16.msra.mxu1 %v10335_v9 }
  0xe0   :  { %13413 = vst [vmem:[#allocation23_spill] sm:$0xff] %v11063_v42  ;;  %v11072_v34 = vrot.slane %v2160_v21, %v10806_v19  ;;  %v13416_v55 = vcombine.low %v10962_v25, %v10965_v1  ;;  %v1180_v5 = vrot.slane %v1166_v27, %v10806_v19  ;;  %v1222_v57 = vrot.slane %v742_v61, %v10806_v19 }
  0xe1   :  { %13414 = vst [vmem:[#allocation24_spill] sm:$0xff] %v11069_v14  ;;  %v1161_v49 = vrot.slane %v1133_v58, %v10806_v19  ;;  %v1163_v52 = vcombine.high %v1147_v41, %v1147_v41  ;;  %v1164_v17 = vcombine.high %v1154_v39, %v1154_v39  ;;  %v1181_v44 = vcombine.high %v1173_v33, %v1173_v33 }
  0xe2   :  { %13415 = vst [vmem:[#allocation25_spill] sm:$0xff] %v11072_v34  ;;  %v11078_v26 = vrot.slane %v13416_v55, %v10806_v19  ;;  %v13417_v18 = vcombine.high %v10962_v25, %v10965_v1  ;;  %v1229_v13 = vrot.slane %v1215_v46, %v10806_v19  ;;  %v306_v9 = vrot.slane %v171_v50, %v10806_v19 }
  0xe3   :  { %v313_v21 = vrot.slane %v299_v16, %v10806_v19  ;;  %v11092_v27 = vcombine.low %v1154_v39, %v1162_v30  ;;  %v697_v61 = vunpack.c.h.bf16 %v679_v56  ;;  %v743_v55 = vmul.f32 %v10921_v40, %v696_v23 }
  0xe4   :  { %v11087_v54 = vrot.slane %v13417_v18, %v10806_v19  ;;  %v1182_v34 = vcombine.high %v1180_v5, %v1180_v5  ;;  %v1189_v42 = vrot.slane %v1173_v33, %v10806_v19  ;;  %v1230_v25 = vcombine.high %v1222_v57, %v1222_v57 }
  0xe5   :  { %v11099_v1 = vrot.slane %v1222_v57, %v10806_v19  ;;  %v11101_v46 = vcombine.low %v1164_v17, %v1147_v41  ;;  %v11103_v50 = vcombine.low %v1161_v49, %v1163_v52  ;;  %v11106_v39 = vrot.slane %v1180_v5, %v10806_v19 }
  0xe6   :  { %v1203_v16 = vrot.slane %v1181_v44, %v10806_v19  ;;  %v1165_v30 = vcombine.high %v1161_v49, %v1161_v49  ;;  %v1231_v56 = vcombine.high %v1229_v13, %v1229_v13  ;;  %v314_v18 = vcombine.high %v306_v9, %v306_v9 }
  0xe7   :  { %13418 = vst [vmem:[#allocation26_spill] sm:$0xff] %v11103_v50  ;;  %v315_v23 = vcombine.high %v313_v21, %v313_v21  ;;  %v11110_v58 = vrot.slane %v1229_v13, %v10806_v19  ;;  %v11113_v33 = vmul.f32 %v10921_v40, %v697_v61  ;;  %v1264_v57 = vcombine.high %v743_v55, %v743_v55 }
  0xe8   :  { %v11116_v41 = vrot.slane %v743_v55, %v10806_v19  ;;  %v11119_v52 = vrot.slane %v1182_v34, %v10806_v19  ;;  %v1211_v5 = vcombine.high %v1189_v42, %v1189_v42  ;;  %v11122_v17 = vrot.slane %v1230_v25, %v10806_v19 }
  0xe9   :  { %v1213_v13 = vcombine.high %v1203_v16, %v1203_v16  ;;  %v322_v61 = vrot.slane %v306_v9, %v10806_v19  ;;  %v329_v40 = vrot.slane %v313_v21, %v10806_v19  ;;  %v11131_v55 = vrot.slane %v1231_v56, %v10806_v19 }
  0xea   :  { %v11133_v34 = vcombine.low %v1165_v30, %v1189_v42  ;;  %v336_v14 = vrot.slane %v314_v18, %v10806_v19  ;;  %v343_v25 = vrot.slane %v315_v23, %v10806_v19  ;;  %v13419_v44 = vcombine.low %v10890_v10, %v10893_v15 }
  0xeb   :  { %v13420_v9 = vcombine.low %v10903_v24, %v10905_v48  ;;  %v13421_v42 = vcombine.low %v10911_v53, %v10900_v32  ;;  %v1262_v56 = vcombine.high %v11122_v17, %v11122_v17  ;;  %v1214_v10 = vcombine.high %v11119_v52, %v11119_v52 }
  0xec   :  { %v1691_v50 = vrot.slane %v13419_v44, %v10806_v19  ;;  %v1534_v18 = vcombine.low %v322_v61, %v336_v14  ;;  %v9620_v23 = vcombine.high %v322_v61, %v336_v14  ;;  %v1536_v49 = vcombine.low %v329_v40, %v343_v25 }
  0xed   :  { %v1698_v21 = vrot.slane %v13420_v9, %v10806_v19  ;;  %v1705_v30 = vrot.slane %v13421_v42, %v10806_v19  ;;  %v11155_v15 = vcombine.low %v1203_v16, %v1211_v5  ;;  %v13422_v24 = vcombine.low %v10907_v38, %v10909_v28  ;;  %v172_v9 = vpop.trf.xlu0 }
  0xee   :  { %v11162_v32 = vcombine.low %v1213_v13, %v11106_v39  ;;  %v11165_v53 = vrot.slane %v1264_v57, %v10806_v19  ;;  %v1279_v14 = vcombine.high %v11116_v41, %v11116_v41  ;;  %v9621_v61 = vcombine.high %v329_v40, %v343_v25 }
  0xef   :  { %v1712_v48 = vrot.slane %v13422_v24, %v10806_v19  ;;  %v1713_v44 = vcombine.low %v1691_v50, %v1698_v21  ;;  %v1544_v16 = vrot.slane %v1534_v18, %v10806_v19  ;;  %v1468_v38 = vcombine.low %v10973_v22, %v10976_v45 }
  0xf0   :  { %v1551_v28 = vrot.slane %v9620_v23, %v10806_v19  ;;  %v11175_v50 = vrot.slane %v1536_v49, %v10806_v19  ;;  %v1469_v57 = vcombine.low %v10981_v12, %v10984_v51  ;;  %v354_v13 = vrot.slane %v172_v9, %v10806_v19 }
  0xf1   :  { %v1714_v5 = vcombine.low %v1705_v30, %v1712_v48  ;;  %v1721_v42 = vrot.slane %v1713_v44, %v10806_v19  ;;  %v1476_v25 = vrot.slane %v1468_v38, %v10806_v19  ;;  %v13423_v21 = vunpack.i.h.s16 %v10812_v29 }
  0xf2   :  { %v1517_v22 = vcombine.low %v11054_v4, %v11057_v62  ;;  %v1483_v45 = vrot.slane %v1469_v57, %v10806_v19  ;;  %v361_v49 = vrot.slane %v354_v13, %v10806_v19  ;;  %v1518_v12 = vcombine.low %v11078_v26, %v11087_v54 }
  0xf3   :  { %v1728_v40 = vrot.slane %v1714_v5, %v10806_v19  ;;  %v9592_v30 = vpack.i.b16 %v10817_v31, %v13423_v21  ;;  %v13424_v51 = vunpack.c.l.bf16 %v10829_v43  ;;  %v1565_v23 = vrot.slane %v9621_v61, %v10806_v19 }
  0xf4   :  { %v1525_v48 = vrot.slane %v1517_v22, %v10806_v19  ;;  %v13425_v31 = vunpack.c.h.bf16 %v10829_v43  ;;  %v1484_v4 = vcombine.low %v1476_v25, %v1483_v45  ;;  %v9591_v44 = vpack.i.b16 %v10812_v29, %v361_v49 }
  0xf5   :  { %v732_v18 = vmul.f32 %v10897_v20, %v13424_v51  ;;  %v1729_v24 = vcombine.low %v1721_v42, %v1728_v40  ;;  %v1532_v9 = vrot.slane %v1518_v12, %v10806_v19  ;;  %v13426_v26 = vrot.slane %v10913_v60, %v10806_v19 }
  0xf6   :  { %v733_v62 = vmul.f32 %v10897_v20, %v13425_v31  ;;  %v688_v38 = vunpack.c.h.bf16 %v10841_v3  ;;  %9882 = vmatmul.mubr.msk.bf16.vlgmr.msra.gmra.mxu0 %vm1756_vm1, %v1484_v4  ;;  %v11212_v29 = vcombine.low %v9591_v44, %v9592_v30  ;;  %v1566_v31 = vcombine.low %v1544_v16, %v1551_v28 }
  0xf7   :  { %v760_v5 = vcombine.high %v732_v18, %v732_v18  ;;  %9902 = vmatmul.mubr.msk.bf16.gmra.mxu1 %vm1756_vm1, %v1729_v24  ;;  %v1743_v54 = vrot.slane %v13426_v26, %v10806_v19  ;;  %v767_v61 = vrot.slane %v732_v18, %v10806_v19  ;;  %v1533_v57 = vcombine.low %v1525_v48, %v1532_v9 }
  0xf8   :  { %v809_v42 = vcombine.high %v733_v62, %v733_v62  ;;  %v816_v43 = vrot.slane %v733_v62, %v10806_v19  ;;  %9905 = vmatprep.mubr.msk.bf16.mxu1 %vm10699_vm0, %v13410_v37  ;;  %9885 = vmatprep.mubr.msk.bf16.mxu0 %vm10699_vm0, %v13410_v37  ;;  %v1593_v22 = vrot.slane %v11212_v29, %v10806_v19  ;;  %v13427_v4 = vunpack.c.l.bf16 %v10841_v3 }
  0xf9   :  { %v774_v13 = vrot.slane %v760_v5, %v10806_v19  ;;  %v775_v60 = vcombine.high %v767_v61, %v767_v61  ;;  %v783_v40 = vrot.slane %v767_v61, %v10806_v19  ;;  %v1567_v62 = vcombine.low %v11175_v50, %v1565_v23 }
  0xfa   :  { %v823_v25 = vrot.slane %v809_v42, %v10806_v19  ;;  %v824_v21 = vcombine.high %v816_v43, %v816_v43  ;;  %v832_v30 = vrot.slane %v816_v43, %v10806_v19  ;;  %v734_v44 = vmul.f32 %v10897_v20, %v13427_v4 }
  0xfb   :  { %v776_v45 = vcombine.high %v774_v13, %v774_v13  ;;  %v790_v49 = vrot.slane %v774_v13, %v10806_v19  ;;  %v797_v12 = vrot.slane %v775_v60, %v10806_v19  ;;  %v1574_v60 = vrot.slane %v1566_v31, %v10806_v19 }
  0xfc   :  { %v825_v51 = vcombine.high %v823_v25, %v823_v25  ;;  %v839_v18 = vrot.slane %v823_v25, %v10806_v19  ;;  %v846_v24 = vrot.slane %v824_v21, %v10806_v19  ;;  %v865_v31 = vrot.slane %v734_v44, %v10806_v19 }
  0xfd   :  { %v804_v48 = vrot.slane %v776_v45, %v10806_v19  ;;  %v1866_v5 = vcombine.low %v783_v40, %v797_v12  ;;  %v9631_v26 = vcombine.high %v783_v40, %v797_v12  ;;  %v735_v12 = vmul.f32 %v10897_v20, %v688_v38 }
  0xfe   :  { %v853_v9 = vrot.slane %v825_v51, %v10806_v19  ;;  %v1915_v61 = vcombine.low %v832_v30, %v846_v24  ;;  %v9633_v13 = vcombine.high %v832_v30, %v846_v24  ;;  %9886 = vmatmul.mubr.msk.bf16.gmra.mxu0 %vm1756_vm1, %v1533_v57  ;;  %v1581_v30 = vrot.slane %v1567_v62, %v10806_v19 }
  0xff   :  { %v1868_v42 = vcombine.low %v790_v49, %v804_v48  ;;  %v9632_v43 = vcombine.high %v790_v49, %v804_v48  ;;  %9906 = vmatmul.mubr.msk.bf16.gmra.mxu1 %vm1756_vm1, %v1743_v54  ;;  %v1876_v16 = vrot.slane %v1866_v5, %v10806_v19  ;;  %v1883_v28 = vrot.slane %v9631_v26, %v10806_v19 }
 0x100   :  { %v1917_v50 = vcombine.low %v839_v18, %v853_v9  ;;  %v9634_v3 = vcombine.high %v839_v18, %v853_v9  ;;  %9913 = vmatprep.mubr.msk.bf16.mxu1 %vm10699_vm0, %v13410_v37  ;;  %v1925_v25 = vrot.slane %v1915_v61, %v10806_v19  ;;  %v1932_v54 = vrot.slane %v9633_v13, %v10806_v19 }
 0x101   :  { %v1890_v23 = vrot.slane %v1868_v42, %v10806_v19  ;;  %v1897_v40 = vrot.slane %v9632_v43, %v10806_v19  ;;  %v1898_v21 = vcombine.low %v1876_v16, %v1883_v28  ;;  %9889 = vmatprep.mubr.msk.bf16.mxu0 %vm10699_vm0, %v13410_v37  ;;  %v858_v51 = vcombine.high %v734_v44, %v734_v44 }
 0x102   :  { %v1939_v45 = vrot.slane %v1917_v50, %v10806_v19  ;;  %v1946_v49 = vrot.slane %v9634_v3, %v10806_v19  ;;  %v1947_v24 = vcombine.low %v1925_v25, %v1932_v54  ;;  %v1582_v9 = vcombine.low %v1574_v60, %v1581_v30 }
 0x103   :  { %v1899_v57 = vcombine.low %v1890_v23, %v1897_v40  ;;  %v1906_v18 = vrot.slane %v1898_v21, %v10806_v19  ;;  %v872_v5 = vrot.slane %v858_v51, %v10806_v19  ;;  %v907_v26 = vcombine.high %v735_v12, %v735_v12 }
 0x104   :  { %v1948_v48 = vcombine.low %v1939_v45, %v1946_v49  ;;  %v1955_v61 = vrot.slane %v1947_v24, %v10806_v19  ;;  %v873_v62 = vcombine.high %v865_v31, %v865_v31  ;;  %v881_v20 = vrot.slane %v865_v31, %v10806_v19 }
 0x105   :  { %v1913_v4 = vrot.slane %v1899_v57, %v10806_v19  ;;  %v874_v43 = vcombine.high %v872_v5, %v872_v5  ;;  %v888_v13 = vrot.slane %v872_v5, %v10806_v19  ;;  %v914_v16 = vrot.slane %v735_v12, %v10806_v19 }
 0x106   :  { %v1962_v42 = vrot.slane %v1948_v48, %v10806_v19  ;;  %v895_v28 = vrot.slane %v873_v62, %v10806_v19  ;;  %v921_v60 = vrot.slane %v907_v26, %v10806_v19  ;;  %v1586_v50 = vcombine.low %v10850_v11, %v10871_v35  ;;  %9890 = vmatmul.mubr.msk.bf16.gmra.mxu0 %vm1756_vm1, %v1582_v9 }
 0x107   :  { %v1914_v38 = vcombine.low %v1906_v18, %v1913_v4  ;;  %v902_v3 = vrot.slane %v874_v43, %v10806_v19  ;;  %v922_v23 = vcombine.high %v914_v16, %v914_v16  ;;  %v930_v40 = vrot.slane %v914_v16, %v10806_v19  ;;  %9893 = vmatprep.mubr.msk.bf16.mxu0 %vm10699_vm0, %v13410_v37 }
 0x108   :  { %v1963_v44 = vcombine.low %v1955_v61, %v1962_v42  ;;  %v13428_v25 = vcombine.low %v10837_v63, %v10839_v0  ;;  %v923_v45 = vcombine.high %v921_v60, %v921_v60  ;;  %v937_v49 = vrot.slane %v921_v60, %v10806_v19 }
 0x109   :  { %v1964_v57 = vcombine.low %v881_v20, %v895_v28  ;;  %v944_v11 = vrot.slane %v922_v23, %v10806_v19  ;;  %v9635_v35 = vcombine.high %v881_v20, %v895_v28  ;;  %v1966_v30 = vcombine.low %v888_v13, %v902_v3 }
 0x10a   :  { %v1600_v21 = vrot.slane %v13428_v25, %v10806_v19  ;;  %v2482_v54 = vpack.c.bf16 %v1963_v44, %v1914_v38  ;;  %v9636_v12 = vcombine.high %v888_v13, %v902_v3  ;;  %v951_v51 = vrot.slane %v923_v45, %v10806_v19  ;;  %v13432_v45 = vld [vmem:[#allocation18_spill] sm:$0xff] }
 0x10b   :  { %v1974_v63 = vrot.slane %v1964_v57, %v10806_v19  ;;  %v13429_v0 = vcombine.low %v10846_v7, %v10848_v8  ;;  %v1614_v24 = vrot.slane %v1586_v50, %v10806_v19  ;;  %v1981_v48 = vrot.slane %v9635_v35, %v10806_v19 }
 0x10c   :  { %9914 = vmatmul.mubr.msk.bf16.vlgmr.msra.gmra.mxu1 %vm1756_vm1, %v2482_v54  ;;  %v1988_v31 = vrot.slane %v1966_v30, %v10806_v19  ;;  %v1995_v4 = vrot.slane %v9636_v12, %v10806_v19  ;;  %v2013_v9 = vcombine.low %v930_v40, %v944_v11  ;;  %v9637_v5 = vcombine.high %v930_v40, %v944_v11 }
 0x10d   :  { %v1607_v18 = vrot.slane %v13429_v0, %v10806_v19  ;;  %9917 = vmatprep.mubr.msk.bf16.mxu1 %vm10699_vm0, %v13410_v37  ;;  %v2015_v26 = vcombine.low %v937_v49, %v951_v51  ;;  %v9638_v61 = vcombine.high %v937_v49, %v951_v51  ;;  %v1615_v7 = vcombine.low %v1593_v22, %v1600_v21  ;;  %v13436_v0 = vld [vmem:[#allocation20_spill] sm:$0xff] }
 0x10e   :  { %v1996_v8 = vcombine.low %v1974_v63, %v1981_v48  ;;  %v1997_v42 = vcombine.low %v1988_v31, %v1995_v4  ;;  %v2023_v62 = vrot.slane %v2013_v9, %v10806_v19  ;;  %v2030_v38 = vrot.slane %v9637_v5, %v10806_v19  ;;  %v13439_v9 = vld [vmem:[#allocation22_spill] sm:$0xff]  ;;  %v13440_v5 = vld [vmem:[#allocation21_spill] sm:$0xff] }
 0x10f   :  { %v1616_v20 = vcombine.low %v1607_v18, %v1614_v24  ;;  %v2037_v43 = vrot.slane %v2015_v26, %v10806_v19  ;;  %v2044_v13 = vrot.slane %v9638_v61, %v10806_v19  ;;  %v1623_v16 = vrot.slane %v1615_v7, %v10806_v19 }
 0x110   :  { %v1313_v44 = vcombine.high %v11113_v33, %v11113_v33  ;;  %v2011_v28 = vrot.slane %v1997_v42, %v10806_v19  ;;  %v13430_v22 = vcombine.low %v11004_v47, %v11007_v2  ;;  %v2004_v50 = vrot.slane %v1996_v8, %v10806_v19 }
 0x111   :  { %v1630_v29 = vrot.slane %v1616_v20, %v10806_v19  ;;  %v2045_v3 = vcombine.low %v2023_v62, %v2030_v38  ;;  %v2046_v23 = vcombine.low %v2037_v43, %v2044_v13  ;;  %v13431_v40 = vcombine.high %v11004_v47, %v11007_v2 }
 0x112   :  { %v2086_v60 = vrot.slane %v13430_v22, %v10806_v19  ;;  %v1320_v21 = vrot.slane %v11113_v33, %v10806_v19  ;;  %v13433_v49 = vcombine.low %v11010_v6, %v13432_v45  ;;  %v13434_v11 = vcombine.high %v11010_v6, %v13432_v45  ;;  %v13437_v6 = vld [vmem:[#allocation19_spill] sm:$0xff] }
 0x113   :  { %v2093_v25 = vrot.slane %v13431_v40, %v10806_v19  ;;  %v1631_v54 = vcombine.low %v1623_v16, %v1630_v29  ;;  %v2012_v30 = vcombine.low %v2004_v50, %v2011_v28  ;;  %v2053_v12 = vrot.slane %v2045_v3, %v10806_v19 }
 0x114   :  { %v2135_v57 = vrot.slane %v13433_v49, %v10806_v19  ;;  %v2142_v35 = vrot.slane %v13434_v11, %v10806_v19  ;;  %v2060_v47 = vrot.slane %v2046_v23, %v10806_v19  ;;  %v13435_v33 = vcombine.high %v11106_v39, %v11106_v39  ;;  %v13443_v23 = vld [vmem:[#allocation24_spill] sm:$0xff] }
 0x115   :  { %v2095_v2 = vcombine.low %v2086_v60, %v2093_v25  ;;  %v2268_v63 = vrot.slane %v11133_v34, %v10806_v19  ;;  %9894 = vmatmul.mubr.msk.bf16.gmra.mxu0 %vm1756_vm1, %v1631_v54  ;;  %v2094_v18 = vcombine.low %v13437_v6, %v13436_v0  ;;  %v11334_v48 = vcombine.low %v1214_v10, %v11099_v1 }
 0x116   :  { %v11323_v51 = vcombine.low %v11119_v52, %v13435_v33  ;;  %v2144_v24 = vcombine.low %v2135_v57, %v2142_v35  ;;  %v13438_v39 = vcombine.high %v11099_v1, %v11099_v1  ;;  %v2061_v4 = vcombine.low %v2053_v12, %v2060_v47  ;;  %v13446_v33 = vld [vmem:[#allocation25_spill] sm:$0xff] }
 0x117   :  { %v2143_v26 = vcombine.low %v13440_v5, %v13439_v9  ;;  %v1280_v61 = vcombine.high %v11165_v53, %v11165_v53  ;;  %v1294_v7 = vrot.slane %v11165_v53, %v10806_v19  ;;  %v1327_v52 = vrot.slane %v1313_v44, %v10806_v19  ;;  %v13441_v44 = vld [vmem:[#allocation26_spill] sm:$0xff] }
 0x118   :  { %v11340_v31 = vcombine.low %v11122_v17, %v13438_v39  ;;  %v1328_v10 = vcombine.high %v1320_v21, %v1320_v21  ;;  %v11353_v1 = vrot.slane %v1279_v14, %v10806_v19  ;;  %v2483_v8 = vpack.c.bf16 %v2061_v4, %v2012_v30  ;;  %v680_v39 = vpop.trf.xlu1 }
 0x119   :  { %v2109_v42 = vrot.slane %v2095_v2, %v10806_v19  ;;  %v2158_v62 = vrot.slane %v2144_v24, %v10806_v19  ;;  %v1336_v20 = vrot.slane %v1320_v21, %v10806_v19  ;;  %v2102_v38 = vrot.slane %v2094_v18, %v10806_v19 }
 0x11a   :  { %v2184_v53 = vrot.slane %v11065_v59, %v10806_v19  ;;  %v2191_v43 = vrot.slane %v11067_v36, %v10806_v19  ;;  %9918 = vmatmul.mubr.msk.bf16.gmra.mxu1 %vm1756_vm1, %v2483_v8  ;;  %v2151_v14 = vrot.slane %v2143_v26, %v10806_v19  ;;  %v2226_v13 = vrot.slane %v11092_v27, %v10806_v19  ;;  %v13442_v27 = vld [vmem:[#allocation23_spill] sm:$0xff] }
 0x11b   :  { %v2233_v16 = vrot.slane %v11101_v46, %v10806_v19  ;;  %v2240_v28 = vrot.slane %v13441_v44, %v10806_v19  ;;  %v1308_v29 = vrot.slane %v1280_v61, %v10806_v19  ;;  %v1329_v22 = vcombine.high %v1327_v52, %v1327_v52  ;;  %9921 = vmatprep.mubr.msk.bf16.mxu1 %vm10699_vm0, %v13410_v37 }
 0x11c   :  { %v1343_v59 = vrot.slane %v1327_v52, %v10806_v19  ;;  %v1350_v36 = vrot.slane %v1328_v10, %v10806_v19  ;;  %v2110_v60 = vcombine.low %v2102_v38, %v2109_v42  ;;  %v2159_v50 = vcombine.low %v2151_v14, %v2158_v62 }
 0x11d   :  { %v2177_v3 = vrot.slane %v13442_v27, %v10806_v19  ;;  %v13444_v46 = vrot.slane %v13443_v23, %v10806_v19  ;;  %v2309_v25 = vcombine.low %v1262_v56, %v11110_v58  ;;  %v13445_v21 = vcombine.high %v11110_v58, %v11110_v58 }
 0x11e   :  { %v1287_v45 = vrot.slane %v11116_v41, %v10806_v19  ;;  %v2193_v49 = vcombine.low %v2184_v53, %v2191_v43  ;;  %v2317_v57 = vrot.slane %v11334_v48, %v10806_v19  ;;  %v1310_v11 = vcombine.high %v1294_v7, %v1294_v7 }
 0x11f   :  { %v2241_v40 = vcombine.low %v13444_v46, %v2226_v13  ;;  %v2310_v54 = vcombine.low %v11131_v55, %v13445_v21  ;;  %v1311_v35 = vcombine.high %v11353_v1, %v11353_v1  ;;  %v2242_v30 = vcombine.low %v2233_v16, %v2240_v28 }
 0x120   :  { %v1312_v12 = vcombine.high %v1308_v29, %v1308_v29  ;;  %v11396_v17 = vrot.slane %v1329_v22, %v10806_v19  ;;  %v1358_v56 = vcombine.high %v1336_v20, %v1336_v20  ;;  %v1359_v58 = vcombine.high %v1343_v59, %v1343_v59 }
 0x121   :  { %v1360_v47 = vcombine.high %v1350_v36, %v1350_v36  ;;  %v2484_v2 = vpack.c.bf16 %v2159_v50, %v2110_v60  ;;  %v2192_v0 = vcombine.low %v13446_v33, %v2177_v3  ;;  %v2249_v41 = vrot.slane %v2241_v40, %v10806_v19 }
 0x122   :  { %v2207_v6 = vrot.slane %v2193_v49, %v10806_v19  ;;  %v2275_v18 = vrot.slane %v11155_v15, %v10806_v19  ;;  %v2282_v24 = vrot.slane %v11162_v32, %v10806_v19  ;;  %v2289_v48 = vrot.slane %v11323_v51, %v10806_v19 }
 0x123   :  { %9922 = vmatmul.mubr.msk.bf16.gmra.mxu1 %vm1756_vm1, %v2484_v2  ;;  %v2256_v4 = vrot.slane %v2242_v30, %v10806_v19  ;;  %v2324_v9 = vrot.slane %v11340_v31, %v10806_v19  ;;  %v2331_v5 = vrot.slane %v2309_v25, %v10806_v19  ;;  %v2338_v26 = vrot.slane %v2310_v54, %v10806_v19 }
 0x124   :  { %v1263_v15 = vcombine.high %v11131_v55, %v11131_v55  ;;  %v1309_v61 = vcombine.high %v1287_v45, %v1287_v45  ;;  %v2358_v32 = vcombine.low %v1311_v35, %v1294_v7  ;;  %v2405_v52 = vcombine.low %v1312_v12, %v1336_v20  ;;  %9925 = vmatprep.mubr.msk.bf16.mxu1 %vm10699_vm0, %v13410_v37 }
 0x125   :  { %v2200_v51 = vrot.slane %v2192_v0, %v10806_v19  ;;  %v2257_v10 = vcombine.low %v2249_v41, %v2256_v4  ;;  %v2290_v31 = vcombine.low %v2268_v63, %v2275_v18  ;;  %v2339_v8 = vcombine.low %v2317_v57, %v2324_v9  ;;  %v13447_v63 = vld [vmem:[#allocation17_spill] sm:$0xff] }
 0x126   :  { %v2359_v42 = vcombine.low %v1308_v29, %v1310_v11  ;;  %v2406_v62 = vcombine.low %v1350_v36, %v1358_v56  ;;  %v698_v38 = vunpack.c.l.bf16 %v680_v39  ;;  %v2291_v53 = vcombine.low %v2282_v24, %v2289_v48  ;;  %v11459_v18 = vld [vmem:[%s13364_s4] ss:$0 sm:$0xff] }
 0x127   :  { %v2407_v43 = vcombine.low %v1360_v47, %v1343_v59  ;;  %v2408_v55 = vcombine.low %v11396_v17, %v1359_v58  ;;  %v2208_v7 = vcombine.low %v2200_v51, %v2207_v6  ;;  %v2340_v20 = vcombine.low %v2331_v5, %v2338_v26 }
 0x128   :  { %v2356_v14 = vcombine.low %v1263_v15, %v1287_v45  ;;  %v2357_v13 = vcombine.low %v11353_v1, %v1309_v61  ;;  %v2415_v16 = vrot.slane %v2405_v52, %v10806_v19  ;;  %v2298_v28 = vrot.slane %v2290_v31, %v10806_v19 }
 0x129   :  { %v2485_v44 = vpack.c.bf16 %v2257_v10, %v2208_v7  ;;  %v2347_v34 = vrot.slane %v2339_v8, %v10806_v19  ;;  %v745_v29 = vmul.f32 %v13447_v63, %v698_v38  ;;  %v2305_v22 = vrot.slane %v2291_v53, %v10806_v19 }
 0x12a   :  { %v2380_v59 = vrot.slane %v2358_v32, %v10806_v19  ;;  %v2387_v36 = vrot.slane %v2359_v42, %v10806_v19  ;;  %v2354_v60 = vrot.slane %v2340_v20, %v10806_v19  ;;  %v2422_v1 = vrot.slane %v2406_v62, %v10806_v19 }
 0x12b   :  { %9926 = vmatmul.mubr.msk.bf16.gmra.mxu1 %vm1756_vm1, %v2485_v44  ;;  %v2429_v50 = vrot.slane %v2407_v43, %v10806_v19  ;;  %v2436_v27 = vrot.slane %v2408_v55, %v10806_v19  ;;  %v2366_v3 = vrot.slane %v2356_v14, %v10806_v19  ;;  %v2306_v23 = vcombine.low %v2298_v28, %v2305_v22 }
 0x12c   :  { %9929 = vmatprep.mubr.msk.bf16.mxu1 %vm10699_vm0, %v13410_v37  ;;  %v2355_v46 = vcombine.low %v2347_v34, %v2354_v60  ;;  %v2373_v40 = vrot.slane %v2357_v13, %v10806_v19  ;;  %v2437_v25 = vcombine.low %v2415_v16, %v2422_v1  ;;  %v1368_v21 = vrot.slane %v745_v29, %v10806_v19 }
 0x12d   :  { %v2389_v54 = vcombine.low %v2380_v59, %v2387_v36  ;;  %v2438_v45 = vcombine.low %v2429_v50, %v2436_v27  ;;  %v1361_v49 = vcombine.high %v11396_v17, %v11396_v17 }
 0x12e   :  { %v2486_v57 = vpack.c.bf16 %v2355_v46, %v2306_v23  ;;  %v2388_v11 = vcombine.low %v2366_v3, %v2373_v40  ;;  %v2445_v35 = vrot.slane %v2437_v25, %v10806_v19  ;;  %v1375_v30 = vrot.slane %v1368_v21, %v10806_v19 }
 0x12f   :  { %v2403_v12 = vrot.slane %v2389_v54, %v10806_v19  ;;  %v2452_v56 = vrot.slane %v2438_v45, %v10806_v19 }
 0x130   :  { %v2454_v58 = vcombine.low %v1361_v49, %v1375_v30  ;;  %v2396_v47 = vrot.slane %v2388_v11, %v10806_v19 }
 0x131   :  { %v2453_v2 = vcombine.low %v2445_v35, %v2452_v56 }
 0x132   :  { %v2404_v17 = vcombine.low %v2396_v47, %v2403_v12  ;;  %v2461_v0 = vrot.slane %v2454_v58, %v10806_v19 }
 0x133   :  { %9930 = vmatmul.mubr.msk.bf16.gmra.mxu1 %vm1756_vm1, %v2486_v57 }
 0x134   :  { %9933 = vmatprep.mubr.msk.bf16.mxu1 %vm10699_vm0, %v13410_v37  ;;  %v2487_v33 = vpack.c.bf16 %v2453_v2, %v2404_v17  ;;  %v2468_v41 = vrot.slane %v2461_v0, %v10806_v19 }
 0x136   :  { %v2488_v6 = vpack.c.bf16 %v2468_v41, %v2468_v41 }
 0x13b   :  { %9934 = vmatmul.mubr.msk.bf16.gmra.mxu1 %vm1756_vm1, %v2487_v33 }
 0x13c   :  { %9937 = vmatprep.mubr.msk.bf16.mxu1 %vm10699_vm0, %v13410_v37 }
 0x143   :  { %9938 = vmatmul.mubr.msk.bf16.gmra.mxu1 %vm1756_vm1, %v2488_v6 }
 0x19a   :  { %v1844_v24 = vpop.f32.mrf.mxu1 }
 0x19b   :  { %v1845_v48 = vadd.f32 %v11459_v18, %v1844_v24 }
 0x19c   :  { %v9899_v39 = vpop.f32.mrf.mxu1 }
 0x19d   :  { %v3026_v4 = vcombine.high %v1845_v48, %v1845_v48  ;;  %v3033_v26 = vrot.slane %v1845_v48, %v10806_v19 }
 0x19e   :  { %v1847_v9 = vpop.f32.mrf.mxu1 }
 0x19f   :  { %v3040_v5 = vrot.slane %v3026_v4, %v10806_v19  ;;  %v1848_v15 = vadd.f32 %v11459_v18, %v1847_v9  ;;  %v3041_v10 = vcombine.high %v3033_v26, %v3033_v26  ;;  %v11469_v38 = vrot.slane %v3033_v26, %v10806_v19 }
 0x1a0   :  { %v9900_v61 = vpop.f32.mrf.mxu1 }
 0x1a1   :  { %v3042_v32 = vcombine.high %v3040_v5, %v3040_v5  ;;  %v3082_v52 = vrot.slane %v1848_v15, %v10806_v19  ;;  %13448 = vst [vmem:[#allocation18_spill] sm:$0xff] %v11469_v38  ;;  %v3056_v53 = vrot.slane %v3040_v5, %v10806_v19  ;;  %v3063_v43 = vrot.slane %v3041_v10, %v10806_v19 }
 0x1a2   :  { %v3075_v55 = vcombine.high %v1848_v15, %v1848_v15  ;;  %v3071_v20 = vcombine.high %v11469_v38, %v11469_v38 }
 0x1a3   :  { %v3070_v51 = vrot.slane %v3042_v32, %v10806_v19  ;;  %v3098_v31 = vrot.slane %v3082_v52, %v10806_v19  ;;  %v3090_v42 = vcombine.high %v3082_v52, %v3082_v52  ;;  %v3072_v14 = vcombine.high %v3056_v53, %v3056_v53 }
 0x1a4   :  { %v3073_v13 = vcombine.high %v3063_v43, %v3063_v43  ;;  %v3089_v16 = vrot.slane %v3075_v55, %v10806_v19  ;;  %v3650_v34 = vcombine.low %v3063_v43, %v3071_v20 }
 0x1a5   :  { %v3074_v8 = vcombine.high %v3070_v51, %v3070_v51  ;;  %v3112_v7 = vrot.slane %v3090_v42, %v10806_v19  ;;  %v3120_v44 = vcombine.high %v3098_v31, %v3098_v31  ;;  %v3652_v29 = vcombine.low %v3070_v51, %v3072_v14 }
 0x1a6   :  { %v3651_v63 = vcombine.low %v3073_v13, %v3056_v53  ;;  %v3105_v22 = vrot.slane %v3089_v16, %v10806_v19  ;;  %v3091_v59 = vcombine.high %v3089_v16, %v3089_v16  ;;  %v3660_v27 = vrot.slane %v3650_v34, %v10806_v19 }
 0x1a7   :  { %v3653_v62 = vcombine.low %v3074_v8, %v3098_v31  ;;  %v3122_v28 = vcombine.high %v3112_v7, %v3112_v7  ;;  %v3699_v60 = vcombine.low %v3112_v7, %v3120_v44  ;;  %v3674_v23 = vrot.slane %v3652_v29, %v10806_v19 }
 0x1a8   :  { %v3121_v50 = vcombine.high %v3105_v22, %v3105_v22  ;;  %v3667_v3 = vrot.slane %v3651_v63, %v10806_v19  ;;  %v3119_v46 = vrot.slane %v3091_v59, %v10806_v19 }
 0x1a9   :  { %v3681_v36 = vrot.slane %v3653_v62, %v10806_v19  ;;  %v3700_v1 = vcombine.low %v3122_v28, %v3105_v22  ;;  %v3709_v54 = vrot.slane %v3699_v60, %v10806_v19 }
 0x1aa   :  { %v3682_v25 = vcombine.low %v3660_v27, %v3667_v3  ;;  %v11486_v11 = vcombine.low %v3119_v46, %v3121_v50  ;;  %v3123_v58 = vcombine.high %v3119_v46, %v3119_v46 }
 0x1ab   :  { %v3683_v21 = vcombine.low %v3674_v23, %v3681_v36  ;;  %v3716_v45 = vrot.slane %v3700_v1, %v10806_v19 }
 0x1ac   :  { %13449 = vst [vmem:[#allocation20_spill] sm:$0xff] %v11486_v11  ;;  %v3690_v12 = vrot.slane %v3682_v25, %v10806_v19 }
 0x1ad   :  { %v3697_v56 = vrot.slane %v3683_v21, %v10806_v19  ;;  %v11495_v24 = vcombine.low %v3709_v54, %v3716_v45 }
 0x1af   :  { %v11493_v6 = vcombine.low %v3690_v12, %v3697_v56  ;;  %13451 = vst [vmem:[#allocation22_spill] sm:$0xff] %v11495_v24 }
 0x1b1   :  { %13450 = vst [vmem:[#allocation19_spill] sm:$0xff] %v11493_v6 }
 0x1b6   :  { %v1812_v57 = vpop.f32.mrf.mxu0 }
 0x1b7   :  { %v1852_v40 = vpop.f32.mrf.mxu1  ;;  %v1813_v30 = vadd.f32 %v11459_v18, %v1812_v57 }
 0x1b8   :  { %v1853_v49 = vadd.f32 %v11459_v18, %v1852_v40  ;;  %v9883_v17 = vpop.f32.mrf.mxu0 }
 0x1b9   :  { %v9903_v35 = vpop.f32.mrf.mxu1  ;;  %v2634_v0 = vcombine.high %v1813_v30, %v1813_v30  ;;  %v2641_v41 = vrot.slane %v1813_v30, %v10806_v19 }
 0x1ba   :  { %v3124_v47 = vcombine.high %v1853_v49, %v1853_v49  ;;  %v3131_v2 = vrot.slane %v1853_v49, %v10806_v19  ;;  %v1815_v5 = vpop.f32.mrf.mxu0 }
 0x1bb   :  { %v1855_v33 = vpop.f32.mrf.mxu1  ;;  %v2648_v26 = vrot.slane %v2634_v0, %v10806_v19  ;;  %v2649_v7 = vcombine.high %v2641_v41, %v2641_v41  ;;  %v2657_v20 = vrot.slane %v2641_v41, %v10806_v19  ;;  %v1816_v14 = vadd.f32 %v11459_v18, %v1815_v5 }
 0x1bc   :  { %v3138_v48 = vrot.slane %v3124_v47, %v10806_v19  ;;  %v3139_v39 = vcombine.high %v3131_v2, %v3131_v2  ;;  %v3147_v4 = vrot.slane %v3131_v2, %v10806_v19  ;;  %v1856_v9 = vadd.f32 %v11459_v18, %v1855_v33  ;;  %v9884_v31 = vpop.f32.mrf.mxu0 }
 0x1bd   :  { %v9904_v15 = vpop.f32.mrf.mxu1  ;;  %v2650_v34 = vcombine.high %v2648_v26, %v2648_v26  ;;  %v2671_v25 = vrot.slane %v2649_v7, %v10806_v19  ;;  %v11536_v47 = vrot.slane %v2648_v26, %v10806_v19 }
 0x1be   :  { %v3140_v32 = vcombine.high %v3138_v48, %v3138_v48  ;;  %v3154_v52 = vrot.slane %v3138_v48, %v10806_v19  ;;  %v3161_v51 = vrot.slane %v3139_v39, %v10806_v19  ;;  %v3169_v10 = vcombine.high %v3147_v4, %v3147_v4  ;;  %v1820_v13 = vpop.f32.mrf.mxu0 }
 0x1bf   :  { %v11505_v8 = vcombine.low %v3123_v58, %v3147_v4  ;;  %v3173_v42 = vcombine.high %v1856_v9, %v1856_v9  ;;  %v3180_v62 = vrot.slane %v1856_v9, %v10806_v19  ;;  %v1860_v53 = vpop.f32.mrf.mxu1  ;;  %v11527_v35 = vrot.slane %v2650_v34, %v10806_v19 }
 0x1c0   :  { %v3168_v55 = vrot.slane %v3140_v32, %v10806_v19  ;;  %v3170_v29 = vcombine.high %v3154_v52, %v3154_v52  ;;  %v3171_v22 = vcombine.high %v3161_v51, %v3161_v51  ;;  %v11515_v59 = vcombine.low %v3161_v51, %v3169_v10  ;;  %v9887_v60 = vpop.f32.mrf.mxu0 }
 0x1c1   :  { %13452 = vst [vmem:[#allocation21_spill] sm:$0xff] %v11505_v8  ;;  %v3187_v16 = vrot.slane %v3173_v42, %v10806_v19  ;;  %v3188_v44 = vcombine.high %v3180_v62, %v3180_v62  ;;  %v3196_v28 = vrot.slane %v3180_v62, %v10806_v19  ;;  %v9907_v63 = vpop.f32.mrf.mxu1  ;;  %v1861_v21 = vadd.f32 %v11459_v18, %v1860_v53 }
 0x1c2   :  { %13453 = vst [vmem:[#allocation26_spill] sm:$0xff] %v11515_v59  ;;  %v3172_v36 = vcombine.high %v3168_v55, %v3168_v55  ;;  %v1823_v54 = vpop.f32.mrf.mxu0  ;;  %v11529_v12 = vcombine.low %v3171_v22, %v3154_v52  ;;  %v11531_v56 = vcombine.low %v3168_v55, %v3170_v29  ;;  %v3244_v33 = vcombine.low %v2657_v20, %v2671_v25 }
 0x1c3   :  { %v3189_v1 = vcombine.high %v3187_v16, %v3187_v16  ;;  %v3203_v50 = vrot.slane %v3187_v16, %v10806_v19  ;;  %v3210_v27 = vrot.slane %v3188_v44, %v10806_v19  ;;  %v3218_v3 = vcombine.high %v3196_v28, %v3196_v28  ;;  %v1863_v23 = vpop.f32.mrf.mxu1 }
 0x1c4   :  { %v11521_v40 = vcombine.low %v3172_v36, %v3196_v28  ;;  %13455 = vst [vmem:[#allocation24_spill] sm:$0xff] %v11529_v12  ;;  %13456 = vst [vmem:[#allocation25_spill] sm:$0xff] %v11531_v56  ;;  %v9888_v2 = vpop.f32.mrf.mxu0  ;;  %v9653_v0 = vcombine.high %v2657_v20, %v2671_v25  ;;  %v3228_v48 = vrot.slane %v1861_v21, %v10806_v19  ;;  %v11558_v20 = vld [vmem:[%s13366_s6] ss:$0 sm:$0xff] }
 0x1c5   :  { %v3217_v45 = vrot.slane %v3189_v1, %v10806_v19  ;;  %v3219_v49 = vcombine.high %v3203_v50, %v3203_v50  ;;  %v3220_v57 = vcombine.high %v3210_v27, %v3210_v27  ;;  %v9908_v30 = vpop.f32.mrf.mxu1  ;;  %v11533_v58 = vcombine.low %v3210_v27, %v3218_v3 }
 0x1c6   :  { %13454 = vst [vmem:[#allocation23_spill] sm:$0xff] %v11521_v40  ;;  %v2683_v39 = vcombine.high %v1816_v14, %v1816_v14  ;;  %v2690_v4 = vrot.slane %v1816_v14, %v10806_v19  ;;  %v1821_v9 = vadd.f32 %v11459_v18, %v1820_v13  ;;  %v1828_v5 = vpop.f32.mrf.mxu0  ;;  %v1824_v52 = vadd.f32 %v11459_v18, %v1823_v54 }
 0x1c7   :  { %13457 = vst [vmem:[#allocation17_spill] sm:$0xff] %v11533_v58  ;;  %v3221_v41 = vcombine.high %v3217_v45, %v3217_v45  ;;  %v11543_v15 = vcombine.low %v3220_v57, %v3203_v50  ;;  %v11545_v32 = vcombine.low %v3217_v45, %v3219_v49  ;;  %v3229_v51 = vcombine.high %v3228_v48, %v3228_v48 }
 0x1c8   :  { %v3236_v10 = vrot.slane %v3228_v48, %v10806_v19  ;;  %v2697_v31 = vrot.slane %v2683_v39, %v10806_v19  ;;  %v2698_v42 = vcombine.high %v2690_v4, %v2690_v4  ;;  %v9891_v62 = vpop.f32.mrf.mxu0  ;;  %v2732_v55 = vcombine.high %v1821_v9, %v1821_v9 }
 0x1c9   :  { %13458 = vst [vmem:[#allocation27_spill] sm:$0xff] %v11543_v15  ;;  %13459 = vst [vmem:[#allocation28_spill] sm:$0xff] %v11545_v32  ;;  %v2739_v7 = vrot.slane %v1821_v9, %v10806_v19  ;;  %v11561_v13 = vadd.f32 %v11459_v18, %v1828_v5  ;;  %v11568_v34 = vrot.slane %v3244_v33, %v10806_v19 }
 0x1ca   :  { %v11563_v16 = vcombine.low %v3221_v41, %v3236_v10  ;;  %v2699_v44 = vcombine.high %v2697_v31, %v2697_v31  ;;  %v11565_v28 = vpop.f32.mrf.mxu0  ;;  %v11571_v63 = vrot.slane %v9653_v0, %v10806_v19  ;;  %v2706_v29 = vrot.slane %v2690_v4, %v10806_v19 }
 0x1cb   :  { %v2720_v22 = vrot.slane %v2698_v42, %v10806_v19  ;;  %v2746_v36 = vrot.slane %v2732_v55, %v10806_v19  ;;  %v2747_v60 = vcombine.high %v2739_v7, %v2739_v7  ;;  %v11577_v50 = vrot.slane %v3229_v51, %v10806_v19 }
 0x1cc   :  { %v2567_v14 = vpop.f32.mrf.mxu1  ;;  %13460 = vst [vmem:[#allocation29_spill] sm:$0xff] %v11563_v16  ;;  %v11580_v27 = vrot.slane %v2699_v44, %v10806_v19  ;;  %v2781_v23 = vcombine.high %v1824_v52, %v1824_v52  ;;  %v9892_v25 = vpop.f32.mrf.mxu0  ;;  %v11584_v21 = vrot.slane %v2697_v31, %v10806_v19  ;;  %v2755_v2 = vrot.slane %v2739_v7, %v10806_v19 }
 0x1cd   :  { %13461 = vst [vmem:[#allocation30_spill] sm:$0xff] %v11577_v50  ;;  %v2568_v3 = vadd.f32 %v11558_v20, %v2567_v14  ;;  %v3293_v54 = vcombine.low %v2706_v29, %v2720_v22  ;;  %v9655_v45 = vcombine.high %v2706_v29, %v2720_v22  ;;  %v2748_v49 = vcombine.high %v2746_v36, %v2746_v36 }
 0x1ce   :  { %v9915_v1 = vpop.f32.mrf.mxu1  ;;  %v2769_v33 = vrot.slane %v2747_v60, %v10806_v19  ;;  %v11591_v41 = vrot.slane %v2746_v36, %v10806_v19  ;;  %v2788_v4 = vrot.slane %v1824_v52, %v10806_v19  ;;  %v2795_v31 = vrot.slane %v2781_v23, %v10806_v19 }
 0x1cf   :  { %v3951_v0 = vcombine.high %v2568_v3, %v2568_v3  ;;  %v11594_v48 = vrot.slane %v2748_v49, %v10806_v19  ;;  %v3958_v39 = vrot.slane %v2568_v3, %v10806_v19  ;;  %v11605_v62 = vrot.slane %v3293_v54, %v10806_v19 }
 0x1d0   :  { %v2570_v57 = vpop.f32.mrf.mxu1  ;;  %v3342_v51 = vcombine.low %v2755_v2, %v2769_v33  ;;  %v11608_v55 = vrot.slane %v9655_v45, %v10806_v19  ;;  %v9657_v52 = vcombine.high %v2755_v2, %v2769_v33  ;;  %v2796_v1 = vcombine.high %v2788_v4, %v2788_v4 }
 0x1d1   :  { %v3965_v10 = vrot.slane %v3951_v0, %v10806_v19  ;;  %v3966_v7 = vcombine.high %v3958_v39, %v3958_v39  ;;  %v3974_v36 = vrot.slane %v3958_v39, %v10806_v19  ;;  %v2797_v3 = vcombine.high %v2795_v31, %v2795_v31 }
 0x1d2   :  { %v9916_v9 = vpop.f32.mrf.mxu1  ;;  %v11619_v23 = vrot.slane %v3342_v51, %v10806_v19  ;;  %v2571_v45 = vadd.f32 %v11558_v20, %v2570_v57  ;;  %v2818_v0 = vrot.slane %v2796_v1, %v10806_v19  ;;  %v11646_v1 = vrot.slane %v2795_v31, %v10806_v19 }
 0x1d3   :  { %v3967_v29 = vcombine.high %v3965_v10, %v3965_v10  ;;  %v3988_v60 = vrot.slane %v3966_v7, %v10806_v19  ;;  %v11622_v25 = vrot.slane %v3965_v10, %v10806_v19  ;;  %v11630_v39 = vrot.slane %v2797_v3, %v10806_v19 }
 0x1d4   :  { %v11633_v9 = vrot.slane %v9657_v52, %v10806_v19  ;;  %v4000_v51 = vcombine.high %v2571_v45, %v2571_v45  ;;  %v4007_v10 = vrot.slane %v2571_v45, %v10806_v19  ;;  %v2830_v7 = vcombine.high %v11561_v13, %v11561_v13 }
 0x1d5   :  { %v11614_v22 = vpop.f32.mrf.mxu0  ;;  %v11625_v54 = vrot.slane %v3967_v29, %v10806_v19  ;;  %v4561_v2 = vcombine.low %v3974_v36, %v3988_v60  ;;  %v9665_v33 = vcombine.high %v3974_v36, %v3988_v60  ;;  %v2804_v60 = vrot.slane %v2788_v4, %v10806_v19 }
 0x1d6   :  { %v4015_v30 = vcombine.high %v4007_v10, %v4007_v10  ;;  %v2837_v4 = vrot.slane %v11561_v13, %v10806_v19  ;;  %v13470_v59 = vcombine.high %v11591_v41, %v11594_v48 }
 0x1d7   :  { %v9895_v49 = vpop.f32.mrf.mxu0  ;;  %v11649_v3 = vrot.slane %v4561_v2, %v10806_v19  ;;  %v11652_v45 = vrot.slane %v9665_v33, %v10806_v19  ;;  %v3391_v43 = vcombine.low %v2804_v60, %v2818_v0  ;;  %v9659_v61 = vcombine.high %v2804_v60, %v2818_v0 }
 0x1d8   :  { %v4014_v49 = vrot.slane %v4000_v51, %v10806_v19  ;;  %v4023_v2 = vrot.slane %v4007_v10, %v10806_v19  ;;  %v4037_v57 = vrot.slane %v4015_v30, %v10806_v19  ;;  %v2844_v33 = vrot.slane %v2830_v7, %v10806_v19 }
 0x1d9   :  { %v11638_v29 = vpop.f32.mrf.mxu0  ;;  %v2845_v0 = vcombine.high %v2837_v4, %v2837_v4  ;;  %v2853_v10 = vrot.slane %v2837_v4, %v10806_v19 }
 0x1da   :  { %v2575_v52 = vpop.f32.mrf.mxu1  ;;  %v4016_v36 = vcombine.high %v4014_v49, %v4014_v49  ;;  %v4610_v13 = vcombine.low %v4023_v2, %v4037_v57  ;;  %v2846_v14 = vcombine.high %v2844_v33, %v2844_v33 }
 0x1db   :  { %v9896_v17 = vpop.f32.mrf.mxu0  ;;  %v2576_v60 = vadd.f32 %v11558_v20, %v2575_v52  ;;  %v2867_v30 = vrot.slane %v2845_v0, %v10806_v19 }
 0x1dc   :  { %v9919_v31 = vpop.f32.mrf.mxu1  ;;  %v4030_v17 = vrot.slane %v4014_v49, %v10806_v19  ;;  %v4044_v44 = vrot.slane %v4016_v36, %v10806_v19  ;;  %v11671_v49 = vrot.slane %v4610_v13, %v10806_v19  ;;  %v11677_v36 = vrot.slane %v3391_v43, %v10806_v19 }
 0x1dd   :  { %v9667_v31 = vcombine.high %v4023_v2, %v4037_v57  ;;  %v4049_v42 = vcombine.high %v2576_v60, %v2576_v60  ;;  %v4056_v7 = vrot.slane %v2576_v60, %v10806_v19  ;;  %v11680_v57 = vrot.slane %v9659_v61, %v10806_v19 }
 0x1de   :  { %v2578_v46 = vpop.f32.mrf.mxu1  ;;  %v4612_v51 = vcombine.low %v4030_v17, %v4044_v44  ;;  %v9668_v53 = vcombine.high %v4030_v17, %v4044_v44  ;;  %v1832_v2 = vadd.f32 %v11459_v18, %v11565_v28  ;;  %v11688_v44 = vrot.slane %v2844_v33, %v10806_v19 }
 0x1df   :  { %v11674_v52 = vrot.slane %v9667_v31, %v10806_v19  ;;  %v4063_v4 = vrot.slane %v4049_v42, %v10806_v19  ;;  %v11691_v17 = vrot.slane %v2846_v14, %v10806_v19  ;;  %v3440_v0 = vcombine.low %v2853_v10, %v2867_v30 }
 0x1e0   :  { %v9920_v5 = vpop.f32.mrf.mxu1  ;;  %v4064_v60 = vcombine.high %v4056_v7, %v4056_v7  ;;  %v11694_v43 = vrot.slane %v4612_v51, %v10806_v19  ;;  %v11697_v61 = vrot.slane %v9668_v53, %v10806_v19  ;;  %v9661_v28 = vcombine.high %v2853_v10, %v2867_v30 }
 0x1e1   :  { %v4065_v31 = vcombine.high %v4063_v4, %v4063_v4  ;;  %v4072_v33 = vrot.slane %v4056_v7, %v10806_v19  ;;  %v4079_v26 = vrot.slane %v4063_v4, %v10806_v19  ;;  %v2879_v37 = vcombine.high %v1832_v2, %v1832_v2 }
 0x1e2   :  { %v4086_v14 = vrot.slane %v4064_v60, %v10806_v19  ;;  %v2886_v50 = vrot.slane %v1832_v2, %v10806_v19  ;;  %v13462_v53 = vcombine.low %v11536_v47, %v11527_v35  ;;  %v13463_v10 = vcombine.high %v11536_v47, %v11527_v35 }
 0x1e3   :  { %v11685_v5 = vpop.f32.mrf.mxu1  ;;  %v4093_v7 = vrot.slane %v4065_v31, %v10806_v19  ;;  %v3276_v60 = vcombine.low %v11568_v34, %v11571_v63  ;;  %v2893_v16 = vrot.slane %v2879_v37, %v10806_v19  ;;  %v11724_v47 = vrot.slane %v3440_v0, %v10806_v19 }
 0x1e4   :  { %v3268_v51 = vrot.slane %v13462_v53, %v10806_v19  ;;  %v3275_v30 = vrot.slane %v13463_v10, %v10806_v19  ;;  %v4659_v4 = vcombine.low %v4072_v33, %v4086_v14  ;;  %v9669_v42 = vcombine.high %v4072_v33, %v4086_v14 }
 0x1e5   :  { %v9923_v13 = vpop.f32.mrf.mxu1  ;;  %v2894_v53 = vcombine.high %v2886_v50, %v2886_v50  ;;  %v4661_v31 = vcombine.low %v4079_v26, %v4093_v7  ;;  %v9670_v10 = vcombine.high %v4079_v26, %v4093_v7  ;;  %v2895_v63 = vcombine.high %v2893_v16, %v2893_v16 }
 0x1e6   :  { %v3277_v32 = vcombine.low %v3268_v51, %v3275_v30  ;;  %v11727_v33 = vrot.slane %v4659_v4, %v10806_v19  ;;  %v11730_v34 = vrot.slane %v9669_v42, %v10806_v19  ;;  %v2902_v51 = vrot.slane %v2886_v50, %v10806_v19 }
 0x1e7   :  { %v11713_v13 = vpop.f32.mrf.mxu1  ;;  %v2916_v37 = vrot.slane %v2894_v53, %v10806_v19  ;;  %v3284_v0 = vrot.slane %v3276_v60, %v10806_v19  ;;  %v11742_v30 = vrot.slane %v4661_v31, %v10806_v19  ;;  %v11745_v42 = vrot.slane %v2893_v16, %v10806_v19 }
 0x1e8   :  { %v3291_v26 = vrot.slane %v3277_v32, %v10806_v19  ;;  %v11748_v7 = vrot.slane %v2895_v63, %v10806_v19  ;;  %v2579_v4 = vadd.f32 %v11558_v20, %v2578_v46  ;;  %v1837_v50 = vadd.f32 %v11459_v18, %v11614_v22 }
 0x1e9   :  { %v9924_v15 = vpop.f32.mrf.mxu1  ;;  %v13464_v32 = vcombine.low %v11584_v21, %v11580_v27  ;;  %v13465_v16 = vcombine.high %v11584_v21, %v11580_v27  ;;  %v11762_v63 = vrot.slane %v9670_v10, %v10806_v19  ;;  %v3325_v21 = vcombine.low %v11605_v62, %v11608_v55 }
 0x1ea   :  { %v11736_v15 = vrot.slane %v9661_v28, %v10806_v19  ;;  %v3292_v28 = vcombine.low %v3284_v0, %v3291_v26  ;;  %v3489_v0 = vcombine.low %v2902_v51, %v2916_v37  ;;  %v9663_v26 = vcombine.high %v2902_v51, %v2916_v37 }
 0x1eb   :  { %v11733_v14 = vpop.f32.mrf.mxu1  ;;  %v3317_v60 = vrot.slane %v13464_v32, %v10806_v19  ;;  %v3324_v31 = vrot.slane %v13465_v16, %v10806_v19  ;;  %v4098_v22 = vcombine.high %v2579_v4, %v2579_v4  ;;  %v4105_v35 = vrot.slane %v2579_v4, %v10806_v19 }
 0x1ec   :  { %3874 = vxpose.xlu1.b32.start [1/7] (short) (narrow) %v3292_v28, 32  ;;  %v2928_v32 = vcombine.high %v1837_v50, %v1837_v50  ;;  %v2935_v2 = vrot.slane %v1837_v50, %v10806_v19  ;;  %v2584_v16 = vadd.f32 %v11558_v20, %v11685_v5  ;;  %v1840_v4 = vadd.f32 %v11459_v18, %v11638_v29 }
 0x1ed   :  { %v9927_v53 = vpop.f32.mrf.mxu1  ;;  %v3326_v10 = vcombine.low %v3317_v60, %v3324_v31  ;;  %v4112_v51 = vrot.slane %v4098_v22, %v10806_v19  ;;  %v4113_v28 = vcombine.high %v4105_v35, %v4105_v35  ;;  %v3333_v27 = vrot.slane %v3325_v21, %v10806_v19 }
 0x1ee   :  { %v2942_v46 = vrot.slane %v2928_v32, %v10806_v19  ;;  %v2943_v50 = vcombine.high %v2935_v2, %v2935_v2  ;;  %v11781_v58 = vrot.slane %v2935_v2, %v10806_v19  ;;  %v4121_v60 = vrot.slane %v4105_v35, %v10806_v19 }
 0x1ef   :  { %v11766_v53 = vpop.f32.mrf.mxu1  ;;  %v3340_v62 = vrot.slane %v3326_v10, %v10806_v19  ;;  %v4114_v5 = vcombine.high %v4112_v51, %v4112_v51  ;;  %v4135_v31 = vrot.slane %v4113_v28, %v10806_v19  ;;  %v4128_v10 = vrot.slane %v4112_v51, %v10806_v19 }
 0x1f0   :  { %v2944_v22 = vcombine.high %v2942_v46, %v2942_v46  ;;  %v11790_v32 = vrot.slane %v2942_v46, %v10806_v19  ;;  %v2965_v18 = vrot.slane %v2943_v50, %v10806_v19  ;;  %v2973_v29 = vcombine.high %v11781_v58, %v11781_v58 }
 0x1f1   :  { %v9928_v37 = vpop.f32.mrf.mxu1  ;;  %v3341_v2 = vcombine.low %v3333_v27, %v3340_v62  ;;  %v4708_v40 = vcombine.low %v4121_v60, %v4135_v31  ;;  %v9671_v6 = vcombine.high %v4121_v60, %v4135_v31  ;;  %v4147_v50 = vcombine.high %v2584_v16, %v2584_v16 }
 0x1f2   :  { %v4142_v37 = vrot.slane %v4114_v5, %v10806_v19  ;;  %v11800_v28 = vrot.slane %v2944_v22, %v10806_v19  ;;  %v2975_v46 = vcombine.high %v2965_v18, %v2965_v18  ;;  %v11805_v27 = vrot.slane %v3489_v0, %v10806_v19 }
 0x1f3   :  { %v11785_v55 = vpop.f32.mrf.mxu1  ;;  %3875 = vxpose.xlu1.b32.cont [2/7] (short) (narrow) %v3341_v2, 32  ;;  %v11808_v51 = vrot.slane %v9663_v26, %v10806_v19  ;;  %v11812_v31 = vcombine.low %v2965_v18, %v2973_v29  ;;  %v4154_v22 = vrot.slane %v2584_v16, %v10806_v19  ;;  %v4161_v2 = vrot.slane %v4147_v50, %v10806_v19 }
 0x1f4   :  { %v4710_v62 = vcombine.low %v4128_v10, %v4142_v37  ;;  %v9672_v60 = vcombine.high %v4128_v10, %v4142_v37  ;;  %v11817_v35 = vrot.slane %v4708_v40, %v10806_v19  ;;  %v11820_v0 = vrot.slane %v9671_v6, %v10806_v19 }
 0x1f5   :  { %v9931_v21 = vpop.f32.mrf.mxu1  ;;  %13466 = vst [vmem:[#allocation31_spill] sm:$0xff] %v11812_v31  ;;  %v11823_v26 = vcombine.low %v2975_v46, %v11790_v32  ;;  %v2977_v56 = vcombine.high %v1840_v4, %v1840_v4  ;;  %v4162_v18 = vcombine.high %v4154_v22, %v4154_v22  ;;  %v4163_v29 = vcombine.high %v4161_v2, %v4161_v2 }
 0x1f6   :  { %v11826_v5 = vrot.slane %v4710_v62, %v10806_v19  ;;  %v2976_v16 = vcombine.high %v11800_v28, %v11800_v28  ;;  %v4170_v40 = vrot.slane %v4154_v22, %v10806_v19  ;;  %v4177_v37 = vrot.slane %v4161_v2, %v10806_v19 }
 0x1f7   :  { %v11802_v24 = vpop.f32.mrf.mxu1  ;;  %13467 = vst [vmem:[#allocation32_spill] sm:$0xff] %v11823_v26  ;;  %v2984_v6 = vrot.slane %v1840_v4, %v10806_v19  ;;  %v2991_v46 = vrot.slane %v2977_v56, %v10806_v19  ;;  %v4184_v50 = vrot.slane %v4162_v18, %v10806_v19  ;;  %v4191_v62 = vrot.slane %v4163_v29, %v10806_v19 }
 0x1f8   :  { %v3373_v22 = vrot.slane %v13470_v59, %v10806_v19  ;;  %v2587_v59 = vadd.f32 %v11558_v20, %v11713_v13 }
 0x1f9   :  { %v9932_v21 = vpop.f32.mrf.mxu1  ;;  %v2992_v2 = vcombine.high %v2984_v6, %v2984_v6  ;;  %v2993_v8 = vcombine.high %v2991_v46, %v2991_v46  ;;  %v3000_v4 = vrot.slane %v2984_v6, %v10806_v19  ;;  %v11848_v56 = vrot.slane %v2991_v46, %v10806_v19 }
 0x1fa   :  { %v13469_v21 = vcombine.low %v11591_v41, %v11594_v48  ;;  %v4757_v18 = vcombine.low %v4170_v40, %v4184_v50  ;;  %v9673_v29 = vcombine.high %v4170_v40, %v4184_v50  ;;  %v4759_v38 = vcombine.low %v4177_v37, %v4191_v62 }
 0x1fb   :  { %v11830_v10 = vpop.f32.mrf.mxu1  ;;  %v11854_v31 = vrot.slane %v2993_v8, %v10806_v19  ;;  %v11861_v41 = vrot.slane %v9672_v60, %v10806_v19  ;;  %v3022_v40 = vcombine.high %v3000_v4, %v3000_v4 }
 0x1fc   :  { %13468 = vst [vmem:[#allocation33_spill] sm:$0xff] %v11830_v10  ;;  %v3366_v12 = vrot.slane %v13469_v21, %v10806_v19  ;;  %v9674_v10 = vcombine.high %v4177_v37, %v4191_v62  ;;  %v3014_v21 = vrot.slane %v2992_v2, %v10806_v19  ;;  %v3023_v37 = vcombine.high %v11848_v56, %v11848_v56 }
 0x1fd   :  { %v9935_v11 = vpop.f32.mrf.mxu1  ;;  %v11868_v8 = vrot.slane %v4757_v18, %v10806_v19  ;;  %v11871_v46 = vrot.slane %v9673_v29, %v10806_v19  ;;  %v4203_v29 = vrot.slane %v2587_v59, %v10806_v19 }
 0x1fe   :  { %v3374_v11 = vcombine.low %v11619_v23, %v11633_v9  ;;  %v11874_v23 = vrot.slane %v4759_v38, %v10806_v19  ;;  %v11876_v9 = vcombine.low %v2976_v16, %v3000_v4  ;;  %v11879_v13 = vrot.slane %v9674_v10, %v10806_v19 }
 0x1ff   :  { %v11850_v26 = vpop.f32.mrf.mxu1  ;;  %v3024_v60 = vcombine.high %v3014_v21, %v3014_v21  ;;  %v3375_v62 = vcombine.low %v3366_v12, %v3373_v22  ;;  %v13473_v38 = vcombine.low %v11622_v25, %v11625_v54  ;;  %v13474_v4 = vcombine.high %v11622_v25, %v11625_v54 }
 0x200   :  { %13471 = vst [vmem:[#allocation34_spill] sm:$0xff] %v11850_v26  ;;  %v3382_v18 = vrot.slane %v3374_v11, %v10806_v19  ;;  %v4593_v12 = vcombine.low %v11649_v3, %v11652_v45  ;;  %v13475_v22 = vcombine.low %v11646_v1, %v11630_v39  ;;  %v11902_v48 = vcombine.low %v3014_v21, %v3022_v40 }
 0x201   :  { %v9936_v6 = vpop.f32.mrf.mxu1  ;;  %v4585_v16 = vrot.slane %v13473_v38, %v10806_v19  ;;  %v3389_v10 = vrot.slane %v3375_v62, %v10806_v19  ;;  %v4592_v50 = vrot.slane %v13474_v4, %v10806_v19  ;;  %v13476_v62 = vcombine.high %v11646_v1, %v11630_v39 }
 0x202   :  { %v4196_v6 = vcombine.high %v2587_v59, %v2587_v59  ;;  %v3415_v11 = vrot.slane %v13475_v22, %v10806_v19  ;;  %v4219_v4 = vrot.slane %v4203_v29, %v10806_v19  ;;  %v3423_v45 = vcombine.low %v11677_v36, %v11680_v57 }
 0x203   :  { %v11883_v2 = vpop.f32.mrf.mxu1  ;;  %v3422_v25 = vrot.slane %v13476_v62, %v10806_v19  ;;  %v3390_v54 = vcombine.low %v3382_v18, %v3389_v10  ;;  %v4594_v3 = vcombine.low %v4585_v16, %v4592_v50  ;;  %v4601_v40 = vrot.slane %v4593_v12, %v10806_v19 }
 0x204   :  { %13472 = vst [vmem:[#allocation35_spill] sm:$0xff] %v11883_v2  ;;  %v4210_v38 = vrot.slane %v4196_v6, %v10806_v19  ;;  %v4211_v2 = vcombine.high %v4203_v29, %v4203_v29  ;;  %v3431_v1 = vrot.slane %v3423_v45, %v10806_v19  ;;  %v2592_v50 = vadd.f32 %v11558_v20, %v11733_v14 }
 0x205   :  { %v9939_v59 = vpop.f32.mrf.mxu1  ;;  %v3424_v6 = vcombine.low %v3415_v11, %v3422_v25  ;;  %3876 = vxpose.xlu1.b32.cont [3/7] (short) (narrow) %v3390_v54, 32  ;;  %v4608_v39 = vrot.slane %v4594_v3, %v10806_v19  ;;  %v4789_v11 = vcombine.low %v11868_v8, %v11871_v46  ;;  %v11930_v14 = vcombine.low %v11854_v31, %v3023_v37  ;;  %v13486_v8 = vld [vmem:[#allocation32_spill] sm:$0xff] }
 0x206   :  { %v4212_v22 = vcombine.high %v4210_v38, %v4210_v38  ;;  %v4233_v21 = vrot.slane %v4211_v2, %v10806_v19  ;;  %v4226_v59 = vrot.slane %v4210_v38, %v10806_v19  ;;  %v4643_v2 = vcombine.low %v11694_v43, %v11697_v61 }
 0x207   :  { %v2618_v26 = vpop.f32.mrf.mxu1  ;;  %v4609_v16 = vcombine.low %v4601_v40, %v4608_v39  ;;  %v4245_v10 = vcombine.high %v2592_v50, %v2592_v50  ;;  %v4252_v12 = vrot.slane %v2592_v50, %v10806_v19  ;;  %v11927_v38 = vcombine.low %v3024_v60, %v11848_v56 }
 0x208   :  { %v4240_v36 = vrot.slane %v4212_v22, %v10806_v19  ;;  %v4806_v57 = vcombine.low %v4219_v4, %v4233_v21  ;;  %v3438_v26 = vrot.slane %v3424_v6, %v10806_v19  ;;  %v9675_v29 = vcombine.high %v4219_v4, %v4233_v21 }
 0x209   :  { %v9940_v18 = vpop.f32.mrf.mxu1  ;;  %5191 = vxpose.xlu0.b32.start [1/7] (short) (narrow) %v4609_v16, 64  ;;  %v4259_v54 = vrot.slane %v4245_v10, %v10806_v19  ;;  %v4260_v43 = vcombine.high %v4252_v12, %v4252_v12  ;;  %v11934_v61 = vrot.slane %v4252_v12, %v10806_v19  ;;  %v13477_v56 = vcombine.low %v11671_v49, %v11674_v52 }
 0x20a   :  { %v4808_v62 = vcombine.low %v4226_v59, %v4240_v36  ;;  %v3439_v25 = vcombine.low %v3431_v1, %v3438_v26  ;;  %v9676_v4 = vcombine.high %v4226_v59, %v4240_v36  ;;  %v11937_v3 = vrot.slane %v4806_v57, %v10806_v19 }
 0x20b   :  { %v4650_v60 = vrot.slane %v13477_v56, %v10806_v19  ;;  %v4657_v37 = vrot.slane %v4643_v2, %v10806_v19  ;;  %v11945_v45 = vrot.slane %v9675_v29, %v10806_v19  ;;  %v4261_v22 = vcombine.high %v4259_v54, %v4259_v54 }
 0x20c   :  { %3877 = vxpose.xlu1.b32.cont [4/7] (short) (narrow) %v3439_v25, 32  ;;  %v4282_v21 = vrot.slane %v4260_v43, %v10806_v19  ;;  %v4290_v40 = vcombine.high %v11934_v61, %v11934_v61  ;;  %v11951_v6 = vrot.slane %v4808_v62, %v10806_v19  ;;  %v13478_v49 = vcombine.low %v11688_v44, %v11691_v17 }
 0x20d   :  { %v4658_v59 = vcombine.low %v4650_v60, %v4657_v37  ;;  %v13479_v39 = vcombine.high %v11688_v44, %v11691_v17  ;;  %v4275_v50 = vrot.slane %v4259_v54, %v10806_v19  ;;  %v4289_v18 = vrot.slane %v4261_v22, %v10806_v19 }
 0x20e   :  { %v3464_v52 = vrot.slane %v13478_v49, %v10806_v19  ;;  %v4292_v36 = vcombine.high %v4282_v21, %v4282_v21  ;;  %v11963_v57 = vcombine.low %v4282_v21, %v4290_v40  ;;  %v3472_v26 = vcombine.low %v11724_v47, %v11736_v15 }
 0x20f   :  { %v3471_v1 = vrot.slane %v13479_v39, %v10806_v19  ;;  %5192 = vxpose.xlu0.b32.cont [2/7] (short) (narrow) %v4658_v59, 64  ;;  %v2595_v29 = vadd.f32 %v11558_v20, %v11766_v53  ;;  %v4692_v16 = vcombine.low %v11742_v30, %v11762_v63  ;;  %v11972_v44 = vrot.slane %v9676_v4, %v10806_v19 }
 0x210   :  { %v11974_v17 = vcombine.low %v4292_v36, %v4275_v50  ;;  %v4293_v10 = vcombine.high %v4289_v18, %v4289_v18  ;;  %v13480_v12 = vcombine.low %v11727_v33, %v11730_v34  ;;  %v3480_v47 = vrot.slane %v3472_v26, %v10806_v19 }
 0x211   :  { %v3473_v2 = vcombine.low %v3464_v52, %v3471_v1  ;;  %v4294_v25 = vcombine.high %v2595_v29, %v2595_v29  ;;  %v4301_v53 = vrot.slane %v2595_v29, %v10806_v19  ;;  %v4706_v30 = vrot.slane %v4692_v16, %v10806_v19 }
 0x212   :  { %v4699_v62 = vrot.slane %v13480_v12, %v10806_v19  ;;  %v13481_v63 = vcombine.low %v11745_v42, %v11748_v7  ;;  %v13482_v43 = vcombine.high %v11745_v42, %v11748_v7  ;;  %v3521_v34 = vcombine.low %v11805_v27, %v11808_v51 }
 0x213   :  { %v3487_v15 = vrot.slane %v3473_v2, %v10806_v19  ;;  %v4308_v56 = vrot.slane %v4294_v25, %v10806_v19  ;;  %v4309_v60 = vcombine.high %v4301_v53, %v4301_v53  ;;  %v4317_v37 = vrot.slane %v4301_v53, %v10806_v19 }
 0x214   :  { %v3513_v54 = vrot.slane %v13481_v63, %v10806_v19  ;;  %v3520_v33 = vrot.slane %v13482_v43, %v10806_v19  ;;  %v4707_v22 = vcombine.low %v4699_v62, %v4706_v30  ;;  %v3529_v40 = vrot.slane %v3521_v34, %v10806_v19 }
 0x215   :  { %v3488_v4 = vcombine.low %v3480_v47, %v3487_v15  ;;  %v2600_v59 = vadd.f32 %v11558_v20, %v11785_v55  ;;  %v4310_v49 = vcombine.high %v4308_v56, %v4308_v56  ;;  %v4324_v42 = vrot.slane %v4308_v56, %v10806_v19 }
 0x216   :  { %v3522_v21 = vcombine.low %v3513_v54, %v3520_v33  ;;  %v4331_v7 = vrot.slane %v4309_v60, %v10806_v19  ;;  %v4339_v27 = vcombine.high %v4317_v37, %v4317_v37  ;;  %v12001_v51 = vcombine.low %v4293_v10, %v4317_v37  ;;  %5193 = vxpose.xlu0.b32.cont [3/7] (short) (narrow) %v4707_v22, 64 }
 0x217   :  { %3878 = vxpose.xlu1.b32.cont [5/7] (short) (narrow) %v3488_v4, 32  ;;  %v4343_v39 = vcombine.high %v2600_v59, %v2600_v59  ;;  %v4350_v1 = vrot.slane %v2600_v59, %v10806_v19  ;;  %v4291_v36 = vcombine.high %v4275_v50, %v4275_v50  ;;  %v4338_v26 = vrot.slane %v4310_v49, %v10806_v19 }
 0x218   :  { %v3536_v52 = vrot.slane %v3522_v21, %v10806_v19  ;;  %v4340_v2 = vcombine.high %v4324_v42, %v4324_v42  ;;  %v4341_v55 = vcombine.high %v4331_v7, %v4331_v7  ;;  %v4838_v29 = vcombine.low %v11937_v3, %v11945_v45 }
 0x219   :  { %v4357_v12 = vrot.slane %v4343_v39, %v10806_v19  ;;  %v4358_v62 = vcombine.high %v4350_v1, %v4350_v1  ;;  %v12009_v10 = vcombine.low %v4331_v7, %v4339_v27  ;;  %v4342_v25 = vcombine.high %v4338_v26, %v4338_v26 }
 0x21a   :  { %v3537_v16 = vcombine.low %v3529_v40, %v3536_v52  ;;  %v12011_v47 = vcombine.low %v4341_v55, %v4324_v42  ;;  %v4920_v15 = vcombine.low %v4338_v26, %v4340_v2  ;;  %v4366_v50 = vrot.slane %v4350_v1, %v10806_v19 }
 0x21b   :  { %v4359_v53 = vcombine.high %v4357_v12, %v4357_v12  ;;  %v4373_v30 = vrot.slane %v4357_v12, %v10806_v19  ;;  %v4380_v63 = vrot.slane %v4358_v62, %v10806_v19  ;;  %v4861_v54 = vrot.slane %v11934_v61, %v10806_v19  ;;  %v13496_v61 = vld [vmem:[#allocation26_spill] sm:$0xff] }
 0x21c   :  { %3879 = vxpose.xlu1.b32.cont [6/7] (short) (narrow) %v3537_v16, 32  ;;  %v12018_v43 = vcombine.low %v4289_v18, %v4291_v36  ;;  %v4900_v33 = vrot.slane %v12001_v51, %v10806_v19  ;;  %v4741_v34 = vcombine.low %v11826_v5, %v11861_v41  ;;  %v4388_v56 = vcombine.high %v4366_v50, %v4366_v50 }
 0x21d   :  { %v4387_v4 = vrot.slane %v4359_v53, %v10806_v19  ;;  %v4389_v60 = vcombine.high %v4373_v30, %v4373_v30  ;;  %v13483_v37 = vcombine.low %v11817_v35, %v11820_v0  ;;  %v4921_v21 = vcombine.low %v4342_v25, %v4366_v50 }
 0x21e   :  { %v4755_v40 = vrot.slane %v4741_v34, %v10806_v19  ;;  %v3544_v18 = vrot.slane %v11781_v58, %v10806_v19  ;;  %v2603_v59 = vadd.f32 %v11558_v20, %v11802_v24  ;;  %v4928_v5 = vrot.slane %v12009_v10, %v10806_v19 }
 0x21f   :  { %v4748_v22 = vrot.slane %v13483_v37, %v10806_v19  ;;  %v4935_v41 = vrot.slane %v12011_v47, %v10806_v19  ;;  %v4390_v49 = vcombine.high %v4380_v63, %v4380_v63  ;;  %v4942_v42 = vrot.slane %v4920_v15, %v10806_v19 }
 0x220   :  { %v4949_v35 = vrot.slane %v4921_v21, %v10806_v19  ;;  %v3551_v7 = vrot.slane %v3544_v18, %v10806_v19  ;;  %v4392_v27 = vcombine.high %v2603_v59, %v2603_v59  ;;  %v12041_v52 = vcombine.low %v4380_v63, %v4388_v56 }
 0x221   :  { %v4756_v0 = vcombine.low %v4748_v22, %v4755_v40  ;;  %v4969_v58 = vcombine.low %v4387_v4, %v4389_v60  ;;  %v4391_v39 = vcombine.high %v4387_v4, %v4387_v4  ;;  %v4399_v24 = vrot.slane %v2603_v59, %v10806_v19  ;;  %v13487_v59 = vld [vmem:[#allocation33_spill] sm:$0xff] }
 0x222   :  { %v12044_v1 = vcombine.low %v4942_v42, %v4949_v35  ;;  %3880 = vxpose.xlu1.b32.end [7/7] (short) (narrow) %v3551_v7, 32  ;;  %v4406_v36 = vrot.slane %v4392_v27, %v10806_v19  ;;  %v4790_v26 = vcombine.low %v11874_v23, %v11879_v13  ;;  %v4797_v16 = vrot.slane %v4789_v11, %v10806_v19  ;;  %v13485_v23 = vld [vmem:[#allocation31_spill] sm:$0xff] }
 0x223   :  { %5194 = vxpose.xlu0.b32.cont [4/7] (short) (narrow) %v4756_v0, 64  ;;  %v4407_v2 = vcombine.high %v4399_v24, %v4399_v24  ;;  %v4415_v55 = vrot.slane %v4399_v24, %v10806_v19  ;;  %v13484_v12 = vcombine.high %v11790_v32, %v11790_v32  ;;  %v3562_v13 = vrot.slane %v13485_v23, %v10806_v19 }
 0x224   :  { %v4408_v15 = vcombine.high %v4406_v36, %v4406_v36  ;;  %v4422_v25 = vrot.slane %v4406_v36, %v10806_v19  ;;  %v4804_v53 = vrot.slane %v4790_v26, %v10806_v19  ;;  %v3569_v46 = vrot.slane %v13486_v8, %v10806_v19 }
 0x225   :  { %v3554_v62 = vcombine.low %v11800_v28, %v13484_v12  ;;  %v4429_v50 = vrot.slane %v4407_v2, %v10806_v19  ;;  %v4437_v63 = vcombine.high %v4415_v55, %v4415_v55  ;;  %v4970_v34 = vcombine.low %v4391_v39, %v4415_v55  ;;  %v13488_v12 = vld [vmem:[#allocation18_spill] sm:$0xff] }
 0x226   :  { %v4436_v11 = vrot.slane %v4408_v15, %v10806_v19  ;;  %v4438_v32 = vcombine.high %v4422_v25, %v4422_v25  ;;  %v4805_v4 = vcombine.low %v4797_v16, %v4804_v53  ;;  %v4991_v60 = vrot.slane %v4969_v58, %v10806_v19 }
 0x227   :  { %v3576_v28 = vrot.slane %v3554_v62, %v10806_v19  ;;  %v4439_v56 = vcombine.high %v4429_v50, %v4429_v50  ;;  %v4998_v37 = vrot.slane %v4970_v34, %v10806_v19  ;;  %v3583_v22 = vrot.slane %v11876_v9, %v10806_v19 }
 0x228   :  { %v12071_v21 = vcombine.low %v4390_v49, %v4373_v30  ;;  %v4977_v40 = vrot.slane %v12041_v52, %v10806_v19  ;;  %5195 = vxpose.xlu0.b32.cont [5/7] (short) (narrow) %v4805_v4, 64  ;;  %v3584_v18 = vcombine.low %v3562_v13, %v3569_v46  ;;  %v2608_v42 = vadd.f32 %v11558_v20, %v13487_v59  ;;  %v13490_v4 = vld [vmem:[#allocation34_spill] sm:$0xff] }
 0x229   :  { %v12077_v35 = vcombine.low %v4991_v60, %v4998_v37  ;;  %v12079_v0 = vcombine.low %v4429_v50, %v4437_v63  ;;  %v5018_v7 = vcombine.low %v4436_v11, %v4438_v32  ;;  %v3585_v27 = vcombine.low %v3576_v28, %v3583_v22 }
 0x22a   :  { %v3592_v58 = vrot.slane %v3584_v18, %v10806_v19  ;;  %v4440_v39 = vcombine.high %v4436_v11, %v4436_v11  ;;  %v4441_v9 = vcombine.high %v2608_v42, %v2608_v42  ;;  %v4448_v30 = vrot.slane %v2608_v42, %v10806_v19 }
 0x22b   :  { %v12083_v49 = vcombine.low %v4439_v56, %v4422_v25  ;;  %v3599_v24 = vrot.slane %v3585_v27, %v10806_v19  ;;  %v4839_v36 = vcombine.low %v11951_v6, %v11972_v44  ;;  %v4846_v26 = vrot.slane %v4838_v29, %v10806_v19 }
 0x22c   :  { %v4455_v2 = vrot.slane %v4441_v9, %v10806_v19  ;;  %v4456_v55 = vcombine.high %v4448_v30, %v4448_v30  ;;  %v4464_v16 = vrot.slane %v4448_v30, %v10806_v19  ;;  %v13489_v62 = vcombine.high %v11854_v31, %v11854_v31 }
 0x22d   :  { %v3600_v25 = vcombine.low %v3592_v58, %v3599_v24  ;;  %v4853_v53 = vrot.slane %v4839_v36, %v10806_v19  ;;  %v3611_v6 = vrot.slane %v11902_v48, %v10806_v19  ;;  %v3618_v3 = vrot.slane %v11927_v38, %v10806_v19  ;;  %v13491_v24 = vld [vmem:[#allocation35_spill] sm:$0xff] }
 0x22e   :  { %v3604_v15 = vcombine.low %v13489_v62, %v13488_v12  ;;  %v4457_v45 = vcombine.high %v4455_v2, %v4455_v2  ;;  %v4471_v44 = vrot.slane %v4455_v2, %v10806_v19  ;;  %v4478_v29 = vrot.slane %v4456_v55, %v10806_v19  ;;  %v13494_v55 = vld [vmem:[#allocation20_spill] sm:$0xff] }
 0x22f   :  { %v4486_v23 = vcombine.high %v4464_v16, %v4464_v16  ;;  %3906 = vxpose.xlu1.b32.start [1/7] (short) (narrow) %v3600_v25, 32  ;;  %v5019_v13 = vcombine.low %v4440_v39, %v4464_v16  ;;  %v4854_v50 = vcombine.low %v4846_v26, %v4853_v53  ;;  %v3625_v31 = vrot.slane %v11930_v14, %v10806_v19  ;;  %v13492_v26 = vld [vmem:[#allocation21_spill] sm:$0xff]  ;;  %v13497_v25 = vld [vmem:[#allocation24_spill] sm:$0xff] }
 0x230   :  { %v3632_v63 = vrot.slane %v3604_v15, %v10806_v19  ;;  %v4984_v48 = vrot.slane %v12071_v21, %v10806_v19  ;;  %v4485_v34 = vrot.slane %v4457_v45, %v10806_v19  ;;  %v4487_v38 = vcombine.high %v4471_v44, %v4471_v44 }
 0x231   :  { %v5040_v8 = vrot.slane %v5018_v7, %v10806_v19  ;;  %v5047_v46 = vrot.slane %v5019_v13, %v10806_v19  ;;  %5196 = vxpose.xlu0.b32.cont [6/7] (short) (narrow) %v4854_v50, 64  ;;  %v3633_v11 = vcombine.low %v3611_v6, %v3618_v3  ;;  %v2611_v28 = vadd.f32 %v11558_v20, %v13490_v4  ;;  %v13498_v50 = vld [vmem:[#allocation25_spill] sm:$0xff]  ;;  %v13499_v4 = vld [vmem:[#allocation22_spill] sm:$0xff] }
 0x232   :  { %v3634_v32 = vcombine.low %v3625_v31, %v3632_v63  ;;  %v5026_v14 = vrot.slane %v12079_v0, %v10806_v19  ;;  %v5033_v56 = vrot.slane %v12083_v49, %v10806_v19  ;;  %v4488_v60 = vcombine.high %v4478_v29, %v4478_v29 }
 0x233   :  { %v12119_v37 = vcombine.low %v4478_v29, %v4486_v23  ;;  %v12121_v22 = vcombine.low %v5040_v8, %v5047_v46  ;;  %v3641_v18 = vrot.slane %v3633_v11, %v10806_v19  ;;  %v4490_v42 = vcombine.high %v2611_v28, %v2611_v28 }
 0x234   :  { %v3648_v59 = vrot.slane %v3634_v32, %v10806_v19  ;;  %v5067_v7 = vcombine.low %v4485_v34, %v4487_v38  ;;  %v4489_v27 = vcombine.high %v4485_v34, %v4485_v34  ;;  %v4497_v58 = vrot.slane %v2611_v28, %v10806_v19 }
 0x235   :  { %v4868_v39 = vrot.slane %v4861_v54, %v10806_v19  ;;  %v4504_v30 = vrot.slane %v4490_v42, %v10806_v19  ;;  %v2616_v36 = vadd.f32 %v11558_v20, %v13491_v24  ;;  %v13493_v2 = vrot.slane %v13492_v26, %v10806_v19  ;;  %v13501_v42 = vld [vmem:[#allocation19_spill] sm:$0xff] }
 0x236   :  { %v3649_v9 = vcombine.low %v3641_v18, %v3648_v59  ;;  %v13495_v16 = vrot.slane %v13494_v55, %v10806_v19  ;;  %v4505_v62 = vcombine.high %v4497_v58, %v4497_v58  ;;  %v4513_v15 = vrot.slane %v4497_v58, %v10806_v19 }
 0x237   :  { %5197 = vxpose.xlu0.b32.end [7/7] (short) (narrow) %v4868_v39, 64  ;;  %v3758_v54 = vrot.slane %v13496_v61, %v10806_v19  ;;  %v3765_v53 = vrot.slane %v13497_v25, %v10806_v19  ;;  %v4506_v6 = vcombine.high %v4504_v30, %v4504_v30  ;;  %v4520_v20 = vrot.slane %v4504_v30, %v10806_v19 }
 0x238   :  { %v3732_v12 = vcombine.low %v13495_v16, %v13493_v2  ;;  %3907 = vxpose.xlu1.b32.cont [2/7] (short) (narrow) %v3649_v9, 32  ;;  %v12146_v3 = vrot.slane %v2616_v36, %v10806_v19  ;;  %v4527_v29 = vrot.slane %v4505_v62, %v10806_v19  ;;  %v4535_v23 = vcombine.high %v4513_v15, %v4513_v15  ;;  %v13502_v9 = vld [vmem:[#allocation23_spill] sm:$0xff]  ;;  %v13504_v62 = vld [vmem:[#allocation17_spill] sm:$0xff] }
 0x239   :  { %v5068_v13 = vcombine.low %v4489_v27, %v4513_v15  ;;  %v3772_v31 = vrot.slane %v13498_v50, %v10806_v19  ;;  %v5066_v63 = vcombine.low %v4488_v60, %v4471_v44  ;;  %v4534_v34 = vrot.slane %v4506_v6, %v10806_v19  ;;  %v13505_v15 = vld [vmem:[#allocation27_spill] sm:$0xff] }
 0x23a   :  { %v3746_v45 = vrot.slane %v3732_v12, %v10806_v19  ;;  %v4536_v38 = vcombine.high %v4520_v20, %v4520_v20  ;;  %v5089_v8 = vrot.slane %v5067_v7, %v10806_v19  ;;  %v4537_v46 = vcombine.high %v4527_v29, %v4527_v29 }
 0x23b   :  { %v5096_v11 = vrot.slane %v5068_v13, %v10806_v19  ;;  %v5114_v32 = vcombine.low %v4527_v29, %v4535_v23  ;;  %v13500_v28 = vrot.slane %v13499_v4, %v10806_v19  ;;  %v4538_v27 = vcombine.high %v4534_v34, %v4534_v34 }
 0x23c   :  { %v5116_v59 = vcombine.low %v4534_v34, %v4536_v38  ;;  %3908 = vxpose.xlu1.b32.cont [3/7] (short) (narrow) %v13501_v42, 32  ;;  %v4553_v44 = vrot.slane %v12146_v3, %v10806_v19  ;;  %v3780_v60 = vcombine.low %v3758_v54, %v3765_v53  ;;  %v5075_v58 = vrot.slane %v12119_v37, %v10806_v19  ;;  %v13506_v53 = vld [vmem:[#allocation28_spill] sm:$0xff]  ;;  %v13509_v38 = vld [vmem:[#allocation30_spill] sm:$0xff] }
 0x23d   :  { %v3747_v18 = vcombine.low %v13500_v28, %v3746_v45  ;;  %v5098_v7 = vcombine.low %v5089_v8, %v5096_v11  ;;  %v5115_v39 = vcombine.low %v4537_v46, %v4520_v20  ;;  %v13503_v30 = vrot.slane %v13502_v9, %v10806_v19 }
 0x23e   :  { %v5082_v36 = vrot.slane %v5066_v63, %v10806_v19  ;;  %v5124_v26 = vrot.slane %v5114_v32, %v10806_v19  ;;  %v5117_v2 = vcombine.low %v4538_v27, %v4553_v44  ;;  %v3788_v55 = vrot.slane %v3780_v60, %v10806_v19 }
 0x23f   :  { %v3781_v24 = vcombine.low %v3772_v31, %v13503_v30  ;;  %v5138_v16 = vrot.slane %v5116_v59, %v10806_v19  ;;  %v3807_v37 = vrot.slane %v13504_v62, %v10806_v19  ;;  %v3814_v61 = vrot.slane %v13505_v15, %v10806_v19  ;;  %v13507_v31 = vld [vmem:[#allocation29_spill] sm:$0xff] }
 0x240   :  { %v5131_v54 = vrot.slane %v5115_v39, %v10806_v19  ;;  %v5145_v25 = vrot.slane %v5117_v2, %v10806_v19  ;;  %3909 = vxpose.xlu1.b32.cont [4/7] (short) (narrow) %v3747_v18, 32  ;;  %v3821_v6 = vrot.slane %v13506_v53, %v10806_v19  ;;  %v4879_v20 = vrot.slane %v11963_v57, %v10806_v19 }
 0x241   :  { %v3795_v12 = vrot.slane %v3781_v24, %v10806_v19  ;;  %v3829_v29 = vcombine.low %v3807_v37, %v3814_v61  ;;  %v4886_v23 = vrot.slane %v11974_v17, %v10806_v19  ;;  %v4893_v13 = vrot.slane %v12018_v43, %v10806_v19 }
 0x242   :  { %v5147_v50 = vcombine.low %v5138_v16, %v5145_v25  ;;  %v13508_v63 = vrot.slane %v13507_v31, %v10806_v19  ;;  %v3852_v8 = vrot.slane %v13509_v38, %v10806_v19  ;;  %v4950_v57 = vcombine.low %v4928_v5, %v4935_v41 }
 0x243   :  { %v3796_v45 = vcombine.low %v3788_v55, %v3795_v12  ;;  %v3837_v17 = vrot.slane %v3829_v29, %v10806_v19  ;;  %v4901_v46 = vcombine.low %v4879_v20, %v4886_v23  ;;  %v4902_v43 = vcombine.low %v4893_v13, %v4900_v33 }
 0x244   :  { %v3830_v34 = vcombine.low %v3821_v6, %v13508_v63  ;;  %v4965_v11 = vrot.slane %v12044_v1, %v10806_v19  ;;  %v4958_v4 = vrot.slane %v4950_v57, %v10806_v19  ;;  %v4999_v10 = vcombine.low %v4977_v40, %v4984_v48 }
 0x245   :  { %3910 = vxpose.xlu1.b32.cont [5/7] (short) (narrow) %v3796_v45, 32  ;;  %v5014_v47 = vrot.slane %v12077_v35, %v10806_v19  ;;  %v4909_v51 = vrot.slane %v4901_v46, %v10806_v19  ;;  %v4916_v33 = vrot.slane %v4902_v43, %v10806_v19  ;;  %v5048_v5 = vcombine.low %v5026_v14, %v5033_v56 }
 0x246   :  { %v3844_v32 = vrot.slane %v3830_v34, %v10806_v19  ;;  %v5063_v41 = vrot.slane %v12121_v22, %v10806_v19  ;;  %v4966_v52 = vcombine.low %v4958_v4, %v4965_v11  ;;  %v5007_v21 = vrot.slane %v4999_v10, %v10806_v19 }
 0x247   :  { %v5097_v40 = vcombine.low %v5075_v58, %v5082_v36  ;;  %v4917_v35 = vcombine.low %v4909_v51, %v4916_v33  ;;  %v5056_v48 = vrot.slane %v5048_v5, %v10806_v19  ;;  %v5112_v28 = vrot.slane %v5098_v7, %v10806_v19 }
 0x248   :  { %v3845_v1 = vcombine.low %v3837_v17, %v3844_v32  ;;  %v5146_v18 = vcombine.low %v5124_v26, %v5131_v54  ;;  %v3859_v49 = vrot.slane %v3852_v8, %v10806_v19  ;;  %v5015_v59 = vcombine.low %v5007_v21, %v5014_v47 }
 0x249   :  { %v5105_v0 = vrot.slane %v5097_v40, %v10806_v19  ;;  %v5161_v14 = vrot.slane %v5147_v50, %v10806_v19  ;;  %v5064_v56 = vcombine.low %v5056_v48, %v5063_v41  ;;  %v4546_v6 = vcombine.high %v12146_v3, %v12146_v3 }
 0x24a   :  { %3911 = vxpose.xlu1.b32.cont [6/7] (short) (narrow) %v3845_v1, 32  ;;  %v5154_v22 = vrot.slane %v5146_v18, %v10806_v19 }
 0x24b   :  { %v5113_v42 = vcombine.low %v5105_v0, %v5112_v28  ;;  %v4560_v45 = vrot.slane %v4546_v6, %v10806_v19 }
 0x24c   :  { %v5162_v27 = vcombine.low %v5154_v22, %v5161_v14 }
 0x24d   :  { %v5169_v29 = vrot.slane %v4560_v45, %v10806_v19 }
 0x24e   :  { %3912 = vxpose.xlu1.b32.end [7/7] (short) (narrow) %v3859_v49, 32 }
 0x24f   :  { %v5176_v23 = vrot.slane %v5169_v29, %v10806_v19 }
 0x286   :  { %v3890_v44 = vpop.trf.xlu1 }
 0x28a   :  { %v3891_v60 = vpop.trf.xlu1 }
 0x28b   :  { %v10176_v58 = vpack.i.bf16 %v3891_v60, %v3890_v44 }
 0x28d   :  { %10177 = vxpose.xlu0.b32.start.end [1/1] (short) (narrow) %v10176_v58, 56 }
 0x28e   :  { %v3892_v7 = vpop.trf.xlu1 }
 0x292   :  { %v3893_v36 = vpop.trf.xlu1 }
 0x293   :  { %v10213_v55 = vpack.i.bf16 %v3893_v36, %v3892_v7 }
 0x29b   :  { %v5207_v39 = vpop.trf.xlu0 }
 0x29c   :  { %v5543_v9 = vpack.c.bf16 %v5207_v39, %v5207_v39 }
 0x29e   :  { %10153 = vmatprep.subr.msk.bf16.mxu0 %vm5564_vm2, %v5543_v9  ;;  %v5566_v30 = vsel %vm5564_vm2, %v5543_v9, 0 }
 0x29f   :  { %9942 = vmatpush3.bf16.msra.mxu0 %v5566_v30  ;;  %v5208_v24 = vpop.trf.xlu0 }
 0x2a0   :  { %v5544_v26 = vpack.c.bf16 %v5208_v24, %v5208_v24 }
 0x2a2   :  { %10154 = vmatprep.subr.msk.bf16.mxu1 %vm5564_vm2, %v5544_v26  ;;  %v5645_v2 = vsel %vm5564_vm2, %v5544_v26, 0 }
 0x2a3   :  { %9952 = vmatpush3.bf16.msra.mxu1 %v5645_v2  ;;  %v5209_v16 = vpop.trf.xlu0 }
 0x2a4   :  { %v5545_v12 = vpack.c.bf16 %v5209_v16, %v5209_v16 }
 0x2a6   :  { %10155 = vmatprep.subr.msk.bf16.mxu0 %vm5564_vm2, %v5545_v12  ;;  %10214 = vxpose.xlu0.b32.start.end [1/1] (short) (narrow) %v10213_v55, 56  ;;  %v5724_v1 = vsel %vm5564_vm2, %v5545_v12, 0 }
 0x2a7   :  { %v5210_v62 = vpop.trf.xlu0 }
 0x2a8   :  { %v5546_v37 = vpack.c.bf16 %v5210_v62, %v5210_v62 }
 0x2aa   :  { %10156 = vmatprep.subr.msk.bf16.mxu1 %vm5564_vm2, %v5546_v37 }
 0x2ab   :  { %v12240_v13 = vpop.trf.xlu0 }
 0x2ac   :  { %13510 = vst [vmem:[#allocation31_spill] sm:$0xff] %v12240_v13 }
 0x2af   :  { %v12242_v50 = vpop.trf.xlu0 }
 0x2b0   :  { %13511 = vst [vmem:[#allocation32_spill] sm:$0xff] %v12242_v50 }
 0x2b2   :  { %v3922_v15 = vpop.trf.xlu1 }
 0x2b3   :  { %v12244_v31 = vpop.trf.xlu0 }
 0x2b4   :  { %13512 = vst [vmem:[#allocation33_spill] sm:$0xff] %v12244_v31 }
 0x2b6   :  { %v3923_v61 = vpop.trf.xlu1 }
 0x2b7   :  { %v10250_v54 = vpack.i.bf16 %v3923_v61, %v3922_v15  ;;  %v12246_v63 = vpop.trf.xlu0 }
 0x2b8   :  { %13513 = vst [vmem:[#allocation18_spill] sm:$0xff] %v12246_v63 }
 0x2b9   :  { %10251 = vxpose.xlu1.b32.start.end [1/1] (short) (narrow) %v10250_v54, 56 }
 0x2ba   :  { %v3924_v25 = vpop.trf.xlu1 }
 0x2be   :  { %v3925_v53 = vpop.trf.xlu1 }
 0x2bf   :  { %5223 = vxpose.xlu0.b32.start [1/7] (short) (narrow) %v4917_v35, 64  ;;  %v10287_v20 = vpack.i.bf16 %v3925_v53, %v3924_v25 }
 0x2c3   :  { %5224 = vxpose.xlu0.b32.cont [2/7] (short) (narrow) %v4966_v52, 64  ;;  %v5803_v52 = vsel %vm5564_vm2, %v5546_v37, 0 }
 0x2c7   :  { %5225 = vxpose.xlu0.b32.cont [3/7] (short) (narrow) %v5015_v59, 64 }
 0x2cb   :  { %5226 = vxpose.xlu0.b32.cont [4/7] (short) (narrow) %v5064_v56, 64 }
 0x2cf   :  { %5227 = vxpose.xlu0.b32.cont [5/7] (short) (narrow) %v5113_v42, 64 }
 0x2d2   :  { %10288 = vxpose.xlu1.b32.start.end [1/1] (short) (narrow) %v10287_v20, 56 }
 0x2d3   :  { %5228 = vxpose.xlu0.b32.cont [6/7] (short) (narrow) %v5162_v27, 64 }
 0x2d7   :  { %5229 = vxpose.xlu0.b32.end [7/7] (short) (narrow) %v5176_v23, 64 }
 0x309   :  { %v10178_v3 = vpop.trf.xlu0 }
 0x30a   :  { %v10182_v34 = vunpack.i.h.bf16 %v10178_v3  ;;  %v10179_v38 = vunpack.i.l.bf16 %v10178_v3 }
 0x30d   :  { %v10183_v8 = vpop.trf.xlu0 }
 0x30e   :  { %v10187_v57 = vunpack.i.h.bf16 %v10183_v8  ;;  %v10184_v17 = vunpack.i.l.bf16 %v10183_v8 }
 0x310   :  { %v5511_v46 = vpack.c.bf16 %v10184_v17, %v10179_v38  ;;  %v5515_v43 = vpack.c.bf16 %v10187_v57, %v10182_v34 }
 0x311   :  { %v10188_v11 = vpop.trf.xlu0 }
 0x312   :  { %9943 = vmatprep.mubr.msk.bf16.mxu0 %vm5551_vm3, %v5511_v46  ;;  %9953 = vmatprep.mubr.msk.bf16.mxu1 %vm5551_vm3, %v5515_v43  ;;  %v10192_v32 = vunpack.i.h.bf16 %v10188_v11  ;;  %v10189_v4 = vunpack.i.l.bf16 %v10188_v11 }
 0x315   :  { %v10193_v10 = vpop.trf.xlu0 }
 0x316   :  { %v10197_v47 = vunpack.i.h.bf16 %v10193_v10  ;;  %v10194_v51 = vunpack.i.l.bf16 %v10193_v10 }
 0x318   :  { %v5512_v33 = vpack.c.bf16 %v10194_v51, %v10189_v4  ;;  %v5516_v5 = vpack.c.bf16 %v10197_v47, %v10192_v32 }
 0x319   :  { %v10198_v41 = vpop.trf.xlu0 }
 0x31a   :  { %9944 = vmatmul.mubr.msk.bf16.vlgmr.msra.gmra.mxu0 %vm5551_vm3, %v5512_v33  ;;  %9954 = vmatmul.mubr.msk.bf16.vlgmr.msra.gmra.mxu1 %vm5551_vm3, %v5516_v5  ;;  %v10202_v21 = vunpack.i.h.bf16 %v10198_v41  ;;  %v10199_v40 = vunpack.i.l.bf16 %v10198_v41 }
 0x31b   :  { %9962 = vmatpush3.bf16.msra.mxu0 %v5724_v1  ;;  %9972 = vmatpush3.bf16.msra.mxu1 %v5803_v52 }
 0x31d   :  { %v10203_v35 = vpop.trf.xlu0 }
 0x31e   :  { %v10207_v48 = vunpack.i.h.bf16 %v10203_v35  ;;  %v10204_v28 = vunpack.i.l.bf16 %v10203_v35 }
 0x320   :  { %v5513_v18 = vpack.c.bf16 %v10204_v28, %v10199_v40  ;;  %v5517_v49 = vpack.c.bf16 %v10207_v48, %v10202_v21 }
 0x321   :  { %v10208_v59 = vpop.trf.xlu0 }
 0x322   :  { %9947 = vmatprep.mubr.msk.bf16.mxu0 %vm5551_vm3, %v5513_v18  ;;  %9957 = vmatprep.mubr.msk.bf16.mxu1 %vm5551_vm3, %v5517_v49  ;;  %v10209_v0 = vunpack.i.l.bf16 %v10208_v59  ;;  %v10212_v14 = vunpack.i.h.bf16 %v10208_v59 }
 0x324   :  { %v5514_v56 = vpack.c.bf16 %v10209_v0, %v10209_v0  ;;  %v5518_v22 = vpack.c.bf16 %v10212_v14, %v10212_v14 }
 0x325   :  { %v10215_v42 = vpop.trf.xlu0 }
 0x326   :  { %9948 = vmatmul.mubr.msk.bf16.gmra.mxu0 %vm5551_vm3, %v5514_v56  ;;  %9958 = vmatmul.mubr.msk.bf16.gmra.mxu1 %vm5551_vm3, %v5518_v22  ;;  %v10219_v27 = vunpack.i.h.bf16 %v10215_v42  ;;  %v10216_v44 = vunpack.i.l.bf16 %v10215_v42 }
 0x329   :  { %v10220_v60 = vpop.trf.xlu0 }
 0x32a   :  { %v10224_v58 = vunpack.i.h.bf16 %v10220_v60  ;;  %v10221_v7 = vunpack.i.l.bf16 %v10220_v60 }
 0x32c   :  { %v5519_v39 = vpack.c.bf16 %v10221_v7, %v10216_v44  ;;  %v5523_v9 = vpack.c.bf16 %v10224_v58, %v10219_v27 }
 0x32d   :  { %v10225_v30 = vpop.trf.xlu0 }
 0x32e   :  { %9963 = vmatprep.mubr.msk.bf16.mxu0 %vm5551_vm3, %v5519_v39  ;;  %9973 = vmatprep.mubr.msk.bf16.mxu1 %vm5551_vm3, %v5523_v9  ;;  %v10229_v24 = vunpack.i.h.bf16 %v10225_v30  ;;  %v10226_v36 = vunpack.i.l.bf16 %v10225_v30 }
 0x331   :  { %v10230_v26 = vpop.trf.xlu0 }
 0x332   :  { %v10234_v2 = vunpack.i.h.bf16 %v10230_v26  ;;  %v10231_v55 = vunpack.i.l.bf16 %v10230_v26 }
 0x334   :  { %v5520_v12 = vpack.c.bf16 %v10231_v55, %v10226_v36  ;;  %v5524_v62 = vpack.c.bf16 %v10234_v2, %v10229_v24  ;;  %v13514_v36 = vmov 0.0  }
 0x335   :  { %v10252_v16 = vpop.trf.xlu1  ;;  %v10235_v37 = vpop.trf.xlu0 }
 0x336   :  { %9964 = vmatmul.mubr.msk.bf16.vlgmr.msra.gmra.mxu0 %vm5551_vm3, %v5520_v12  ;;  %9974 = vmatmul.mubr.msk.bf16.vlgmr.msra.gmra.mxu1 %vm5551_vm3, %v5524_v62  ;;  %v10239_v61 = vunpack.i.h.bf16 %v10235_v37  ;;  %v10236_v54 = vunpack.i.l.bf16 %v10235_v37  ;;  %v10256_v25 = vunpack.i.h.bf16 %v10252_v16  ;;  %v10253_v53 = vunpack.i.l.bf16 %v10252_v16 }
 0x339   :  { %v10257_v15 = vpop.trf.xlu1  ;;  %v10240_v6 = vpop.trf.xlu0 }
 0x33a   :  { %v10244_v20 = vunpack.i.h.bf16 %v10240_v6  ;;  %v10241_v45 = vunpack.i.l.bf16 %v10240_v6  ;;  %v10261_v23 = vunpack.i.h.bf16 %v10257_v15  ;;  %v10258_v3 = vunpack.i.l.bf16 %v10257_v15 }
 0x33c   :  { %v5521_v34 = vpack.c.bf16 %v10241_v45, %v10236_v54  ;;  %v5525_v38 = vpack.c.bf16 %v10244_v20, %v10239_v61  ;;  %v5527_v43 = vpack.c.bf16 %v10258_v3, %v10253_v53  ;;  %v5531_v11 = vpack.c.bf16 %v10261_v23, %v10256_v25 }
 0x33d   :  { %v10262_v29 = vpop.trf.xlu1  ;;  %v10245_v8 = vpop.trf.xlu0 }
 0x33e   :  { %9967 = vmatprep.mubr.msk.bf16.mxu0 %vm5551_vm3, %v5521_v34  ;;  %v10246_v17 = vunpack.i.l.bf16 %v10245_v8  ;;  %9977 = vmatprep.mubr.msk.bf16.mxu1 %vm5551_vm3, %v5525_v38  ;;  %v10249_v46 = vunpack.i.h.bf16 %v10245_v8  ;;  %v10263_v47 = vunpack.i.l.bf16 %v10262_v29  ;;  %v10266_v41 = vunpack.i.h.bf16 %v10262_v29 }
 0x340   :  { %v5522_v32 = vpack.c.bf16 %v10246_v17, %v10246_v17  ;;  %v5526_v4 = vpack.c.bf16 %v10249_v46, %v10249_v46 }
 0x341   :  { %v10267_v57 = vpop.trf.xlu1  ;;  %v5239_v10 = vpop.trf.xlu0 }
 0x342   :  { %v10268_v51 = vunpack.i.l.bf16 %v10267_v57  ;;  %9968 = vmatmul.mubr.msk.bf16.gmra.mxu0 %vm5551_vm3, %v5522_v32  ;;  %v5547_v5 = vpack.c.bf16 %v5239_v10, %v5239_v10  ;;  %9978 = vmatmul.mubr.msk.bf16.gmra.mxu1 %vm5551_vm3, %v5526_v4  ;;  %v10271_v1 = vunpack.i.h.bf16 %v10267_v57 }
 0x343   :  { %9983 = vmatprep.mubr.msk.bf16.mxu0 %vm5551_vm3, %v5527_v43  ;;  %9993 = vmatprep.mubr.msk.bf16.mxu1 %vm5551_vm3, %v5531_v11 }
 0x344   :  { %10157 = vmatprep.subr.msk.bf16.mxu0 %vm5564_vm2, %v5547_v5  ;;  %v5882_v52 = vsel %vm5564_vm2, %v5547_v5, 0  ;;  %v5528_v48 = vpack.c.bf16 %v10268_v51, %v10263_v47  ;;  %v5532_v0 = vpack.c.bf16 %v10271_v1, %v10266_v41 }
 0x345   :  { %v10272_v33 = vpop.trf.xlu1  ;;  %9982 = vmatpush3.bf16.msra.mxu0 %v5882_v52  ;;  %v5240_v35 = vpop.trf.xlu0 }
 0x346   :  { %v10276_v21 = vunpack.i.h.bf16 %v10272_v33  ;;  %v10273_v40 = vunpack.i.l.bf16 %v10272_v33  ;;  %v5548_v18 = vpack.c.bf16 %v5240_v35, %v5240_v35 }
 0x348   :  { %10158 = vmatprep.subr.msk.bf16.mxu1 %vm5564_vm2, %v5548_v18  ;;  %v5961_v14 = vsel %vm5564_vm2, %v5548_v18, 0 }
 0x349   :  { %v10277_v28 = vpop.trf.xlu1  ;;  %9992 = vmatpush3.bf16.msra.mxu1 %v5961_v14  ;;  %v5241_v22 = vpop.trf.xlu0 }
 0x34a   :  { %v10281_v49 = vunpack.i.h.bf16 %v10277_v28  ;;  %v10278_v59 = vunpack.i.l.bf16 %v10277_v28  ;;  %9984 = vmatmul.mubr.msk.bf16.vlgmr.msra.gmra.mxu0 %vm5551_vm3, %v5528_v48  ;;  %v5549_v44 = vpack.c.bf16 %v5241_v22, %v5241_v22 }
 0x34c   :  { %v5529_v56 = vpack.c.bf16 %v10278_v59, %v10273_v40  ;;  %v5533_v42 = vpack.c.bf16 %v10281_v49, %v10276_v21  ;;  %9994 = vmatmul.mubr.msk.bf16.vlgmr.msra.gmra.mxu1 %vm5551_vm3, %v5532_v0  ;;  %10159 = vmatprep.subr.msk.bf16.mxu0 %vm5564_vm2, %v5549_v44  ;;  %v6040_v58 = vsel %vm5564_vm2, %v5549_v44, 0 }
 0x34d   :  { %v10282_v27 = vpop.trf.xlu1  ;;  %10002 = vmatpush3.bf16.msra.mxu0 %v6040_v58  ;;  %v5242_v39 = vpop.trf.xlu0 }
 0x34e   :  { %9987 = vmatprep.mubr.msk.bf16.mxu0 %vm5551_vm3, %v5529_v56  ;;  %v10283_v60 = vunpack.i.l.bf16 %v10282_v27  ;;  %v10286_v7 = vunpack.i.h.bf16 %v10282_v27  ;;  %9997 = vmatprep.mubr.msk.bf16.mxu1 %vm5551_vm3, %v5533_v42  ;;  %v5550_v24 = vpack.c.bf16 %v5242_v39, %v5242_v39 }
 0x34f   :  { %10021 = vmatprep.subr.bf16.mxu0 %v13514_v36 }
 0x350   :  { %v5530_v30 = vpack.c.bf16 %v10283_v60, %v10283_v60  ;;  %v5534_v26 = vpack.c.bf16 %v10286_v7, %v10286_v7  ;;  %10160 = vmatprep.subr.msk.bf16.mxu1 %vm5564_vm2, %v5550_v24  ;;  %v6119_v2 = vsel %vm5564_vm2, %v5550_v24, 0 }
 0x351   :  { %v10289_v9 = vpop.trf.xlu1  ;;  %10012 = vmatpush3.bf16.msra.mxu1 %v6119_v2 }
 0x352   :  { %v10293_v55 = vunpack.i.h.bf16 %v10289_v9  ;;  %v10290_v16 = vunpack.i.l.bf16 %v10289_v9  ;;  %9988 = vmatmul.mubr.msk.bf16.gmra.mxu0 %vm5551_vm3, %v5530_v30  ;;  %10033 = vmatprep.subr.bf16.mxu1 %v13514_v36 }
 0x354   :  { %9998 = vmatmul.mubr.msk.bf16.gmra.mxu1 %vm5551_vm3, %v5534_v26 }
 0x355   :  { %v10294_v12 = vpop.trf.xlu1 }
 0x356   :  { %v10298_v62 = vunpack.i.h.bf16 %v10294_v12  ;;  %v10295_v37 = vunpack.i.l.bf16 %v10294_v12 }
 0x358   :  { %v5535_v15 = vpack.c.bf16 %v10295_v37, %v10290_v16  ;;  %v5539_v61 = vpack.c.bf16 %v10298_v62, %v10293_v55 }
 0x359   :  { %v10299_v54 = vpop.trf.xlu1 }
 0x35a   :  { %10003 = vmatprep.mubr.msk.bf16.mxu0 %vm5551_vm3, %v5535_v15  ;;  %10013 = vmatprep.mubr.msk.bf16.mxu1 %vm5551_vm3, %v5539_v61  ;;  %v10303_v25 = vunpack.i.h.bf16 %v10299_v54  ;;  %v10300_v53 = vunpack.i.l.bf16 %v10299_v54 }
 0x35d   :  { %v10304_v6 = vpop.trf.xlu1 }
 0x35e   :  { %v10308_v20 = vunpack.i.h.bf16 %v10304_v6  ;;  %v10305_v45 = vunpack.i.l.bf16 %v10304_v6 }
 0x360   :  { %v5536_v29 = vpack.c.bf16 %v10305_v45, %v10300_v53  ;;  %v5540_v23 = vpack.c.bf16 %v10308_v20, %v10303_v25 }
 0x361   :  { %v10309_v3 = vpop.trf.xlu1 }
 0x362   :  { %10004 = vmatmul.mubr.msk.bf16.vlgmr.msra.gmra.mxu0 %vm5551_vm3, %v5536_v29  ;;  %10014 = vmatmul.mubr.msk.bf16.vlgmr.msra.gmra.mxu1 %vm5551_vm3, %v5540_v23  ;;  %v10313_v34 = vunpack.i.h.bf16 %v10309_v3  ;;  %v10310_v38 = vunpack.i.l.bf16 %v10309_v3 }
 0x365   :  { %v10314_v8 = vpop.trf.xlu1 }
 0x366   :  { %v10318_v57 = vunpack.i.h.bf16 %v10314_v8  ;;  %v10315_v17 = vunpack.i.l.bf16 %v10314_v8 }
 0x368   :  { %v5537_v46 = vpack.c.bf16 %v10315_v17, %v10310_v38  ;;  %v5541_v43 = vpack.c.bf16 %v10318_v57, %v10313_v34 }
 0x369   :  { %v10319_v11 = vpop.trf.xlu1 }
 0x36a   :  { %10007 = vmatprep.mubr.msk.bf16.mxu0 %vm5551_vm3, %v5537_v46  ;;  %v10320_v32 = vunpack.i.l.bf16 %v10319_v11  ;;  %10017 = vmatprep.mubr.msk.bf16.mxu1 %vm5551_vm3, %v5541_v43  ;;  %v10323_v4 = vunpack.i.h.bf16 %v10319_v11 }
 0x36c   :  { %v5538_v10 = vpack.c.bf16 %v10320_v32, %v10320_v32  ;;  %v5542_v47 = vpack.c.bf16 %v10323_v4, %v10323_v4 }
 0x36e   :  { %10008 = vmatmul.mubr.msk.bf16.gmra.mxu0 %vm5551_vm3, %v5538_v10  ;;  %10018 = vmatmul.mubr.msk.bf16.gmra.mxu1 %vm5551_vm3, %v5542_v47 }
 0x36f   :  { %10029 = vmatprep.mubr.msk.bf16.mxu0 %vm10699_vm0, %v13514_v36  ;;  %10041 = vmatprep.mubr.msk.bf16.mxu1 %vm10699_vm0, %v13514_v36 }
 0x3da   :  { %v12296_v51 = vpop.f32.mrf.mxu0  ;;  %v12298_v33 = vpop.f32.mrf.mxu1 }
 0x3db   :  { %v6192_v5 = vsel %vm6185_vm4, %v12296_v51, -inf  ;;  %v6214_v28 = vsel %vm6185_vm4, %v12298_v33, -inf }
 0x3dc   :  { %v12302_v41 = vpop.f32.mrf.mxu1  ;;  %6193 = vmax.xlane.f32.xlu0 %v6192_v5  ;;  %v12304_v1 = vpop.f32.mrf.mxu0 }
 0x3dd   :  { %v6186_v21 = vsel %vm6185_vm4, %v12304_v1, -inf  ;;  %v6208_v58 = vsel %vm6185_vm4, %v12302_v41, -inf }
 0x3de   :  { %v12306_v52 = vpop.f32.mrf.mxu0  ;;  %v12312_v35 = vpop.f32.mrf.mxu1 }
 0x3df   :  { %v6195_v40 = vsel %vm6185_vm4, %v12306_v52, -inf  ;;  %v6217_v56 = vsel %vm6185_vm4, %v12312_v35, -inf }
 0x3e0   :  { %6187 = vmax.xlane.f32.xlu0 %v6186_v21  ;;  %6196 = vmax.xlane.f32.xlu1 %v6195_v40  ;;  %v12314_v48 = vpop.f32.mrf.mxu0  ;;  %v12320_v49 = vpop.f32.mrf.mxu1 }
 0x3e1   :  { %v6189_v18 = vsel %vm6185_vm4, %v12314_v48, -inf  ;;  %v6211_v9 = vsel %vm6185_vm4, %v12320_v49, -inf }
 0x3e4   :  { %6215 = vmax.xlane.f32.xlu0 %v6214_v28  ;;  %6190 = vmax.xlane.f32.xlu1 %v6189_v18 }
 0x3e6   :  { %v12322_v59 = vpop.f32.mrf.mxu0  ;;  %v12324_v0 = vpop.f32.mrf.mxu1 }
 0x3e7   :  { %v6226_v14 = vsel %vm6204_vm5, %v12324_v0, -inf  ;;  %v6205_v27 = vsel %vm6204_vm5, %v12322_v59, -inf }
 0x3e8   :  { %v12330_v22 = vpop.f32.mrf.mxu1  ;;  %6227 = vmax.xlane.f32.xlu0 %v6226_v14  ;;  %6218 = vmax.xlane.f32.xlu1 %v6217_v56  ;;  %v12332_v42 = vpop.f32.mrf.mxu0 }
 0x3e9   :  { %v6220_v7 = vsel %vm6185_vm4, %v12330_v22, -inf  ;;  %v6198_v39 = vsel %vm6185_vm4, %v12332_v42, -inf }
 0x3ea   :  { %v9950_v44 = vpop.f32.mrf.mxu0  ;;  %v9960_v60 = vpop.f32.mrf.mxu1 }
 0x3ec   :  { %6209 = vmax.xlane.f32.xlu0 %v6208_v58  ;;  %6206 = vmax.xlane.f32.xlu1 %v6205_v27  ;;  %v12344_v30 = vpop.f32.mrf.mxu0  ;;  %v12346_v24 = vpop.f32.mrf.mxu1 }
 0x3ed   :  { %v6201_v2 = vsel %vm6185_vm4, %v12344_v30, -inf  ;;  %v6223_v61 = vsel %vm6185_vm4, %v12346_v24, -inf }
 0x3f0   :  { %6221 = vmax.xlane.f32.xlu0 %v6220_v7  ;;  %6199 = vmax.xlane.f32.xlu1 %v6198_v39 }
 0x3f4   :  { %6212 = vmax.xlane.f32.xlu1 %v6211_v9 }
 0x3f6   :  { %v12348_v26 = vpop.f32.mrf.mxu0  ;;  %v12356_v12 = vpop.f32.mrf.mxu1 }
 0x3f7   :  { %v6235_v55 = vsel %vm6185_vm4, %v12348_v26, -inf  ;;  %v6256_v25 = vsel %vm6185_vm4, %v12356_v12, -inf }
 0x3f8   :  { %6202 = vmax.xlane.f32.xlu1 %v6201_v2  ;;  %6236 = vmax.xlane.f32.xlu0 %v6235_v55  ;;  %v12354_v16 = vpop.f32.mrf.mxu0  ;;  %v12362_v15 = vpop.f32.mrf.mxu1 }
 0x3f9   :  { %v6229_v62 = vsel %vm6185_vm4, %v12354_v16, -inf  ;;  %v6250_v45 = vsel %vm6185_vm4, %v12362_v15, -inf }
 0x3fa   :  { %v12360_v37 = vpop.f32.mrf.mxu0  ;;  %v12366_v54 = vpop.f32.mrf.mxu1 }
 0x3fb   :  { %v6238_v53 = vsel %vm6185_vm4, %v12360_v37, -inf  ;;  %v6259_v8 = vsel %vm6185_vm4, %v12366_v54, -inf }
 0x3fc   :  { %6224 = vmax.xlane.f32.xlu1 %v6223_v61  ;;  %6230 = vmax.xlane.f32.xlu0 %v6229_v62  ;;  %v12372_v6 = vpop.f32.mrf.mxu0  ;;  %v12374_v20 = vpop.f32.mrf.mxu1 }
 0x3fd   :  { %v6232_v29 = vsel %vm6185_vm4, %v12372_v6, -inf  ;;  %v6253_v11 = vsel %vm6185_vm4, %v12374_v20, -inf }
 0x400   :  { %6257 = vmax.xlane.f32.xlu0 %v6256_v25  ;;  %6239 = vmax.xlane.f32.xlu1 %v6238_v53 }
 0x402   :  { %v12380_v23 = vpop.f32.mrf.mxu0  ;;  %v12382_v3 = vpop.f32.mrf.mxu1 }
 0x403   :  { %v6247_v57 = vsel %vm6204_vm5, %v12380_v23, -inf  ;;  %v6268_v21 = vsel %vm6204_vm5, %v12382_v3, -inf }
 0x404   :  { %6251 = vmax.xlane.f32.xlu0 %v6250_v45  ;;  %6233 = vmax.xlane.f32.xlu1 %v6232_v29  ;;  %v12384_v34 = vpop.f32.mrf.mxu0  ;;  %v12386_v38 = vpop.f32.mrf.mxu1 }
 0x405   :  { %v6241_v32 = vsel %vm6185_vm4, %v12384_v34, -inf  ;;  %v6262_v40 = vsel %vm6185_vm4, %v12386_v38, -inf }
 0x406   :  { %v9970_v17 = vpop.f32.mrf.mxu0  ;;  %v9980_v46 = vpop.f32.mrf.mxu1 }
 0x408   :  { %6260 = vmax.xlane.f32.xlu1 %v6259_v8  ;;  %6248 = vmax.xlane.f32.xlu0 %v6247_v57  ;;  %v12392_v43 = vpop.f32.mrf.mxu0  ;;  %v12400_v10 = vpop.f32.mrf.mxu1 }
 0x409   :  { %v6244_v27 = vsel %vm6185_vm4, %v12392_v43, -inf  ;;  %v6265_v9 = vsel %vm6185_vm4, %v12400_v10, -inf }
 0x40a   :  { %v12398_v4 = vpop.f32.mrf.mxu0 }
 0x40b   :  { %v6277_v44 = vsel %vm6185_vm4, %v12398_v4, -inf }
 0x40c   :  { %6254 = vmax.xlane.f32.xlu1 %v6253_v11  ;;  %6242 = vmax.xlane.f32.xlu0 %v6241_v32  ;;  %v12402_v47 = vpop.f32.mrf.mxu0  ;;  %v12404_v5 = vpop.f32.mrf.mxu1 }
 0x40d   :  { %v6271_v2 = vsel %vm6185_vm4, %v12402_v47, -inf  ;;  %v6298_v25 = vsel %vm6185_vm4, %v12404_v5, -inf }
 0x40e   :  { %v12410_v28 = vpop.f32.mrf.mxu0  ;;  %v12412_v18 = vpop.f32.mrf.mxu1 }
 0x40f   :  { %v6280_v53 = vsel %vm6185_vm4, %v12410_v28, -inf  ;;  %v6292_v8 = vsel %vm6185_vm4, %v12412_v18, -inf }
 0x410   :  { %6269 = vmax.xlane.f32.xlu1 %v6268_v21  ;;  %6263 = vmax.xlane.f32.xlu0 %v6262_v40  ;;  %v12414_v14 = vpop.f32.mrf.mxu0  ;;  %v12416_v56 = vpop.f32.mrf.mxu1 }
 0x411   :  { %v6274_v57 = vsel %vm6185_vm4, %v12414_v14, -inf  ;;  %v6301_v11 = vsel %vm6185_vm4, %v12416_v56, -inf }
 0x412   :  { %v12422_v60 = vpop.f32.mrf.mxu0  ;;  %v12424_v58 = vpop.f32.mrf.mxu1 }
 0x413   :  { %v6289_v32 = vsel %vm6204_vm5, %v12422_v60, -inf }
 0x414   :  { %6245 = vmax.xlane.f32.xlu1 %v6244_v27  ;;  %6278 = vmax.xlane.f32.xlu0 %v6277_v44  ;;  %v12426_v7 = vpop.f32.mrf.mxu0  ;;  %v12428_v39 = vpop.f32.mrf.mxu1 }
 0x416   :  { %v9990_v55 = vpop.f32.mrf.mxu0  ;;  %v12434_v62 = vpop.f32.mrf.mxu1 }
 0x418   :  { %6266 = vmax.xlane.f32.xlu1 %v6265_v9  ;;  %6272 = vmax.xlane.f32.xlu0 %v6271_v2  ;;  %v10000_v61 = vpop.f32.mrf.mxu1  ;;  %v12440_v45 = vpop.f32.mrf.mxu0  ;;  %v6295_v9 = vsel %vm6185_vm4, %v12424_v58, -inf  ;;  %v6283_v2 = vsel %vm6185_vm4, %v12426_v7, -inf }
 0x41a   :  { %v12442_v29 = vpop.f32.mrf.mxu1 }
 0x41b   :  { %v6307_v31 = vsel %vm6185_vm4, %v12442_v29, -inf }
 0x41c   :  { %6299 = vmax.xlane.f32.xlu0 %v6298_v25  ;;  %6281 = vmax.xlane.f32.xlu1 %v6280_v53  ;;  %v6310_v25 = vsel %vm6204_vm5, %v12428_v39, -inf  ;;  %v6304_v53 = vsel %vm6185_vm4, %v12434_v62, -inf }
 0x420   :  { %6293 = vmax.xlane.f32.xlu0 %v6292_v8  ;;  %6275 = vmax.xlane.f32.xlu1 %v6274_v57 }
 0x422   :  { %v12448_v17 = vpop.f32.mrf.mxu0  ;;  %v12450_v46 = vpop.f32.mrf.mxu1 }
 0x423   :  { %13515 = vst [vmem:[#allocation34_spill] sm:$0xff] %v12448_v17 }
 0x424   :  { %v12456_v21 = vpop.f32.mrf.mxu0  ;;  %v12458_v40 = vpop.f32.mrf.mxu1  ;;  %6302 = vmax.xlane.f32.xlu1 %v6301_v11  ;;  %6290 = vmax.xlane.f32.xlu0 %v6289_v32  ;;  %v6286_v11 = vsel %vm6185_vm4, %v12440_v45, -inf  ;;  %v6319_v32 = vsel %vm6185_vm4, %v12448_v17, -inf }
 0x426   :  { %v12460_v27 = vpop.f32.mrf.mxu0  ;;  %v12462_v44 = vpop.f32.mrf.mxu1 }
 0x427   :  { %13516 = vst [vmem:[#allocation35_spill] sm:$0xff] %v12460_v27 }
 0x428   :  { %v12468_v55 = vpop.f32.mrf.mxu0  ;;  %v12470_v61 = vpop.f32.mrf.mxu1  ;;  %6296 = vmax.xlane.f32.xlu1 %v6295_v9  ;;  %6284 = vmax.xlane.f32.xlu0 %v6283_v2 }
 0x42c   :  { %6311 = vmax.xlane.f32.xlu1 %v6310_v25  ;;  %6305 = vmax.xlane.f32.xlu0 %v6304_v53  ;;  %v6322_v53 = vsel %vm6185_vm4, %v12460_v27, -inf }
 0x42e   :  { %v12476_v8 = vpop.f32.mrf.mxu0  ;;  %v12478_v57 = vpop.f32.mrf.mxu1 }
 0x42f   :  { %13517 = vst [vmem:[#allocation21_spill] sm:$0xff] %v12478_v57  ;;  %v6331_v25 = vsel %vm6204_vm5, %v12476_v8, -inf }
 0x430   :  { %v12484_v9 = vpop.f32.mrf.mxu0  ;;  %v12486_v2 = vpop.f32.mrf.mxu1  ;;  %6287 = vmax.xlane.f32.xlu1 %v6286_v11  ;;  %6320 = vmax.xlane.f32.xlu0 %v6319_v32 }
 0x431   :  { %13518 = vst [vmem:[#allocation20_spill] sm:$0xff] %v12484_v9  ;;  %13519 = vst [vmem:[#allocation26_spill] sm:$0xff] %v12486_v2  ;;  %v6325_v50 = vsel %vm6185_vm4, %v12484_v9, -inf }
 0x432   :  { %v10010_v19 = vpop.f32.mrf.mxu0  ;;  %v10020_v63 = vpop.f32.mrf.mxu1 }
 0x433   :  { %v6352_v19 = vsel %vm6204_vm5, %v12478_v57, -inf  ;;  %v6346_v63 = vsel %vm6185_vm4, %v12486_v2, -inf }
 0x434   :  { %6308 = vmax.xlane.f32.xlu1 %v6307_v31  ;;  %6332 = vmax.xlane.f32.xlu0 %v6331_v25  ;;  %v12500_v11 = vpop.f32.mrf.mxu0  ;;  %v12504_v32 = vpop.f32.mrf.mxu1 }
 0x435   :  { %13520 = vst [vmem:[#allocation24_spill] sm:$0xff] %v12500_v11  ;;  %v6328_v31 = vsel %vm6185_vm4, %v12500_v11, -inf  ;;  %13521 = vst [vmem:[#allocation25_spill] sm:$0xff] %v12504_v32  ;;  %v6349_v25 = vsel %vm6185_vm4, %v12504_v32, -inf }
 0x438   :  { %6323 = vmax.xlane.f32.xlu1 %v6322_v53  ;;  %6326 = vmax.xlane.f32.xlu0 %v6325_v50  ;;  %v12508_v50 = vpop.trf.xlu0 }
 0x439   :  { %13522 = vst [vmem:[#allocation22_spill] sm:$0xff] %v12508_v50 }
 0x43c   :  { %6353 = vmax.xlane.f32.xlu1 %v6352_v19  ;;  %6347 = vmax.xlane.f32.xlu0 %v6346_v63  ;;  %v12510_v53 = vpop.trf.xlu0 }
 0x43d   :  { %13523 = vst [vmem:[#allocation19_spill] sm:$0xff] %v12510_v53 }
 0x440   :  { %6329 = vmax.xlane.f32.xlu1 %v6328_v31  ;;  %v12512_v13 = vpop.trf.xlu0 }
 0x441   :  { %13524 = vst [vmem:[#allocation23_spill] sm:$0xff] %v12512_v13 }
 0x444   :  { %6350 = vmax.xlane.f32.xlu1 %v6349_v25  ;;  %v12514_v36 = vpop.trf.xlu0 }
 0x445   :  { %13525 = vst [vmem:[#allocation17_spill] sm:$0xff] %v12514_v36 }
 0x465   :  { %v6194_v19 = vpop.xlane.xlu0 %6193 }
 0x466   :  { %v6357_v63 = vsub.f32 %v12296_v51, %v6194_v19 }
 0x468   :  { %v6415_v27 = vmul.f32 1.442695, %v6357_v63 }
 0x469   :  { %v6188_v17 = vpop.xlane.xlu0 %6187  ;;  %v6197_v11 = vpop.xlane.xlu1 %6196 }
 0x46a   :  { %10338 = vpow2.f32 %v6415_v27  ;;  %v6358_v31 = vsub.f32 %v12306_v52, %v6197_v11 }
 0x46c   :  { %v6417_v2 = vmul.f32 1.442695, %v6358_v31 }
 0x46d   :  { %v6216_v32 = vpop.xlane.xlu0 %6215  ;;  %v12518_v25 = vpop.xlane.xlu1 %6190 }
 0x46e   :  { %v6364_v50 = vsub.f32 %v12298_v33, %v6216_v32  ;;  %10340 = vpow2.f32 %v6417_v2 }
 0x470   :  { %v6429_v53 = vmul.f32 1.442695, %v6364_v50 }
 0x471   :  { %v6228_v13 = vpop.xlane.xlu0 %6227  ;;  %v6219_v57 = vpop.xlane.xlu1 %6218 }
 0x472   :  { %10342 = vpow2.f32 %v6429_v53  ;;  %v6368_v36 = vsub.f32 %v12324_v0, %v6228_v13  ;;  %v6365_v51 = vsub.f32 %v12312_v35, %v6219_v57 }
 0x474   :  { %v6431_v19 = vmul.f32 1.442695, %v6365_v51  ;;  %v6437_v63 = vmul.f32 1.442695, %v6368_v36 }
 0x475   :  { %v6210_v27 = vpop.xlane.xlu0 %6209  ;;  %v6207_v9 = vpop.xlane.xlu1 %6206 }
 0x476   :  { %v6361_v52 = vsub.f32 %v12322_v59, %v6207_v9  ;;  %10344 = vpow2.f32 %v6431_v19 }
 0x477   :  { %v12524_v11 = vpop.eup %10338  ;;  %10346 = vpow2.f32 %v6437_v63 }
 0x478   :  { %v6423_v31 = vmul.f32 1.442695, %v6361_v52  ;;  %v6529_v33 = vsel %vm6185_vm4, %v12524_v11, 0.0 }
 0x479   :  { %v6222_v2 = vpop.xlane.xlu0 %6221  ;;  %v6200_v32 = vpop.xlane.xlu1 %6199  ;;  %6530 = vadd.xlane.f32.xlu0 %v6529_v33  ;;  %v6362_v33 = vsub.f32 %v12302_v41, %v6210_v27 }
 0x47a   :  { %v6366_v13 = vsub.f32 %v12330_v22, %v6222_v2  ;;  %v6359_v35 = vsub.f32 %v12332_v42, %v6200_v32  ;;  %10348 = vpow2.f32 %v6423_v31  ;;  %v6355_v22 = vsub.f32 %v12304_v1, %v6188_v17 }
 0x47b   :  { %v12530_v36 = vpop.eup %10340  ;;  %v6425_v41 = vmul.f32 1.442695, %v6362_v33 }
 0x47c   :  { %v6419_v0 = vmul.f32 1.442695, %v6359_v35  ;;  %v6433_v59 = vmul.f32 1.442695, %v6366_v13  ;;  %v6532_v9 = vsel %vm6185_vm4, %v12530_v36, 0.0 }
 0x47d   :  { %v6213_v57 = vpop.xlane.xlu1 %6212  ;;  %6533 = vadd.xlane.f32.xlu1 %v6532_v9  ;;  %v6411_v31 = vmul.f32 1.442695, %v6355_v22 }
 0x47e   :  { %10350 = vpow2.f32 %v6419_v0 }
 0x47f   :  { %v12534_v50 = vpop.eup %10342  ;;  %10352 = vpow2.f32 %v6433_v59 }
 0x480   :  { %13526 = vst [vmem:[#allocation27_spill] sm:$0xff] %v12534_v50  ;;  %v6550_v53 = vsel %vm6185_vm4, %v12534_v50, 0.0 }
 0x481   :  { %v6203_v42 = vpop.xlane.xlu1 %6202  ;;  %v12539_v51 = vpop.xlane.xlu0 %6236  ;;  %6551 = vadd.xlane.f32.xlu0 %v6550_v53 }
 0x482   :  { %v6360_v19 = vsub.f32 %v12344_v30, %v6203_v42  ;;  %v6356_v30 = vsub.f32 %v12314_v48, %v12518_v25  ;;  %v6363_v48 = vsub.f32 %v12320_v49, %v6213_v57 }
 0x483   :  { %v12542_v63 = vpop.eup %10344 }
 0x484   :  { %v6421_v52 = vmul.f32 1.442695, %v6360_v19  ;;  %v6553_v13 = vsel %vm6185_vm4, %v12542_v63, 0.0  ;;  %v12549_v1 = vpop.eup %10346  ;;  %v6413_v22 = vmul.f32 1.442695, %v6356_v30 }
 0x485   :  { %v6225_v2 = vpop.xlane.xlu1 %6224  ;;  %v12545_v32 = vpop.xlane.xlu0 %6230  ;;  %6554 = vadd.xlane.f32.xlu1 %v6553_v13  ;;  %v6562_v53 = vsel %vm6204_vm5, %v12549_v1, 0.0 }
 0x486   :  { %10354 = vpow2.f32 %v6421_v52  ;;  %v6367_v17 = vsub.f32 %v12346_v24, %v6225_v2 }
 0x487   :  { %v12552_v35 = vpop.eup %10348  ;;  %10356 = vpow2.f32 %v6411_v31  ;;  %v6427_v31 = vmul.f32 1.442695, %v6363_v48 }
 0x488   :  { %v6435_v0 = vmul.f32 1.442695, %v6367_v17  ;;  %v6541_v9 = vsel %vm6204_vm5, %v12552_v35, 0.0 }
 0x489   :  { %v12556_v27 = vpop.xlane.xlu0 %6257  ;;  %v12558_v59 = vpop.xlane.xlu1 %6239  ;;  %6542 = vadd.xlane.f32.xlu0 %v6541_v9  ;;  %6563 = vadd.xlane.f32.xlu1 %v6562_v53  ;;  %v6340_v9 = vsel %vm6185_vm4, %v12450_v46, -inf }
 0x48a   :  { %10358 = vpow2.f32 %v6435_v0 }
 0x48b   :  { %v12564_v24 = vpop.eup %10350  ;;  %10360 = vpow2.f32 %v6425_v41 }
 0x48c   :  { %v6535_v19 = vsel %vm6185_vm4, %v12564_v24, 0.0  ;;  %v12573_v52 = vpop.eup %10352  ;;  %10362 = vpow2.f32 %v6413_v22 }
 0x48d   :  { %v12567_v25 = vpop.xlane.xlu0 %6251  ;;  %v12569_v42 = vpop.xlane.xlu1 %6233  ;;  %6536 = vadd.xlane.f32.xlu0 %v6535_v19  ;;  %v6556_v13 = vsel %vm6185_vm4, %v12573_v52, 0.0  ;;  %10364 = vpow2.f32 %v6427_v31 }
 0x491   :  { %v12575_v33 = vpop.xlane.xlu1 %6260  ;;  %v6249_v2 = vpop.xlane.xlu0 %6248  ;;  %6557 = vadd.xlane.f32.xlu0 %v6556_v13 }
 0x492   :  { %v6375_v49 = vsub.f32 %v12380_v23, %v6249_v2 }
 0x493   :  { %v12580_v57 = vpop.eup %10354 }
 0x494   :  { %v6538_v17 = vsel %vm6185_vm4, %v12580_v57, 0.0  ;;  %v6451_v30 = vmul.f32 1.442695, %v6375_v49  ;;  %v12588_v53 = vpop.eup %10356 }
 0x495   :  { %v12584_v0 = vpop.xlane.xlu1 %6254  ;;  %v6243_v41 = vpop.xlane.xlu0 %6242  ;;  %6539 = vadd.xlane.f32.xlu1 %v6538_v17  ;;  %13527 = vst [vmem:[#allocation28_spill] sm:$0xff] %v12588_v53  ;;  %6341 = vmax.xlane.f32.xlu0 %v6340_v9  ;;  %v6523_v13 = vsel %vm6185_vm4, %v12588_v53, 0.0  ;;  %v6343_v9 = vsel %vm6185_vm4, %v12462_v44, -inf }
 0x496   :  { %v6373_v22 = vsub.f32 %v12384_v34, %v6243_v41  ;;  %10366 = vpow2.f32 %v6451_v30  ;;  %v6371_v30 = vsub.f32 %v12348_v26, %v12539_v51  ;;  %v6378_v51 = vsub.f32 %v12356_v12, %v12556_v27 }
 0x497   :  { %v12591_v23 = vpop.eup %10358  ;;  %v6369_v12 = vsub.f32 %v12354_v16, %v12545_v32  ;;  %v6316_v16 = vsel %vm6185_vm4, %v12468_v55, -inf }
 0x498   :  { %v6559_v48 = vsel %vm6185_vm4, %v12591_v23, 0.0  ;;  %v6447_v19 = vmul.f32 1.442695, %v6373_v22  ;;  %v12597_v49 = vpop.eup %10360  ;;  %v6443_v26 = vmul.f32 1.442695, %v6371_v30 }
 0x499   :  { %v6270_v31 = vpop.xlane.xlu1 %6269  ;;  %v6264_v2 = vpop.xlane.xlu0 %6263  ;;  %6560 = vadd.xlane.f32.xlu1 %v6559_v48  ;;  %6524 = vadd.xlane.f32.xlu0 %v6523_v13  ;;  %v6457_v27 = vmul.f32 1.442695, %v6378_v51  ;;  %v6439_v32 = vmul.f32 1.442695, %v6369_v12 }
 0x49a   :  { %v6382_v17 = vsub.f32 %v12382_v3, %v6270_v31  ;;  %v6380_v34 = vsub.f32 %v12386_v38, %v6264_v2  ;;  %v12603_v50 = vpop.eup %10362  ;;  %10368 = vpow2.f32 %v6447_v19  ;;  %v6544_v3 = vsel %vm6185_vm4, %v12597_v49, 0.0 }
 0x49b   :  { %v6526_v2 = vsel %vm6185_vm4, %v12603_v50, 0.0  ;;  %v12614_v13 = vpop.eup %10364 }
 0x49c   :  { %v6465_v41 = vmul.f32 1.442695, %v6382_v17  ;;  %v6461_v22 = vmul.f32 1.442695, %v6380_v34  ;;  %v6313_v34 = vsel %vm6185_vm4, %v12456_v21, -inf }
 0x49d   :  { %v6246_v53 = vpop.xlane.xlu1 %6245  ;;  %v12607_v48 = vpop.xlane.xlu0 %6278  ;;  %6344 = vmax.xlane.f32.xlu1 %v6343_v9  ;;  %6545 = vadd.xlane.f32.xlu0 %v6544_v3  ;;  %v6547_v9 = vsel %vm6185_vm4, %v12614_v13, 0.0 }
 0x49e   :  { %v6374_v38 = vsub.f32 %v12392_v43, %v6246_v53  ;;  %10370 = vpow2.f32 %v6465_v41  ;;  %v6372_v53 = vsub.f32 %v12360_v37, %v12558_v59  ;;  %v6379_v59 = vsub.f32 %v12366_v54, %v12575_v33 }
 0x49f   :  { %10372 = vpow2.f32 %v6461_v22  ;;  %v6370_v54 = vsub.f32 %v12372_v6, %v12569_v42  ;;  %v6377_v42 = vsub.f32 %v12374_v20, %v12584_v0 }
 0x4a0   :  { %v6449_v31 = vmul.f32 1.442695, %v6374_v38  ;;  %v6445_v37 = vmul.f32 1.442695, %v6372_v53  ;;  %v6376_v38 = vsub.f32 %v12362_v15, %v12567_v25  ;;  %v6459_v33 = vmul.f32 1.442695, %v6379_v59 }
 0x4a1   :  { %v6267_v19 = vpop.xlane.xlu1 %6266  ;;  %v12618_v17 = vpop.xlane.xlu0 %6272  ;;  %6527 = vadd.xlane.f32.xlu1 %v6526_v2  ;;  %6314 = vmax.xlane.f32.xlu0 %v6313_v34  ;;  %v6441_v6 = vmul.f32 1.442695, %v6370_v54  ;;  %v6455_v20 = vmul.f32 1.442695, %v6377_v42  ;;  %v6385_v42 = vsub.f32 %v12398_v4, %v12607_v48 }
 0x4a2   :  { %v6381_v43 = vsub.f32 %v12400_v10, %v6267_v19  ;;  %10374 = vpow2.f32 %v6449_v31  ;;  %v6334_v10 = vsel %vm6185_vm4, %v12458_v40, -inf  ;;  %v6337_v19 = vsel %vm6185_vm4, %v12470_v61, -inf }
 0x4a3   :  { %10376 = vpow2.f32 %v6443_v26  ;;  %v12635_v3 = vpop.eup %10366  ;;  %v6453_v25 = vmul.f32 1.442695, %v6376_v38  ;;  %v6471_v48 = vmul.f32 1.442695, %v6385_v42 }
 0x4a4   :  { %v6463_v41 = vmul.f32 1.442695, %v6381_v43  ;;  %v6583_v26 = vsel %vm6204_vm5, %v12635_v3, 0.0 }
 0x4a5   :  { %v12629_v30 = vpop.xlane.xlu0 %6299  ;;  %v12631_v22 = vpop.xlane.xlu1 %6281  ;;  %6548 = vadd.xlane.f32.xlu1 %v6547_v9  ;;  %6335 = vmax.xlane.f32.xlu0 %v6334_v10 }
 0x4a6   :  { %10378 = vpow2.f32 %v6463_v41 }
 0x4a7   :  { %10380 = vpow2.f32 %v6457_v27  ;;  %v12649_v51 = vpop.eup %10368 }
 0x4a8   :  { %10382 = vpow2.f32 %v6445_v37  ;;  %v6577_v53 = vsel %vm6185_vm4, %v12649_v51, 0.0 }
 0x4a9   :  { %v12643_v31 = vpop.xlane.xlu0 %6293  ;;  %v12645_v2 = vpop.xlane.xlu1 %6275  ;;  %6317 = vmax.xlane.f32.xlu1 %v6316_v16  ;;  %6584 = vadd.xlane.f32.xlu0 %v6583_v26  ;;  %10384 = vpow2.f32 %v6439_v32 }
 0x4aa   :  { %10386 = vpow2.f32 %v6459_v33 }
 0x4ab   :  { %v12655_v15 = vpop.eup %10370  ;;  %10388 = vpow2.f32 %v6453_v25 }
 0x4ac   :  { %v12661_v41 = vpop.eup %10372  ;;  %v6604_v12 = vsel %vm6204_vm5, %v12655_v15, 0.0  ;;  %10390 = vpow2.f32 %v6441_v6 }
 0x4ad   :  { %v12657_v34 = vpop.xlane.xlu1 %6302  ;;  %v6291_v43 = vpop.xlane.xlu0 %6290  ;;  %6338 = vmax.xlane.f32.xlu1 %v6337_v19  ;;  %6578 = vadd.xlane.f32.xlu0 %v6577_v53  ;;  %v6598_v16 = vsel %vm6185_vm4, %v12661_v41, 0.0 }
 0x4ae   :  { %v6389_v9 = vsub.f32 %v12422_v60, %v6291_v43 }
 0x4af   :  { %v12668_v27 = vpop.eup %10374 }
 0x4b0   :  { %v6479_v10 = vmul.f32 1.442695, %v6389_v9  ;;  %v12674_v60 = vpop.eup %10376  ;;  %v6580_v0 = vsel %vm6185_vm4, %v12668_v27, 0.0 }
 0x4b1   :  { %v12670_v37 = vpop.xlane.xlu1 %6296  ;;  %v6285_v59 = vpop.xlane.xlu0 %6284  ;;  %6605 = vadd.xlane.f32.xlu1 %v6604_v12  ;;  %6599 = vadd.xlane.f32.xlu0 %v6598_v16  ;;  %v6571_v19 = vsel %vm6185_vm4, %v12674_v60, 0.0 }
 0x4b2   :  { %v6387_v32 = vsub.f32 %v12426_v7, %v6285_v59  ;;  %10392 = vpow2.f32 %v6479_v10 }
 0x4b3   :  { %v12679_v38 = vpop.eup %10378  ;;  %10394 = vpow2.f32 %v6455_v20 }
 0x4b4   :  { %v6475_v26 = vmul.f32 1.442695, %v6387_v32  ;;  %v12683_v25 = vpop.eup %10380  ;;  %v6601_v9 = vsel %vm6185_vm4, %v12679_v38, 0.0 }
 0x4b5   :  { %v6312_v54 = vpop.xlane.xlu1 %6311  ;;  %v6306_v33 = vpop.xlane.xlu0 %6305  ;;  %6581 = vadd.xlane.f32.xlu1 %v6580_v0  ;;  %6572 = vadd.xlane.f32.xlu0 %v6571_v19  ;;  %v6592_v59 = vsel %vm6185_vm4, %v12683_v25, 0.0  ;;  %v6392_v0 = vsub.f32 %v12404_v5, %v12629_v30  ;;  %v6386_v19 = vsub.f32 %v12410_v28, %v12631_v22  ;;  %v6383_v30 = vsub.f32 %v12402_v47, %v12618_v17 }
 0x4b6   :  { %v6396_v7 = vsub.f32 %v12428_v39, %v6312_v54  ;;  %v6394_v43 = vsub.f32 %v12434_v62, %v6306_v33  ;;  %v12689_v6 = vpop.eup %10382  ;;  %10396 = vpow2.f32 %v6475_v26 }
 0x4b7   :  { %v12695_v39 = vpop.eup %10384  ;;  %v6574_v20 = vsel %vm6185_vm4, %v12689_v6, 0.0  ;;  %v6473_v22 = vmul.f32 1.442695, %v6386_v19  ;;  %v6467_v17 = vmul.f32 1.442695, %v6383_v30 }
 0x4b8   :  { %v6493_v53 = vmul.f32 1.442695, %v6396_v7  ;;  %v6489_v12 = vmul.f32 1.442695, %v6394_v43  ;;  %v12702_v4 = vpop.eup %10386  ;;  %v6565_v54 = vsel %vm6185_vm4, %v12695_v39, 0.0 }
 0x4b9   :  { %v6288_v10 = vpop.xlane.xlu1 %6287  ;;  %6602 = vadd.xlane.f32.xlu1 %v6601_v9  ;;  %6593 = vadd.xlane.f32.xlu0 %v6592_v59  ;;  %v12698_v32 = vpop.xlane.xlu0 %6320  ;;  %v6595_v43 = vsel %vm6185_vm4, %v12702_v4, 0.0  ;;  %v6390_v59 = vsub.f32 %v12412_v18, %v12643_v31 }
 0x4ba   :  { %v6388_v62 = vsub.f32 %v12440_v45, %v6288_v10  ;;  %10398 = vpow2.f32 %v6493_v53  ;;  %v12708_v45 = vpop.eup %10388  ;;  %v6485_v53 = vmul.f32 1.442695, %v6392_v0 }
 0x4bb   :  { %10400 = vpow2.f32 %v6489_v12  ;;  %v12715_v5 = vpop.eup %10390  ;;  %v6586_v9 = vsel %vm6185_vm4, %v12708_v45, 0.0  ;;  %v6393_v12 = vsub.f32 %v12416_v56, %v12657_v34  ;;  %v6384_v56 = vsub.f32 %v12414_v14, %v12645_v2 }
 0x4bc   :  { %v6477_v16 = vmul.f32 1.442695, %v6388_v62  ;;  %v6568_v10 = vsel %vm6185_vm4, %v12715_v5, 0.0  ;;  %v6481_v18 = vmul.f32 1.442695, %v6390_v59  ;;  %v6391_v2 = vsub.f32 %v12424_v58, %v12670_v37  ;;  %v13529_v37 = vld [vmem:[#allocation21_spill] sm:$0xff] }
 0x4bd   :  { %v6309_v26 = vpop.xlane.xlu1 %6308  ;;  %6575 = vadd.xlane.f32.xlu1 %v6574_v20  ;;  %6566 = vadd.xlane.f32.xlu0 %v6565_v54  ;;  %v6333_v42 = vpop.xlane.xlu0 %6332  ;;  %v6487_v34 = vmul.f32 1.442695, %v6393_v12  ;;  %v6469_v14 = vmul.f32 1.442695, %v6384_v56 }
 0x4be   :  { %v6395_v33 = vsub.f32 %v12442_v29, %v6309_v26  ;;  %10402 = vpow2.f32 %v6477_v16  ;;  %v6403_v31 = vsub.f32 %v12476_v8, %v6333_v42  ;;  %v6483_v58 = vmul.f32 1.442695, %v6391_v2 }
 0x4bf   :  { %10404 = vpow2.f32 %v6471_v48  ;;  %v12721_v29 = vpop.eup %10392 }
 0x4c0   :  { %v6491_v7 = vmul.f32 1.442695, %v6395_v33  ;;  %v12729_v47 = vpop.eup %10394  ;;  %v6625_v62 = vsel %vm6204_vm5, %v12721_v29, 0.0  ;;  %v6507_v8 = vmul.f32 1.442695, %v6403_v31 }
 0x4c1   :  { %6596 = vadd.xlane.f32.xlu1 %v6595_v43  ;;  %6587 = vadd.xlane.f32.xlu0 %v6586_v9  ;;  %v12723_v28 = vpop.xlane.xlu1 %6323  ;;  %v6327_v20 = vpop.xlane.xlu0 %6326  ;;  %v6589_v48 = vsel %vm6185_vm4, %v12729_v47, 0.0  ;;  %v13528_v43 = vld [vmem:[#allocation20_spill] sm:$0xff] }
 0x4c2   :  { %10406 = vpow2.f32 %v6491_v7  ;;  %v6401_v30 = vsub.f32 %v13528_v43, %v6327_v20 }
 0x4c3   :  { %10408 = vpow2.f32 %v6485_v53  ;;  %v12735_v16 = vpop.eup %10396 }
 0x4c4   :  { %10410 = vpow2.f32 %v6473_v22  ;;  %v6619_v54 = vsel %vm6185_vm4, %v12735_v16, 0.0  ;;  %v6503_v59 = vmul.f32 1.442695, %v6401_v30 }
 0x4c5   :  { %6569 = vadd.xlane.f32.xlu1 %v6568_v10  ;;  %6626 = vadd.xlane.f32.xlu0 %v6625_v62  ;;  %10412 = vpow2.f32 %v6467_v17  ;;  %v6354_v26 = vpop.xlane.xlu1 %6353  ;;  %v6348_v42 = vpop.xlane.xlu0 %6347  ;;  %v13530_v62 = vld [vmem:[#allocation26_spill] sm:$0xff] }
 0x4c6   :  { %10414 = vpow2.f32 %v6487_v34  ;;  %v6410_v12 = vsub.f32 %v13529_v37, %v6354_v26  ;;  %v6408_v56 = vsub.f32 %v13530_v62, %v6348_v42  ;;  %v13533_v42 = vld [vmem:[#allocation25_spill] sm:$0xff] }
 0x4c7   :  { %v12741_v0 = vpop.eup %10398  ;;  %10416 = vpow2.f32 %v6481_v18  ;;  %v13531_v18 = vld [vmem:[#allocation24_spill] sm:$0xff] }
 0x4c8   :  { %v12746_v33 = vpop.eup %10400  ;;  %v6646_v19 = vsel %vm6204_vm5, %v12741_v0, 0.0  ;;  %10418 = vpow2.f32 %v6469_v14  ;;  %v13532_v14 = vld [vmem:[#allocation34_spill] sm:$0xff] }
 0x4c9   :  { %6590 = vadd.xlane.f32.xlu1 %v6589_v48  ;;  %6620 = vadd.xlane.f32.xlu0 %v6619_v54  ;;  %v6640_v53 = vsel %vm6185_vm4, %v12746_v33, 0.0  ;;  %v6330_v22 = vpop.xlane.xlu1 %6329  ;;  %10420 = vpow2.f32 %v6507_v8  ;;  %v6521_v48 = vmul.f32 1.442695, %v6410_v12  ;;  %v6399_v2 = vsub.f32 %v13532_v14, %v12698_v32 }
 0x4ca   :  { %10422 = vpow2.f32 %v6483_v58  ;;  %v6402_v31 = vsub.f32 %v13531_v18, %v6330_v22 }
 0x4cb   :  { %v12752_v7 = vpop.eup %10402  ;;  %10424 = vpow2.f32 %v6503_v59  ;;  %v6499_v32 = vmul.f32 1.442695, %v6399_v2  ;;  %v13534_v59 = vld [vmem:[#allocation35_spill] sm:$0xff] }
 0x4cc   :  { %v12757_v9 = vpop.eup %10404  ;;  %v6622_v10 = vsel %vm6185_vm4, %v12752_v7, 0.0  ;;  %10426 = vpow2.f32 %v6521_v48  ;;  %v6400_v62 = vsub.f32 %v13534_v59, %v12723_v28 }
 0x4cd   :  { %6647 = vadd.xlane.f32.xlu1 %v6646_v19  ;;  %6641 = vadd.xlane.f32.xlu0 %v6640_v53  ;;  %v6613_v34 = vsel %vm6185_vm4, %v12757_v9, 0.0  ;;  %v6517_v19 = vmul.f32 1.442695, %v6408_v56  ;;  %v6351_v8 = vpop.xlane.xlu1 %6350  ;;  %v6505_v53 = vmul.f32 1.442695, %v6402_v31 }
 0x4ce   :  { %v6409_v22 = vsub.f32 %v13533_v42, %v6351_v8 }
 0x4cf   :  { %v12762_v17 = vpop.eup %10406  ;;  %10428 = vpow2.f32 %v6517_v19 }
 0x4d0   :  { %v12767_v20 = vpop.eup %10408  ;;  %v6643_v26 = vsel %vm6185_vm4, %v12762_v17, 0.0  ;;  %10430 = vpow2.f32 %v6505_v53  ;;  %v6519_v56 = vmul.f32 1.442695, %v6409_v22 }
 0x4d1   :  { %6623 = vadd.xlane.f32.xlu1 %v6622_v10  ;;  %6614 = vadd.xlane.f32.xlu0 %v6613_v34  ;;  %v12772_v54 = vpop.eup %10410  ;;  %v6634_v43 = vsel %vm6185_vm4, %v12767_v20, 0.0  ;;  %10432 = vpow2.f32 %v6499_v32 }
 0x4d2   :  { %v12778_v30 = vpop.eup %10412  ;;  %v6616_v58 = vsel %vm6185_vm4, %v12772_v54, 0.0  ;;  %10434 = vpow2.f32 %v6519_v56 }
 0x4d3   :  { %v12783_v37 = vpop.eup %10414  ;;  %v6607_v12 = vsel %vm6185_vm4, %v12778_v30, 0.0 }
 0x4d4   :  { %v12787_v10 = vpop.eup %10416  ;;  %v6637_v34 = vsel %vm6185_vm4, %v12783_v37, 0.0 }
 0x4d5   :  { %6644 = vadd.xlane.f32.xlu1 %v6643_v26  ;;  %6635 = vadd.xlane.f32.xlu0 %v6634_v43  ;;  %v12793_v48 = vpop.eup %10418  ;;  %v6628_v18 = vsel %vm6185_vm4, %v12787_v10, 0.0  ;;  %v6501_v26 = vmul.f32 1.442695, %v6400_v62 }
 0x4d6   :  { %v12797_v31 = vpop.eup %10420  ;;  %v6610_v28 = vsel %vm6185_vm4, %v12793_v48, 0.0 }
 0x4d7   :  { %v12801_v14 = vpop.eup %10422  ;;  %v6667_v2 = vsel %vm6204_vm5, %v12797_v31, 0.0  ;;  %10436 = vpow2.f32 %v6501_v26 }
 0x4d8   :  { %v12805_v19 = vpop.eup %10424  ;;  %v6631_v8 = vsel %vm6185_vm4, %v12801_v14, 0.0 }
 0x4d9   :  { %6617 = vadd.xlane.f32.xlu1 %v6616_v58  ;;  %6608 = vadd.xlane.f32.xlu0 %v6607_v12  ;;  %13535 = vst [vmem:[#allocation29_spill] sm:$0xff] %v12805_v19  ;;  %v12809_v43 = vpop.eup %10426  ;;  %v6661_v53 = vsel %vm6185_vm4, %v12805_v19, 0.0 }
 0x4da   :  { %13536 = vst [vmem:[#allocation30_spill] sm:$0xff] %v12809_v43  ;;  %v6688_v22 = vsel %vm6204_vm5, %v12809_v43, 0.0 }
 0x4dc   :  { %v12813_v42 = vpop.eup %10428 }
 0x4dd   :  { %6638 = vadd.xlane.f32.xlu1 %v6637_v34  ;;  %6629 = vadd.xlane.f32.xlu0 %v6628_v18  ;;  %13537 = vst [vmem:[#allocation20_spill] sm:$0xff] %v12813_v42  ;;  %v12817_v58 = vpop.eup %10430  ;;  %v6682_v32 = vsel %vm6185_vm4, %v12813_v42, 0.0 }
 0x4de   :  { %13538 = vst [vmem:[#allocation21_spill] sm:$0xff] %v12817_v58  ;;  %v12821_v12 = vpop.eup %10432  ;;  %v6664_v59 = vsel %vm6185_vm4, %v12817_v58, 0.0 }
 0x4df   :  { %13539 = vst [vmem:[#allocation26_spill] sm:$0xff] %v12821_v12  ;;  %v12825_v62 = vpop.eup %10434  ;;  %v6655_v56 = vsel %vm6185_vm4, %v12821_v12, 0.0 }
 0x4e0   :  { %13540 = vst [vmem:[#allocation24_spill] sm:$0xff] %v12825_v62  ;;  %v6685_v34 = vsel %vm6185_vm4, %v12825_v62, 0.0 }
 0x4e1   :  { %6611 = vadd.xlane.f32.xlu1 %v6610_v28  ;;  %6668 = vadd.xlane.f32.xlu0 %v6667_v2 }
 0x4e4   :  { %v12831_v18 = vpop.eup %10436 }
 0x4e5   :  { %6632 = vadd.xlane.f32.xlu1 %v6631_v8  ;;  %6662 = vadd.xlane.f32.xlu0 %v6661_v53  ;;  %13541 = vst [vmem:[#allocation34_spill] sm:$0xff] %v12831_v18  ;;  %v6658_v26 = vsel %vm6185_vm4, %v12831_v18, 0.0 }
 0x4e9   :  { %6689 = vadd.xlane.f32.xlu1 %v6688_v22  ;;  %6683 = vadd.xlane.f32.xlu0 %v6682_v32 }
 0x4ed   :  { %6665 = vadd.xlane.f32.xlu1 %v6664_v59  ;;  %6656 = vadd.xlane.f32.xlu0 %v6655_v56 }
 0x4f1   :  { %6686 = vadd.xlane.f32.xlu1 %v6685_v34 }
 0x4f5   :  { %6659 = vadd.xlane.f32.xlu1 %v6658_v26 }
 0x502   :  { %v6531_v28 = vpop.xlane.xlu0 %6530 }
 0x506   :  { %v6534_v2 = vpop.xlane.xlu1 %6533 }
 0x50a   :  { %v6552_v8 = vpop.xlane.xlu0 %6551 }
 0x50e   :  { %v6555_v53 = vpop.xlane.xlu1 %6554 }
 0x512   :  { %v6543_v22 = vpop.xlane.xlu0 %6542  ;;  %v6564_v32 = vpop.xlane.xlu1 %6563 }
 0x513   :  { %10438 = vrcp.f32 %v6543_v22 }
 0x514   :  { %10440 = vrcp.f32 %v6564_v32 }
 0x516   :  { %v6537_v59 = vpop.xlane.xlu0 %6536 }
 0x517   :  { %10442 = vrcp.f32 %v6537_v59 }
 0x51a   :  { %v6558_v56 = vpop.xlane.xlu0 %6557 }
 0x51e   :  { %v6540_v12 = vpop.xlane.xlu1 %6539  ;;  %v6342_v42 = vpop.xlane.xlu0 %6341 }
 0x51f   :  { %10444 = vrcp.f32 %v6540_v12  ;;  %v6406_v34 = vsub.f32 %v12450_v46, %v6342_v42 }
 0x520   :  { %10446 = vrcp.f32 %v6534_v2  ;;  %v10439_v62 = vpop.eup %10438 }
 0x521   :  { %10448 = vrcp.f32 %v6558_v56  ;;  %v10441_v26 = vpop.eup %10440  ;;  %v6513_v18 = vmul.f32 1.442695, %v6406_v34  ;;  %v6753_v58 = vmul.f32 %v10439_v62, %v12552_v35  ;;  %v13542_v35 = vmov 0.0  }
 0x522   :  { %10450 = vrcp.f32 %v6531_v28  ;;  %v6561_v19 = vpop.xlane.xlu1 %6560  ;;  %v6525_v43 = vpop.xlane.xlu0 %6524  ;;  %v6760_v22 = vmul.f32 %v10441_v26, %v12549_v1 }
 0x523   :  { %10452 = vrcp.f32 %v6561_v19  ;;  %v6806_v32 = vpack.c.bf16 %v6753_v58, %v6753_v58 }
 0x524   :  { %10454 = vpow2.f32 %v6513_v18  ;;  %v6810_v59 = vpack.c.bf16 %v6760_v22, %v6760_v22  ;;  %v10443_v1 = vpop.eup %10442 }
 0x525   :  { %10456 = vrcp.f32 %v6555_v53  ;;  %v6856_v12 = vsel %vm6185_vm4, %v6806_v32, 0  ;;  %v6751_v56 = vmul.f32 %v10443_v1, %v12564_v24 }
 0x526   :  { %v6345_v2 = vpop.xlane.xlu1 %6344  ;;  %10458 = vrcp.f32 %v6552_v8  ;;  %10022 = vmatpush3.bf16.xpose.msra.mxu0 %v6856_v12  ;;  %v6546_v46 = vpop.xlane.xlu0 %6545  ;;  %v6911_v42 = vsel %vm6185_vm4, %v6810_v59, 0 }
 0x527   :  { %v6407_v28 = vsub.f32 %v12462_v44, %v6345_v2  ;;  %10034 = vmatpush3.bf16.xpose.msra.mxu1 %v6911_v42  ;;  %10023 = vmatprep.subr.bf16.mxu0 %v13542_v35  ;;  %10460 = vrcp.f32 %v6525_v43 }
 0x528   :  { %10035 = vmatprep.subr.bf16.mxu1 %v13542_v35 }
 0x529   :  { %v6515_v19 = vmul.f32 1.442695, %v6407_v28 }
 0x52a   :  { %v6528_v58 = vpop.xlane.xlu1 %6527  ;;  %v6315_v62 = vpop.xlane.xlu0 %6314 }
 0x52b   :  { %10462 = vpow2.f32 %v6515_v19  ;;  %v6397_v8 = vsub.f32 %v12456_v21, %v6315_v62 }
 0x52c   :  { %v10445_v18 = vpop.eup %10444  ;;  %10464 = vrcp.f32 %v6528_v58 }
 0x52d   :  { %v10447_v53 = vpop.eup %10446  ;;  %v6752_v44 = vmul.f32 %v10445_v18, %v12580_v57  ;;  %10466 = vrcp.f32 %v6546_v46  ;;  %v6495_v26 = vmul.f32 1.442695, %v6397_v8 }
 0x52e   :  { %v10449_v34 = vpop.eup %10448  ;;  %v6549_v22 = vpop.xlane.xlu1 %6548  ;;  %v6750_v21 = vmul.f32 %v10447_v53, %v12530_v36 }
 0x52f   :  { %v10451_v32 = vpop.eup %10450  ;;  %v6336_v59 = vpop.xlane.xlu0 %6335  ;;  %10468 = vrcp.f32 %v6549_v22  ;;  %v6805_v43 = vpack.c.bf16 %v6752_v44, %v6751_v56  ;;  %v6758_v57 = vmul.f32 %v10449_v34, %v12573_v52 }
 0x530   :  { %v10453_v12 = vpop.eup %10452  ;;  %10470 = vpow2.f32 %v6495_v26  ;;  %v6404_v2 = vsub.f32 %v12458_v40, %v6336_v59  ;;  %v6749_v62 = vmul.f32 %v10451_v32, %v12524_v11 }
 0x531   :  { %v12848_v42 = vpop.eup %10454  ;;  %v6853_v24 = vsel %vm6185_vm4, %v6805_v43, 0  ;;  %v6759_v46 = vmul.f32 %v10453_v12, %v12591_v23 }
 0x532   :  { %v10457_v28 = vpop.eup %10456  ;;  %v6509_v19 = vmul.f32 1.442695, %v6404_v2  ;;  %v6676_v1 = vsel %vm6185_vm4, %v12848_v42, 0.0  ;;  %10024 = vmatpush3.bf16.xpose.msra.mxu0 %v6853_v24  ;;  %v6318_v58 = vpop.xlane.xlu1 %6317  ;;  %v6804_v52 = vpack.c.bf16 %v6750_v21, %v6749_v62 }
 0x533   :  { %6677 = vadd.xlane.f32.xlu0 %v6676_v1  ;;  %v6585_v40 = vpop.xlane.xlu0 %6584  ;;  %v6398_v36 = vsub.f32 %v12468_v55, %v6318_v58  ;;  %v6809_v18 = vpack.c.bf16 %v6759_v46, %v6758_v57  ;;  %10025 = vmatprep.subr.bf16.mxu0 %v13542_v35  ;;  %v10459_v8 = vpop.eup %10458  ;;  %v6757_v56 = vmul.f32 %v10457_v28, %v12542_v63  ;;  %v13543_v55 = vld [vmem:[#allocation27_spill] sm:$0xff]  ;;  %v13544_v46 = vld [vmem:[#allocation28_spill] sm:$0xff] }
 0x534   :  { %10472 = vpow2.f32 %v6509_v19  ;;  %v10461_v34 = vpop.eup %10460  ;;  %v6756_v22 = vmul.f32 %v10459_v8, %v13543_v55  ;;  %v6850_v12 = vsel %vm6185_vm4, %v6804_v52, 0 }
 0x535   :  { %10474 = vrcp.f32 %v6585_v40  ;;  %v6497_v23 = vmul.f32 1.442695, %v6398_v36  ;;  %v6908_v53 = vsel %vm6185_vm4, %v6809_v18, 0  ;;  %v6747_v28 = vmul.f32 %v10461_v34, %v13544_v46  ;;  %v13546_v46 = vld [vmem:[#allocation32_spill] sm:$0xff] }
 0x536   :  { %10036 = vmatpush3.bf16.xpose.msra.mxu1 %v6908_v53  ;;  %v6339_v44 = vpop.xlane.xlu1 %6338  ;;  %v6808_v2 = vpack.c.bf16 %v6757_v56, %v6756_v22 }
 0x537   :  { %10476 = vpow2.f32 %v6497_v23  ;;  %v6579_v11 = vpop.xlane.xlu0 %6578  ;;  %v6405_v26 = vsub.f32 %v12470_v61, %v6339_v44  ;;  %10037 = vmatprep.subr.bf16.mxu1 %v13542_v35 }
 0x538   :  { %v12863_v32 = vpop.eup %10462  ;;  %v6905_v58 = vsel %vm6185_vm4, %v6808_v2, 0 }
 0x539   :  { %v10465_v59 = vpop.eup %10464  ;;  %v6511_v43 = vmul.f32 1.442695, %v6405_v26  ;;  %v6679_v63 = vsel %vm6185_vm4, %v12863_v32, 0.0 }
 0x53a   :  { %10026 = vmatpush3.bf16.xpose.msra.mxu0 %v6850_v12  ;;  %6680 = vadd.xlane.f32.xlu1 %v6679_v63  ;;  %v6606_v21 = vpop.xlane.xlu1 %6605  ;;  %v6748_v24 = vmul.f32 %v10465_v59, %v12603_v50  ;;  %v10467_v61 = vpop.eup %10466 }
 0x53b   :  { %10478 = vpow2.f32 %v6511_v43  ;;  %v6600_v57 = vpop.xlane.xlu0 %6599  ;;  %10027 = vmatprep.subr.bf16.mxu0 %v13542_v35  ;;  %v6754_v8 = vmul.f32 %v10467_v61, %v12597_v49  ;;  %v13545_v43 = vld [vmem:[#allocation31_spill] sm:$0xff] }
 0x53c   :  { %v10469_v19 = vpop.eup %10468  ;;  %10480 = vrcp.f32 %v6579_v11  ;;  %v6803_v62 = vpack.c.bf16 %v6748_v24, %v6747_v28  ;;  %v6835_v12 = vpack.c.bf16 %v13545_v43, %v13545_v43  ;;  %v6836_v28 = vpack.c.bf16 %v13546_v46, %v13546_v46 }
 0x53d   :  { %v12871_v1 = vpop.eup %10470  ;;  %10482 = vrcp.f32 %v6606_v21  ;;  %v6755_v40 = vmul.f32 %v10469_v19, %v12614_v13 }
 0x53e   :  { %v6649_v50 = vsel %vm6185_vm4, %v12871_v1, 0.0  ;;  %10038 = vmatpush3.bf16.xpose.msra.mxu1 %v6905_v58  ;;  %v6582_v36 = vpop.xlane.xlu1 %6581  ;;  %v6847_v23 = vsel %vm6185_vm4, %v6803_v62, 0 }
 0x53f   :  { %6650 = vadd.xlane.f32.xlu0 %v6649_v50  ;;  %v6573_v18 = vpop.xlane.xlu0 %6572  ;;  %10484 = vrcp.f32 %v6582_v36  ;;  %10039 = vmatprep.subr.bf16.mxu1 %v13542_v35  ;;  %v6807_v53 = vpack.c.bf16 %v6755_v40, %v6754_v8 }
 0x540   :  { %10486 = vrcp.f32 %v6600_v57 }
 0x541   :  { %v12879_v52 = vpop.eup %10472  ;;  %v6902_v26 = vsel %vm6185_vm4, %v6807_v53, 0 }
 0x542   :  { %v10475_v56 = vpop.eup %10474  ;;  %v6670_v13 = vsel %vm6185_vm4, %v12879_v52, 0.0  ;;  %10028 = vmatpush3.bf16.xpose.msra.mxu0 %v6847_v23  ;;  %v6603_v44 = vpop.xlane.xlu1 %6602 }
 0x543   :  { %6671 = vadd.xlane.f32.xlu0 %v6670_v13  ;;  %v6594_v34 = vpop.xlane.xlu0 %6593  ;;  %10488 = vrcp.f32 %v6603_v44  ;;  %10045 = vmatprep.subr.bf16.mxu0 %v13542_v35  ;;  %v6767_v11 = vmul.f32 %v10475_v56, %v12635_v3 }
 0x544   :  { %v12886_v49 = vpop.eup %10476  ;;  %10490 = vrcp.f32 %v6573_v18 }
 0x545   :  { %v6652_v55 = vsel %vm6185_vm4, %v12886_v49, 0.0  ;;  %v6814_v22 = vpack.c.bf16 %v6767_v11, %v6767_v11 }
 0x546   :  { %10040 = vmatpush3.bf16.xpose.msra.mxu1 %v6902_v26  ;;  %6653 = vadd.xlane.f32.xlu1 %v6652_v55  ;;  %v6576_v59 = vpop.xlane.xlu1 %6575 }
 0x547   :  { %v6567_v63 = vpop.xlane.xlu0 %6566  ;;  %10492 = vrcp.f32 %v6576_v59  ;;  %10057 = vmatprep.subr.bf16.mxu1 %v13542_v35  ;;  %v6966_v21 = vsel %vm6185_vm4, %v6814_v22, 0 }
 0x548   :  { %v12894_v3 = vpop.eup %10478  ;;  %10494 = vrcp.f32 %v6594_v34 }
 0x549   :  { %v10481_v2 = vpop.eup %10480  ;;  %10030 = vmatmul.mubr.msk.bf16.vlgmr.msra.gmra.mxu0 %vm6185_vm4, %v6835_v12  ;;  %v6673_v24 = vsel %vm6185_vm4, %v12894_v3, 0.0 }
 0x54a   :  { %v10483_v61 = vpop.eup %10482  ;;  %10046 = vmatpush3.bf16.xpose.msra.mxu0 %v6966_v21  ;;  %6674 = vadd.xlane.f32.xlu1 %v6673_v24  ;;  %v6597_v57 = vpop.xlane.xlu1 %6596  ;;  %v6765_v50 = vmul.f32 %v10481_v2, %v12649_v51 }
 0x54b   :  { %v6588_v19 = vpop.xlane.xlu0 %6587  ;;  %10496 = vrcp.f32 %v6597_v57  ;;  %v6774_v58 = vmul.f32 %v10483_v61, %v12655_v15  ;;  %10047 = vmatprep.subr.bf16.mxu0 %v13542_v35  ;;  %10053 = vmatprep.mubr.msk.bf16.mxu0 %vm10699_vm0, %v13542_v35 }
 0x54c   :  { %v10485_v62 = vpop.eup %10484  ;;  %10498 = vrcp.f32 %v6567_v63 }
 0x54d   :  { %10042 = vmatmul.mubr.msk.bf16.vlgmr.msra.gmra.mxu1 %vm6185_vm4, %v6836_v28  ;;  %v6818_v40 = vpack.c.bf16 %v6774_v58, %v6774_v58  ;;  %v6766_v36 = vmul.f32 %v10485_v62, %v12668_v27  ;;  %v10487_v18 = vpop.eup %10486 }
 0x54e   :  { %v6570_v8 = vpop.xlane.xlu1 %6569  ;;  %10065 = vmatprep.mubr.msk.bf16.mxu1 %vm10699_vm0, %v13542_v35  ;;  %v6772_v51 = vmul.f32 %v10487_v18, %v12661_v41 }
 0x54f   :  { %v6627_v15 = vpop.xlane.xlu0 %6626  ;;  %v7021_v23 = vsel %vm6185_vm4, %v6818_v40, 0  ;;  %10500 = vrcp.f32 %v6570_v8  ;;  %v6813_v53 = vpack.c.bf16 %v6766_v36, %v6765_v50 }
 0x550   :  { %v10489_v56 = vpop.eup %10488  ;;  %10502 = vrcp.f32 %v6588_v19  ;;  %10058 = vmatpush3.bf16.xpose.msra.mxu1 %v7021_v23 }
 0x551   :  { %10504 = vrcp.f32 %v6627_v15  ;;  %v6963_v13 = vsel %vm6185_vm4, %v6813_v53, 0  ;;  %10059 = vmatprep.subr.bf16.mxu1 %v13542_v35  ;;  %v6773_v27 = vmul.f32 %v10489_v56, %v12679_v38  ;;  %v10491_v44 = vpop.eup %10490 }
 0x552   :  { %10048 = vmatpush3.bf16.xpose.msra.mxu0 %v6963_v13  ;;  %v6591_v34 = vpop.xlane.xlu1 %6590  ;;  %v6763_v59 = vmul.f32 %v10491_v44, %v12674_v60 }
 0x553   :  { %v6621_v11 = vpop.xlane.xlu0 %6620  ;;  %10506 = vrcp.f32 %v6591_v34  ;;  %v6817_v26 = vpack.c.bf16 %v6773_v27, %v6772_v51  ;;  %10049 = vmatprep.subr.bf16.mxu0 %v13542_v35 }
 0x554   :  { %v10493_v55 = vpop.eup %10492 }
 0x555   :  { %v7018_v22 = vsel %vm6185_vm4, %v6817_v26, 0  ;;  %v6764_v43 = vmul.f32 %v10493_v55, %v12689_v6  ;;  %v10495_v12 = vpop.eup %10494 }
 0x556   :  { %v6648_v63 = vpop.xlane.xlu1 %6647  ;;  %v6770_v24 = vmul.f32 %v10495_v12, %v12683_v25 }
 0x557   :  { %v6642_v41 = vpop.xlane.xlu0 %6641  ;;  %10508 = vrcp.f32 %v6648_v63  ;;  %v6812_v38 = vpack.c.bf16 %v6764_v43, %v6763_v59 }
 0x558   :  { %v10497_v2 = vpop.eup %10496  ;;  %10060 = vmatpush3.bf16.xpose.msra.mxu1 %v7018_v22  ;;  %10510 = vrcp.f32 %v6621_v11  ;;  %v13547_v11 = vld [vmem:[#allocation33_spill] sm:$0xff] }
 0x559   :  { %v6960_v21 = vsel %vm6185_vm4, %v6812_v38, 0  ;;  %10061 = vmatprep.subr.bf16.mxu1 %v13542_v35  ;;  %v6771_v61 = vmul.f32 %v10497_v2, %v12702_v4  ;;  %v10499_v57 = vpop.eup %10498 }
 0x55a   :  { %10050 = vmatpush3.bf16.xpose.msra.mxu0 %v6960_v21  ;;  %v6624_v60 = vpop.xlane.xlu1 %6623  ;;  %v6761_v62 = vmul.f32 %v10499_v57, %v12695_v39 }
 0x55b   :  { %v6615_v6 = vpop.xlane.xlu0 %6614  ;;  %10512 = vrcp.f32 %v6624_v60  ;;  %v6816_v46 = vpack.c.bf16 %v6771_v61, %v6770_v24  ;;  %10051 = vmatprep.subr.bf16.mxu0 %v13542_v35 }
 0x55c   :  { %v10501_v28 = vpop.eup %10500 }
 0x55d   :  { %v10503_v19 = vpop.eup %10502  ;;  %v7015_v58 = vsel %vm6185_vm4, %v6816_v46, 0  ;;  %v6762_v40 = vmul.f32 %v10501_v28, %v12715_v5 }
 0x55e   :  { %v10505_v25 = vpop.eup %10504  ;;  %v6645_v50 = vpop.xlane.xlu1 %6644  ;;  %v6768_v15 = vmul.f32 %v10503_v19, %v12708_v45  ;;  %v6837_v45 = vpack.c.bf16 %v13547_v11, %v13547_v11 }
 0x55f   :  { %v6636_v4 = vpop.xlane.xlu0 %6635  ;;  %10514 = vrcp.f32 %v6645_v50  ;;  %v6811_v36 = vpack.c.bf16 %v6762_v40, %v6761_v62  ;;  %v6781_v39 = vmul.f32 %v10505_v25, %v12721_v29 }
 0x560   :  { %v10507_v18 = vpop.eup %10506  ;;  %10516 = vrcp.f32 %v6642_v41  ;;  %10062 = vmatpush3.bf16.xpose.msra.mxu1 %v7015_v58  ;;  %v13548_v41 = vld [vmem:[#allocation18_spill] sm:$0xff] }
 0x561   :  { %v6957_v8 = vsel %vm6185_vm4, %v6811_v36, 0  ;;  %10063 = vmatprep.subr.bf16.mxu1 %v13542_v35  ;;  %v6769_v23 = vmul.f32 %v10507_v18, %v12729_v47  ;;  %10518 = vrcp.f32 %v6615_v6  ;;  %v6822_v27 = vpack.c.bf16 %v6781_v39, %v6781_v39 }
 0x562   :  { %10052 = vmatpush3.bf16.xpose.msra.mxu0 %v6957_v8  ;;  %v6618_v5 = vpop.xlane.xlu1 %6617  ;;  %v6838_v38 = vpack.c.bf16 %v13548_v41, %v13548_v41 }
 0x563   :  { %v6609_v53 = vpop.xlane.xlu0 %6608  ;;  %10520 = vrcp.f32 %v6618_v5  ;;  %v6815_v56 = vpack.c.bf16 %v6769_v23, %v6768_v15  ;;  %10069 = vmatprep.subr.bf16.mxu0 %v13542_v35  ;;  %v7076_v55 = vsel %vm6185_vm4, %v6822_v27, 0 }
 0x564   :  { %v10509_v13 = vpop.eup %10508 }
 0x565   :  { %v7012_v51 = vsel %vm6185_vm4, %v6815_v56, 0  ;;  %v10511_v34 = vpop.eup %10510  ;;  %v6788_v29 = vmul.f32 %v10509_v13, %v12741_v0 }
 0x566   :  { %v6639_v44 = vpop.xlane.xlu1 %6638  ;;  %v6779_v43 = vmul.f32 %v10511_v34, %v12735_v16 }
 0x567   :  { %10522 = vrcp.f32 %v6639_v44  ;;  %v6630_v26 = vpop.xlane.xlu0 %6629  ;;  %v6826_v0 = vpack.c.bf16 %v6788_v29, %v6788_v29 }
 0x568   :  { %v10513_v47 = vpop.eup %10512  ;;  %10064 = vmatpush3.bf16.xpose.msra.mxu1 %v7012_v51  ;;  %10524 = vrcp.f32 %v6636_v4 }
 0x569   :  { %10054 = vmatmul.mubr.msk.bf16.vlgmr.msra.gmra.mxu0 %vm6185_vm4, %v6837_v45  ;;  %10081 = vmatprep.subr.bf16.mxu1 %v13542_v35  ;;  %v6780_v22 = vmul.f32 %v10513_v47, %v12752_v7  ;;  %10526 = vrcp.f32 %v6609_v53  ;;  %v7131_v61 = vsel %vm6185_vm4, %v6826_v0, 0  ;;  %v13549_v47 = vld [vmem:[#allocation22_spill] sm:$0xff] }
 0x56a   :  { %10070 = vmatpush3.bf16.xpose.msra.mxu0 %v7076_v55  ;;  %v6612_v59 = vpop.xlane.xlu1 %6611  ;;  %10077 = vmatprep.mubr.msk.bf16.mxu0 %vm10699_vm0, %v13542_v35 }
 0x56b   :  { %10528 = vrcp.f32 %v6612_v59  ;;  %10071 = vmatprep.subr.bf16.mxu0 %v13542_v35  ;;  %v6821_v2 = vpack.c.bf16 %v6780_v22, %v6779_v43  ;;  %v6669_v21 = vpop.xlane.xlu0 %6668  ;;  %v13550_v22 = vld [vmem:[#allocation30_spill] sm:$0xff] }
 0x56c   :  { %v10515_v12 = vpop.eup %10514 }
 0x56d   :  { %v10517_v63 = vpop.eup %10516  ;;  %v6787_v57 = vmul.f32 %v10515_v12, %v12762_v17  ;;  %v7073_v16 = vsel %vm6185_vm4, %v6821_v2, 0 }
 0x56e   :  { %v6633_v7 = vpop.xlane.xlu1 %6632  ;;  %v10519_v24 = vpop.eup %10518  ;;  %v6786_v6 = vmul.f32 %v10517_v63, %v12746_v33  ;;  %v13552_v63 = vld [vmem:[#allocation29_spill] sm:$0xff] }
 0x56f   :  { %10066 = vmatmul.mubr.msk.bf16.vlgmr.msra.gmra.mxu1 %vm6185_vm4, %v6838_v38  ;;  %10530 = vrcp.f32 %v6633_v7  ;;  %v6777_v17 = vmul.f32 %v10519_v24, %v12757_v9  ;;  %v6663_v62 = vpop.xlane.xlu0 %6662 }
 0x570   :  { %v10521_v60 = vpop.eup %10520  ;;  %10532 = vrcp.f32 %v6630_v26  ;;  %10082 = vmatpush3.bf16.xpose.msra.mxu1 %v7131_v61  ;;  %10089 = vmatprep.mubr.msk.bf16.mxu1 %vm10699_vm0, %v13542_v35  ;;  %v6825_v19 = vpack.c.bf16 %v6787_v57, %v6786_v6  ;;  %v6839_v26 = vpack.c.bf16 %v13549_v47, %v13549_v47 }
 0x571   :  { %10534 = vrcp.f32 %v6669_v21  ;;  %10083 = vmatprep.subr.bf16.mxu1 %v13542_v35  ;;  %v6778_v46 = vmul.f32 %v10521_v60, %v12772_v54  ;;  %v13553_v21 = vld [vmem:[#allocation19_spill] sm:$0xff]  ;;  %v13554_v60 = vld [vmem:[#allocation24_spill] sm:$0xff] }
 0x572   :  { %10072 = vmatpush3.bf16.xpose.msra.mxu0 %v7073_v16  ;;  %v6690_v28 = vpop.xlane.xlu1 %6689  ;;  %v7128_v36 = vsel %vm6185_vm4, %v6825_v19, 0  ;;  %v6840_v7 = vpack.c.bf16 %v13553_v21, %v13553_v21 }
 0x573   :  { %10073 = vmatprep.subr.bf16.mxu0 %v13542_v35  ;;  %v6820_v40 = vpack.c.bf16 %v6778_v46, %v6777_v17  ;;  %10536 = vrcp.f32 %v6690_v28  ;;  %v6684_v15 = vpop.xlane.xlu0 %6683  ;;  %v13555_v28 = vld [vmem:[#allocation20_spill] sm:$0xff]  ;;  %v13556_v17 = vld [vmem:[#allocation34_spill] sm:$0xff] }
 0x574   :  { %v10523_v58 = vpop.eup %10522 }
 0x575   :  { %v10525_v25 = vpop.eup %10524  ;;  %v6785_v33 = vmul.f32 %v10523_v58, %v12783_v37  ;;  %v7070_v54 = vsel %vm6185_vm4, %v6820_v40, 0  ;;  %v13557_v40 = vld [vmem:[#allocation26_spill] sm:$0xff] }
 0x576   :  { %v6666_v50 = vpop.xlane.xlu1 %6665  ;;  %v10527_v4 = vpop.eup %10526  ;;  %v6784_v9 = vmul.f32 %v10525_v25, %v12767_v20 }
 0x577   :  { %10538 = vrcp.f32 %v6666_v50  ;;  %v6775_v37 = vmul.f32 %v10527_v4, %v12778_v30 }
 0x578   :  { %v10529_v18 = vpop.eup %10528  ;;  %10084 = vmatpush3.bf16.xpose.msra.mxu1 %v7128_v36  ;;  %10540 = vrcp.f32 %v6663_v62  ;;  %v6824_v39 = vpack.c.bf16 %v6785_v33, %v6784_v9 }
 0x579   :  { %10085 = vmatprep.subr.bf16.mxu1 %v13542_v35  ;;  %v6776_v8 = vmul.f32 %v10529_v18, %v12793_v48  ;;  %v6657_v48 = vpop.xlane.xlu0 %6656 }
 0x57a   :  { %10074 = vmatpush3.bf16.xpose.msra.mxu0 %v7070_v54  ;;  %v6687_v23 = vpop.xlane.xlu1 %6686  ;;  %v7125_v27 = vsel %vm6185_vm4, %v6824_v39, 0 }
 0x57b   :  { %10075 = vmatprep.subr.bf16.mxu0 %v13542_v35  ;;  %v6819_v56 = vpack.c.bf16 %v6776_v8, %v6775_v37  ;;  %10542 = vrcp.f32 %v6687_v23 }
 0x57c   :  { %v10531_v5 = vpop.eup %10530  ;;  %10544 = vrcp.f32 %v6684_v15 }
 0x57d   :  { %v10533_v53 = vpop.eup %10532  ;;  %v6783_v20 = vmul.f32 %v10531_v5, %v12801_v14  ;;  %v7067_v44 = vsel %vm6185_vm4, %v6819_v56, 0 }
 0x57e   :  { %v10535_v13 = vpop.eup %10534  ;;  %v6660_v51 = vpop.xlane.xlu1 %6659  ;;  %v6782_v30 = vmul.f32 %v10533_v53, %v12787_v10 }
 0x57f   :  { %10546 = vrcp.f32 %v6660_v51  ;;  %v6795_v34 = vmul.f32 %v10535_v13, %v12797_v31  ;;  %v13551_v31 = vld [vmem:[#allocation21_spill] sm:$0xff] }
 0x580   :  { %10086 = vmatpush3.bf16.xpose.msra.mxu1 %v7125_v27  ;;  %10548 = vrcp.f32 %v6657_v48  ;;  %v6823_v11 = vpack.c.bf16 %v6783_v20, %v6782_v30  ;;  %v10537_v45 = vpop.eup %10536 }
 0x581   :  { %10087 = vmatprep.subr.bf16.mxu1 %v13542_v35  ;;  %v6830_v29 = vpack.c.bf16 %v6795_v34, %v6795_v34  ;;  %v6802_v59 = vmul.f32 %v10537_v45, %v13550_v22 }
 0x582   :  { %10076 = vmatpush3.bf16.xpose.msra.mxu0 %v7067_v44  ;;  %v7122_v55 = vsel %vm6185_vm4, %v6823_v11, 0 }
 0x583   :  { %10093 = vmatprep.subr.bf16.mxu0 %v13542_v35  ;;  %v7186_v10 = vsel %vm6185_vm4, %v6830_v29, 0  ;;  %v6834_v12 = vpack.c.bf16 %v6802_v59, %v6802_v59  ;;  %v13558_v29 = vld [vmem:[#allocation23_spill] sm:$0xff] }
 0x584   :  { %v10539_v14 = vpop.eup %10538 }
 0x585   :  { %v10541_v0 = vpop.eup %10540  ;;  %v6794_v43 = vmul.f32 %v10539_v14, %v13551_v31  ;;  %v7241_v57 = vsel %vm6185_vm4, %v6834_v12, 0 }
 0x586   :  { %v6793_v41 = vmul.f32 %v10541_v0, %v13552_v63 }
 0x588   :  { %10088 = vmatpush3.bf16.xpose.msra.mxu1 %v7122_v55  ;;  %v10543_v38 = vpop.eup %10542  ;;  %v6829_v24 = vpack.c.bf16 %v6794_v43, %v6793_v41 }
 0x589   :  { %10078 = vmatmul.mubr.msk.bf16.vlgmr.msra.gmra.mxu0 %vm6185_vm4, %v6839_v26  ;;  %10105 = vmatprep.subr.bf16.mxu1 %v13542_v35  ;;  %v10545_v2 = vpop.eup %10544  ;;  %v6801_v16 = vmul.f32 %v10543_v38, %v13554_v60 }
 0x58a   :  { %10094 = vmatpush3.bf16.xpose.msra.mxu0 %v7186_v10  ;;  %10101 = vmatprep.mubr.msk.bf16.mxu0 %vm10699_vm0, %v13542_v35  ;;  %v7183_v46 = vsel %vm6185_vm4, %v6829_v24, 0  ;;  %v6800_v19 = vmul.f32 %v10545_v2, %v13555_v28 }
 0x58b   :  { %10095 = vmatprep.subr.bf16.mxu0 %v13542_v35 }
 0x58c   :  { %v10547_v61 = vpop.eup %10546  ;;  %v6833_v62 = vpack.c.bf16 %v6801_v16, %v6800_v19 }
 0x58d   :  { %v10549_v6 = vpop.eup %10548  ;;  %v6792_v58 = vmul.f32 %v10547_v61, %v13556_v17  ;;  %v10337_v61 = vld [vmem:[%s13369_s9] sm:$0xff]  }
 0x58e   :  { %v6791_v25 = vmul.f32 %v10549_v6, %v13557_v40  ;;  %v7238_v4 = vsel %vm6185_vm4, %v6833_v62, 0 }
 0x58f   :  { %10090 = vmatmul.mubr.msk.bf16.vlgmr.msra.gmra.mxu1 %vm6185_vm4, %v6840_v7  ;;  %v10336_v7 = vld [vmem:[%s13369_s9 + $0x8] sm:$0xff]  }
 0x590   :  { %10106 = vmatpush3.bf16.xpose.msra.mxu1 %v7241_v57  ;;  %10113 = vmatprep.mubr.msk.bf16.mxu1 %vm10699_vm0, %v13542_v35  ;;  %v6828_v50 = vpack.c.bf16 %v6792_v58, %v6791_v25  ;;  %v13560_v25 = vld [vmem:[#allocation16_spill] sm:$0xff] }
 0x591   :  { %10107 = vmatprep.subr.bf16.mxu1 %v13542_v35 }
 0x592   :  { %10096 = vmatpush3.bf16.xpose.msra.mxu0 %v7183_v46  ;;  %v7180_v36 = vsel %vm6185_vm4, %v6828_v50, 0 }
 0x593   :  { %10097 = vmatprep.subr.bf16.mxu0 %v13542_v35 }
 0x598   :  { %10108 = vmatpush3.bf16.xpose.msra.mxu1 %v7238_v4 }
 0x599   :  { %10109 = vmatprep.subr.bf16.mxu1 %v13542_v35 }
 0x59a   :  { %10098 = vmatpush3.bf16.xpose.msra.mxu0 %v7180_v36 }
 0x59b   :  { %10099 = vmatprep.subr.bf16.mxu0 %v13542_v35 }
 0x5bc   :  { %v6678_v33 = vpop.xlane.xlu0 %6677 }
 0x5bd   :  { %10550 = vrcp.f32 %v6678_v33 }
 0x5c3   :  { %v6681_v18 = vpop.xlane.xlu1 %6680 }
 0x5c4   :  { %10552 = vrcp.f32 %v6681_v18 }
 0x5c8   :  { %v6651_v54 = vpop.xlane.xlu0 %6650 }
 0x5c9   :  { %10554 = vrcp.f32 %v6651_v54 }
 0x5ca   :  { %v10551_v9 = vpop.eup %10550 }
 0x5cb   :  { %v6798_v39 = vmul.f32 %v10551_v9, %v12848_v42 }
 0x5cc   :  { %v6672_v8 = vpop.xlane.xlu0 %6671 }
 0x5cf   :  { %v6654_v15 = vpop.xlane.xlu1 %6653 }
 0x5d0   :  { %10556 = vrcp.f32 %v6654_v15 }
 0x5d1   :  { %v10553_v23 = vpop.eup %10552  ;;  %10558 = vrcp.f32 %v6672_v8 }
 0x5d2   :  { %v6799_v37 = vmul.f32 %v10553_v23, %v12863_v32 }
 0x5d3   :  { %v6675_v5 = vpop.xlane.xlu1 %6674 }
 0x5d4   :  { %10560 = vrcp.f32 %v6675_v5  ;;  %v6832_v53 = vpack.c.bf16 %v6799_v37, %v6798_v39 }
 0x5d6   :  { %v7235_v56 = vsel %vm6185_vm4, %v6832_v53, 0  ;;  %v10555_v13 = vpop.eup %10554 }
 0x5d7   :  { %10110 = vmatpush3.bf16.xpose.msra.mxu1 %v7235_v56  ;;  %v6789_v27 = vmul.f32 %v10555_v13, %v12871_v1  ;;  %v6841_v1 = vpack.c.bf16 %v13558_v29, %v13558_v29 }
 0x5d8   :  { %10111 = vmatprep.subr.bf16.mxu1 %v13542_v35 }
 0x5dd   :  { %v10557_v51 = vpop.eup %10556 }
 0x5de   :  { %v6790_v20 = vmul.f32 %v10557_v51, %v12886_v49  ;;  %v10559_v48 = vpop.eup %10558  ;;  %v13559_v49 = vld [vmem:[#allocation17_spill] sm:$0xff] }
 0x5df   :  { %v6796_v32 = vmul.f32 %v10559_v48, %v12879_v52  ;;  %v6842_v52 = vpack.c.bf16 %v13559_v49, %v13559_v49 }
 0x5e0   :  { %v6827_v44 = vpack.c.bf16 %v6790_v20, %v6789_v27 }
 0x5e1   :  { %v10561_v30 = vpop.eup %10560 }
 0x5e2   :  { %v7177_v42 = vsel %vm6185_vm4, %v6827_v44, 0  ;;  %v6797_v34 = vmul.f32 %v10561_v30, %v12894_v3 }
 0x5e3   :  { %10100 = vmatpush3.bf16.xpose.msra.mxu0 %v7177_v42 }
 0x5e4   :  { %v6831_v11 = vpack.c.bf16 %v6797_v34, %v6796_v32  ;;  %10117 = vmatprep.subr.bf16.mxu0 %v13542_v35 }
 0x5e6   :  { %v7232_v45 = vsel %vm6185_vm4, %v6831_v11, 0 }
 0x5e7   :  { %10112 = vmatpush3.bf16.xpose.msra.mxu1 %v7232_v45 }
 0x5ea   :  { %10102 = vmatmul.mubr.msk.bf16.vlgmr.msra.gmra.mxu0 %vm6185_vm4, %v6841_v1 }
 0x5eb   :  { %10121 = vmatprep.mubr.msk.bf16.mxu0 %vm10699_vm0, %v13542_v35  ;;  %10118 = vmatpush3.bf16.msra.mxu0 %v10336_v7 }
 0x5ec   :  { %10119 = vmatprep.subr.bf16.mxu0 %v13542_v35 }
 0x5ee   :  { %10114 = vmatmul.mubr.msk.bf16.vlgmr.msra.gmra.mxu1 %vm6185_vm4, %v6842_v52 }
 0x5ef   :  { %10120 = vmatpush3.bf16.msra.mxu0 %v10337_v61 }
 0x609   :  { %v6892_v3 = vpop.f32.mrf.mxu0 }
 0x60b   :  { %v10031_v14 = vpop.f32.mrf.mxu0 }
 0x60d   :  { %v6895_v47 = vpop.f32.mrf.mxu0  ;;  %v6947_v26 = vpop.f32.mrf.mxu1 }
 0x60e   :  { %v7283_v55 = vpack.c.bf16 %v6947_v26, %v6892_v3 }
 0x60f   :  { %v10032_v22 = vpop.f32.mrf.mxu0  ;;  %v10043_v59 = vpop.f32.mrf.mxu1 }
 0x610   :  { %7287 = vxpose.xlu0.c.b16.start [1/2] (short) (narrow) %v7283_v55, 64 }
 0x611   :  { %v6950_v0 = vpop.f32.mrf.mxu1 }
 0x613   :  { %v10044_v10 = vpop.f32.mrf.mxu1 }
 0x629   :  { %v7002_v31 = vpop.f32.mrf.mxu0 }
 0x62b   :  { %v10055_v43 = vpop.f32.mrf.mxu0 }
 0x62d   :  { %v7005_v12 = vpop.f32.mrf.mxu0 }
 0x62f   :  { %v7057_v63 = vpop.f32.mrf.mxu1  ;;  %v10056_v41 = vpop.f32.mrf.mxu0 }
 0x630   :  { %v7284_v38 = vpack.c.bf16 %v7057_v63, %v7002_v31 }
 0x631   :  { %v10067_v2 = vpop.f32.mrf.mxu1 }
 0x632   :  { %7288 = vxpose.xlu0.c.b16.end [2/2] (short) (narrow) %v7284_v38, 64 }
 0x633   :  { %v7060_v21 = vpop.f32.mrf.mxu1 }
 0x635   :  { %v10068_v24 = vpop.f32.mrf.mxu1 }
 0x649   :  { %v7112_v57 = vpop.f32.mrf.mxu0 }
 0x64b   :  { %v10079_v60 = vpop.f32.mrf.mxu0 }
 0x64d   :  { %v7115_v16 = vpop.f32.mrf.mxu0 }
 0x64f   :  { %v7167_v6 = vpop.f32.mrf.mxu1  ;;  %v10080_v46 = vpop.f32.mrf.mxu0 }
 0x650   :  { %v7285_v28 = vpack.c.bf16 %v7167_v6, %v7112_v57 }
 0x651   :  { %v10091_v19 = vpop.f32.mrf.mxu1 }
 0x652   :  { %7303 = vxpose.xlu1.c.b16.start [1/2] (short) (narrow) %v7285_v28, 64 }
 0x653   :  { %v7170_v17 = vpop.f32.mrf.mxu1 }
 0x655   :  { %v10092_v58 = vpop.f32.mrf.mxu1 }
 0x690   :  { %v7295_v62 = vpop.trf.xlu0 }
 0x691   :  { %v7327_v40 = vcombine.high %v7295_v62, %v7295_v62  ;;  %v7334_v50 = vrot.slane %v7295_v62, %v13560_v25 }
 0x693   :  { %v7341_v4 = vrot.slane %v7327_v40, %v13560_v25  ;;  %v7342_v36 = vcombine.high %v7334_v50, %v7334_v50  ;;  %v7350_v33 = vrot.slane %v7334_v50, %v13560_v25 }
 0x694   :  { %v7296_v18 = vpop.trf.xlu0 }
 0x695   :  { %v7343_v54 = vcombine.high %v7341_v4, %v7341_v4  ;;  %v7357_v9 = vrot.slane %v7341_v4, %v13560_v25  ;;  %v7364_v8 = vrot.slane %v7342_v36, %v13560_v25  ;;  %v7376_v15 = vcombine.high %v7296_v18, %v7296_v18 }
 0x696   :  { %v7383_v23 = vrot.slane %v7296_v18, %v13560_v25 }
 0x697   :  { %v7371_v39 = vrot.slane %v7343_v54, %v13560_v25  ;;  %v7807_v37 = vcombine.low %v7350_v33, %v7364_v8  ;;  %v9743_v5 = vcombine.high %v7350_v33, %v7364_v8  ;;  %v7390_v53 = vrot.slane %v7376_v15, %v13560_v25 }
 0x698   :  { %v7391_v56 = vcombine.high %v7383_v23, %v7383_v23  ;;  %v7399_v13 = vrot.slane %v7383_v23, %v13560_v25  ;;  %v7297_v51 = vpop.trf.xlu0 }
 0x699   :  { %v7809_v27 = vcombine.low %v7357_v9, %v7371_v39  ;;  %v9744_v20 = vcombine.high %v7357_v9, %v7371_v39  ;;  %v7817_v48 = vrot.slane %v7807_v37, %v13560_v25  ;;  %v7824_v44 = vrot.slane %v9743_v5, %v13560_v25 }
 0x69a   :  { %v7392_v30 = vcombine.high %v7390_v53, %v7390_v53  ;;  %v7406_v42 = vrot.slane %v7390_v53, %v13560_v25  ;;  %v7413_v32 = vrot.slane %v7391_v56, %v13560_v25  ;;  %v7425_v34 = vcombine.high %v7297_v51, %v7297_v51 }
 0x69b   :  { %v7831_v11 = vrot.slane %v7809_v27, %v13560_v25  ;;  %v7838_v45 = vrot.slane %v9744_v20, %v13560_v25  ;;  %v7839_v29 = vcombine.low %v7817_v48, %v7824_v44  ;;  %v7432_v1 = vrot.slane %v7297_v51, %v13560_v25 }
 0x69c   :  { %v7420_v49 = vrot.slane %v7392_v30, %v13560_v25  ;;  %v7856_v52 = vcombine.low %v7399_v13, %v7413_v32  ;;  %v9745_v3 = vcombine.high %v7399_v13, %v7413_v32  ;;  %v7439_v14 = vrot.slane %v7425_v34, %v13560_v25  ;;  %v7298_v56 = vpop.trf.xlu0 }
 0x69d   :  { %v7840_v47 = vcombine.low %v7831_v11, %v7838_v45  ;;  %v7847_v26 = vrot.slane %v7839_v29, %v13560_v25  ;;  %v7440_v55 = vcombine.high %v7432_v1, %v7432_v1  ;;  %v7448_v22 = vrot.slane %v7432_v1, %v13560_v25 }
 0x69e   :  { %v7858_v59 = vcombine.low %v7406_v42, %v7420_v49  ;;  %v9746_v0 = vcombine.high %v7406_v42, %v7420_v49  ;;  %v7866_v10 = vrot.slane %v7856_v52, %v13560_v25  ;;  %v7873_v31 = vrot.slane %v9745_v3, %v13560_v25 }
 0x69f   :  { %v7854_v43 = vrot.slane %v7840_v47, %v13560_v25  ;;  %v7441_v12 = vcombine.high %v7439_v14, %v7439_v14  ;;  %v7455_v63 = vrot.slane %v7439_v14, %v13560_v25  ;;  %v7462_v41 = vrot.slane %v7440_v55, %v13560_v25 }
 0x6a0   :  { %v7880_v38 = vrot.slane %v7858_v59, %v13560_v25  ;;  %v7887_v2 = vrot.slane %v9746_v0, %v13560_v25  ;;  %v7888_v21 = vcombine.low %v7866_v10, %v7873_v31  ;;  %v7480_v20 = vrot.slane %v7298_v56, %v13560_v25 }
 0x6a1   :  { %v7469_v7 = vrot.slane %v7441_v12, %v13560_v25  ;;  %v7905_v24 = vcombine.low %v7448_v22, %v7462_v41  ;;  %v9747_v61 = vcombine.high %v7448_v22, %v7462_v41  ;;  %v7855_v57 = vcombine.low %v7847_v26, %v7854_v43 }
 0x6a2   :  { %v7889_v60 = vcombine.low %v7880_v38, %v7887_v2  ;;  %v7896_v16 = vrot.slane %v7888_v21, %v13560_v25  ;;  %v7487_v29 = vrot.slane %v7480_v20, %v13560_v25 }
 0x6a3   :  { %v7907_v6 = vcombine.low %v7455_v63, %v7469_v7  ;;  %v9748_v46 = vcombine.high %v7455_v63, %v7469_v7  ;;  %v7915_v28 = vrot.slane %v7905_v24, %v13560_v25  ;;  %v7922_v19 = vrot.slane %v9747_v61, %v13560_v25  ;;  %10122 = vmatmul.mubr.msk.bf16.vlgmr.msra.gmra.mxu0 %vm1756_vm1, %v7855_v57 }
 0x6a4   :  { %10125 = vmatprep.mubr.msk.bf16.mxu0 %vm10699_vm0, %v13542_v35  ;;  %v7903_v17 = vrot.slane %v7889_v60, %v13560_v25 }
 0x6a5   :  { %v7929_v58 = vrot.slane %v7907_v6, %v13560_v25  ;;  %v7936_v62 = vrot.slane %v9748_v46, %v13560_v25  ;;  %v7937_v40 = vcombine.low %v7915_v28, %v7922_v19 }
 0x6a6   :  { %v7904_v50 = vcombine.low %v7896_v16, %v7903_v17 }
 0x6a7   :  { %v7938_v4 = vcombine.low %v7929_v58, %v7936_v62  ;;  %v7945_v33 = vrot.slane %v7937_v40, %v13560_v25 }
 0x6a9   :  { %v7952_v18 = vrot.slane %v7938_v4, %v13560_v25 }
 0x6aa   :  { %v7222_v36 = vpop.f32.mrf.mxu0 }
 0x6ab   :  { %10126 = vmatmul.mubr.msk.bf16.gmra.mxu0 %vm1756_vm1, %v7904_v50  ;;  %v7953_v23 = vcombine.low %v7945_v33, %v7952_v18 }
 0x6ac   :  { %v10103_v54 = vpop.f32.mrf.mxu0  ;;  %10129 = vmatprep.mubr.msk.bf16.mxu0 %vm10699_vm0, %v13542_v35 }
 0x6ae   :  { %v7225_v9 = vpop.f32.mrf.mxu0  ;;  %v7277_v8 = vpop.f32.mrf.mxu1 }
 0x6af   :  { %v7286_v15 = vpack.c.bf16 %v7277_v8, %v7222_v36 }
 0x6b0   :  { %v10104_v39 = vpop.f32.mrf.mxu0  ;;  %v10115_v37 = vpop.f32.mrf.mxu1 }
 0x6b1   :  { %7304 = vxpose.xlu1.c.b16.end [2/2] (short) (narrow) %v7286_v15, 64 }
 0x6b2   :  { %v7280_v5 = vpop.f32.mrf.mxu1 }
 0x6b3   :  { %10130 = vmatmul.mubr.msk.bf16.gmra.mxu0 %vm1756_vm1, %v7953_v23 }
 0x6b4   :  { %v10116_v53 = vpop.f32.mrf.mxu1  ;;  %10133 = vmatprep.mubr.msk.bf16.mxu0 %vm10699_vm0, %v13542_v35 }
 0x70f   :  { %v7311_v13 = vpop.trf.xlu1 }
 0x710   :  { %v7488_v51 = vcombine.high %v7311_v13, %v7311_v13  ;;  %v7495_v27 = vrot.slane %v7311_v13, %v13560_v25 }
 0x712   :  { %v7502_v48 = vrot.slane %v7488_v51, %v13560_v25  ;;  %v7503_v44 = vcombine.high %v7495_v27, %v7495_v27  ;;  %v7511_v30 = vrot.slane %v7495_v27, %v13560_v25 }
 0x713   :  { %v7312_v42 = vpop.trf.xlu1 }
 0x714   :  { %v7504_v32 = vcombine.high %v7502_v48, %v7502_v48  ;;  %v7518_v34 = vrot.slane %v7502_v48, %v13560_v25  ;;  %v7525_v11 = vrot.slane %v7503_v44, %v13560_v25  ;;  %v7533_v45 = vcombine.high %v7511_v30, %v7511_v30 }
 0x715   :  { %v7699_v1 = vunpack.i.h.s16 %v7511_v30  ;;  %v7537_v49 = vcombine.high %v7312_v42, %v7312_v42  ;;  %v7544_v52 = vrot.slane %v7312_v42, %v13560_v25  ;;  %v9718_v63 = vpack.i.b16 %v7511_v30, %v7487_v29 }
 0x716   :  { %v7532_v3 = vrot.slane %v7504_v32, %v13560_v25  ;;  %v7534_v14 = vcombine.high %v7518_v34, %v7518_v34  ;;  %v7535_v47 = vcombine.high %v7525_v11, %v7525_v11  ;;  %v7701_v26 = vunpack.i.h.s16 %v7525_v11 }
 0x717   :  { %v7703_v55 = vunpack.i.h.s16 %v7533_v45  ;;  %v7707_v22 = vunpack.i.h.s16 %v7518_v34  ;;  %v9719_v59 = vpack.i.b16 %v7525_v11, %v7699_v1  ;;  %v7551_v0 = vrot.slane %v7537_v49, %v13560_v25  ;;  %v7313_v24 = vpop.trf.xlu1 }
 0x718   :  { %v7705_v10 = vunpack.i.h.s16 %v7535_v47  ;;  %v7709_v31 = vunpack.i.h.s16 %v7532_v3  ;;  %v9720_v43 = vpack.i.b16 %v7533_v45, %v7701_v26  ;;  %v7711_v12 = vunpack.i.h.s16 %v7534_v14 }
 0x719   :  { %v9721_v41 = vpack.i.b16 %v7535_v47, %v7703_v55  ;;  %v7536_v38 = vcombine.high %v7532_v3, %v7532_v3  ;;  %v9723_v2 = vpack.i.b16 %v7532_v3, %v7707_v22  ;;  %v7552_v21 = vcombine.high %v7544_v52, %v7544_v52 }
 0x71a   :  { %v7553_v7 = vcombine.high %v7551_v0, %v7551_v0  ;;  %v9722_v61 = vpack.i.b16 %v7518_v34, %v7705_v10  ;;  %v9724_v57 = vpack.i.b16 %v7534_v14, %v7709_v31  ;;  %v7954_v60 = vcombine.low %v9718_v63, %v9719_v59 }
 0x71b   :  { %v7713_v16 = vunpack.i.h.s16 %v7536_v38  ;;  %v7955_v6 = vcombine.low %v9720_v43, %v9721_v41  ;;  %v7560_v46 = vrot.slane %v7544_v52, %v13560_v25  ;;  %v7567_v28 = vrot.slane %v7551_v0, %v13560_v25 }
 0x71c   :  { %v7574_v19 = vrot.slane %v7552_v21, %v13560_v25  ;;  %v9725_v17 = vpack.i.b16 %v7536_v38, %v7711_v12  ;;  %v7581_v58 = vrot.slane %v7553_v7, %v13560_v25  ;;  %v7586_v62 = vcombine.high %v7313_v24, %v7313_v24 }
 0x71d   :  { %v7593_v40 = vrot.slane %v7313_v24, %v13560_v25  ;;  %v7582_v50 = vcombine.high %v7560_v46, %v7560_v46  ;;  %v7583_v4 = vcombine.high %v7567_v28, %v7567_v28  ;;  %v7715_v33 = vunpack.i.h.s16 %v7560_v46 }
 0x71e   :  { %v7584_v36 = vcombine.high %v7574_v19, %v7574_v19  ;;  %v7717_v18 = vunpack.i.h.s16 %v7574_v19  ;;  %v7723_v54 = vunpack.i.h.s16 %v7567_v28  ;;  %v7725_v9 = vunpack.i.h.s16 %v7581_v58 }
 0x71f   :  { %v9726_v8 = vpack.i.b16 %v7560_v46, %v7713_v16  ;;  %v7719_v15 = vunpack.i.h.s16 %v7582_v50  ;;  %v7727_v39 = vunpack.i.h.s16 %v7583_v4  ;;  %v9727_v37 = vpack.i.b16 %v7574_v19, %v7715_v33 }
 0x720   :  { %v7721_v23 = vunpack.i.h.s16 %v7584_v36  ;;  %v7956_v5 = vcombine.low %v9722_v61, %v9723_v2  ;;  %v7964_v53 = vrot.slane %v7954_v60, %v13560_v25  ;;  %v7585_v56 = vcombine.high %v7581_v58, %v7581_v58 }
 0x721   :  { %v7957_v13 = vcombine.low %v9724_v57, %v9725_v17  ;;  %v9728_v51 = vpack.i.b16 %v7582_v50, %v7717_v18  ;;  %v9729_v27 = vpack.i.b16 %v7584_v36, %v7719_v15  ;;  %v9731_v20 = vpack.i.b16 %v7581_v58, %v7723_v54 }
 0x722   :  { %v7600_v48 = vrot.slane %v7586_v62, %v13560_v25  ;;  %v9730_v44 = vpack.i.b16 %v7567_v28, %v7721_v23  ;;  %v9732_v30 = vpack.i.b16 %v7583_v4, %v7725_v9  ;;  %v7601_v42 = vcombine.high %v7593_v40, %v7593_v40 }
 0x723   :  { %v7609_v32 = vrot.slane %v7593_v40, %v13560_v25  ;;  %v8003_v34 = vcombine.low %v9726_v8, %v9727_v37  ;;  %v7729_v11 = vunpack.i.h.s16 %v7585_v56  ;;  %v9733_v45 = vpack.i.b16 %v7585_v56, %v7727_v39  ;;  %v7314_v56 = vpop.trf.xlu1 }
 0x724   :  { %v7602_v29 = vcombine.high %v7600_v48, %v7600_v48  ;;  %v7616_v1 = vrot.slane %v7600_v48, %v13560_v25  ;;  %v7623_v49 = vrot.slane %v7601_v42, %v13560_v25  ;;  %v8004_v14 = vcombine.low %v9728_v51, %v9729_v27 }
 0x725   :  { %v7631_v52 = vcombine.high %v7609_v32, %v7609_v32  ;;  %v7731_v3 = vunpack.i.h.s16 %v7609_v32  ;;  %v7971_v26 = vrot.slane %v7955_v6, %v13560_v25  ;;  %v7978_v55 = vrot.slane %v7956_v5, %v13560_v25 }
 0x726   :  { %v7630_v47 = vrot.slane %v7602_v29, %v13560_v25  ;;  %v7632_v22 = vcombine.high %v7616_v1, %v7616_v1  ;;  %v7633_v59 = vcombine.high %v7623_v49, %v7623_v49  ;;  %v7733_v0 = vunpack.i.h.s16 %v7623_v49 }
 0x727   :  { %v7735_v10 = vunpack.i.h.s16 %v7631_v52  ;;  %v8005_v31 = vcombine.low %v9730_v44, %v9731_v20  ;;  %v7739_v43 = vunpack.i.h.s16 %v7616_v1  ;;  %v7985_v63 = vrot.slane %v7957_v13, %v13560_v25 }
 0x728   :  { %v7741_v12 = vunpack.i.h.s16 %v7630_v47  ;;  %v7737_v41 = vunpack.i.h.s16 %v7633_v59  ;;  %v7743_v38 = vunpack.i.h.s16 %v7632_v22  ;;  %v9734_v2 = vpack.i.b16 %v7609_v32, %v7729_v11 }
 0x729   :  { %v9735_v21 = vpack.i.b16 %v7623_v49, %v7731_v3  ;;  %v9736_v7 = vpack.i.b16 %v7631_v52, %v7733_v0  ;;  %v9737_v24 = vpack.i.b16 %v7633_v59, %v7735_v10  ;;  %v9739_v61 = vpack.i.b16 %v7630_v47, %v7739_v43 }
 0x72a   :  { %v7986_v57 = vcombine.low %v7964_v53, %v7971_v26  ;;  %v9738_v60 = vpack.i.b16 %v7616_v1, %v7737_v41  ;;  %v9740_v16 = vpack.i.b16 %v7632_v22, %v7741_v12  ;;  %v7987_v6 = vcombine.low %v7978_v55, %v7985_v63  ;;  %v13129_v1 = vld [vmem:[%s13370_s10] ss:$0 sm:$0xff]  ;;  %s10701_s10 = smov [#allocation11]  }
 0x72b   :  { %v7634_v46 = vcombine.high %v7630_v47, %v7630_v47  ;;  %v8006_v28 = vcombine.low %v9732_v30, %v9733_v45  ;;  %v8013_v19 = vrot.slane %v8003_v34, %v13560_v25  ;;  %v8052_v40 = vcombine.low %v9734_v2, %v9735_v21  ;;  %s9566_s30 = sshll.u32 %s10701_s10, 4  ;;  %s9567_s30 = int_to_ptr.vmem [resolvable:$true] %s9566_s30 }
 0x72c   :  { %v7994_v17 = vrot.slane %v7986_v57, %v13560_v25  ;;  %v8001_v58 = vrot.slane %v7987_v6, %v13560_v25  ;;  %v8020_v50 = vrot.slane %v8004_v14, %v13560_v25  ;;  %v8027_v4 = vrot.slane %v8005_v31, %v13560_v25  ;;  %s10662_s12 = scalar_lea.vmem %s9567_s30, 1024  ;;  %p10667_p12 = scmp.lt.s32.totalorder %s9567_s30, %s9567_s30 }
 0x72d   :  { %v9741_v62 = vpack.i.b16 %v7634_v46, %v7743_v38  ;;  %v8034_v36 = vrot.slane %v8006_v28, %v13560_v25  ;;  %v8053_v33 = vcombine.low %v9736_v7, %v9737_v24  ;;  %v8054_v18 = vcombine.low %v9738_v60, %v9739_v61  ;;  %p10663_p11 = scmp.ne.s32.totalorder %s9567_s30, %s10662_s12  ;;  %p10668_p13 = scmp.lt.s32.totalorder %s10662_s12, %s10662_s12 }
 0x72e   :  { %v8002_v54 = vcombine.low %v7994_v17, %v8001_v58  ;;  %v8035_v15 = vcombine.low %v8013_v19, %v8020_v50  ;;  %v8062_v23 = vrot.slane %v8052_v40, %v13560_v25  ;;  %v7641_v51 = vrot.slane %v7314_v56, %v13560_v25 }
 0x72f   :  { %v8055_v9 = vcombine.low %v9740_v16, %v9741_v62  ;;  %v8036_v8 = vcombine.low %v8027_v4, %v8034_v36  ;;  %v8069_v37 = vrot.slane %v8053_v33, %v13560_v25  ;;  %v8076_v5 = vrot.slane %v8054_v18, %v13560_v25  ;;  %p10669_p0 = por %p10668_p13, %p10667_p12 }
 0x730   :  { %10134 = vmatmul.mubr.msk.bf16.gmra.mxu0 %vm1756_vm1, %v8002_v54  ;;  %v8043_v13 = vrot.slane %v8035_v15, %v13560_v25  ;;  %v7745_v44 = vunpack.i.h.s16 %v7634_v46  ;;  %v7648_v30 = vrot.slane %v7641_v51, %v13560_v25 }
 0x731   :  { %10137 = vmatprep.mubr.msk.bf16.mxu0 %vm10699_vm0, %v13542_v35  ;;  %v8050_v39 = vrot.slane %v8036_v8, %v13560_v25  ;;  %v8083_v53 = vrot.slane %v8055_v9, %v13560_v25  ;;  %v8084_v20 = vcombine.low %v8062_v23, %v8069_v37  ;;  %p10670_p1 = pnand %p10669_p0, %p10663_p11 }
 0x732   :  { %v9742_v34 = vpack.i.b16 %v7648_v30, %v7745_v44 }
 0x733   :  { %v8051_v27 = vcombine.low %v8043_v13, %v8050_v39  ;;  %v8085_v48 = vcombine.low %v8076_v5, %v8083_v53  ;;  %v8092_v42 = vrot.slane %v8084_v20, %v13560_v25 }
 0x734   :  { %v8107_v45 = vrot.slane %v9742_v34, %v13560_v25 }
 0x735   :  { %v8099_v32 = vrot.slane %v8085_v48, %v13560_v25 }
 0x736   :  { %v8114_v29 = vrot.slane %v8107_v45, %v13560_v25 }
 0x737   :  { %v8100_v11 = vcombine.low %v8092_v42, %v8099_v32 }
 0x738   :  { %10138 = vmatmul.mubr.msk.bf16.gmra.mxu0 %vm1756_vm1, %v8051_v27 }
 0x739   :  { %10141 = vmatprep.mubr.msk.bf16.mxu0 %vm10699_vm0, %v13542_v35 }
 0x740   :  { %10142 = vmatmul.mubr.msk.bf16.gmra.mxu0 %vm1756_vm1, %v8100_v11 }
 0x741   :  { %10145 = vmatprep.mubr.msk.bf16.mxu0 %vm10699_vm0, %v13542_v35 }
 0x748   :  { %10146 = vmatmul.mubr.msk.bf16.gmra.mxu0 %vm1756_vm1, %v8114_v29 }
 0x763   :  { %v8182_v49 = vpop.f32.mrf.mxu0 }
 0x764   :  { %v8183_v52 = vadd.f32 %v13129_v1, %v8182_v49 }
 0x765   :  { %v10123_v3 = vpop.f32.mrf.mxu0 }
 0x766   :  { %v8249_v14 = vcombine.high %v8183_v52, %v8183_v52  ;;  %v8256_v47 = vrot.slane %v8183_v52, %v13560_v25 }
 0x767   :  { %v8185_v26 = vpop.f32.mrf.mxu0 }
 0x768   :  { %v8263_v35 = vrot.slane %v8249_v14, %v13560_v25  ;;  %v8264_v55 = vcombine.high %v8256_v47, %v8256_v47  ;;  %v8272_v22 = vrot.slane %v8256_v47, %v13560_v25  ;;  %v8186_v59 = vadd.f32 %v13129_v1, %v8185_v26 }
 0x769   :  { %v10124_v0 = vpop.f32.mrf.mxu0 }
 0x76a   :  { %v8265_v10 = vcombine.high %v8263_v35, %v8263_v35  ;;  %v8279_v31 = vrot.slane %v8263_v35, %v13560_v25  ;;  %v8286_v43 = vrot.slane %v8264_v55, %v13560_v25  ;;  %v8298_v12 = vcombine.high %v8186_v59, %v8186_v59 }
 0x76b   :  { %v8305_v63 = vrot.slane %v8186_v59, %v13560_v25  ;;  %v8190_v41 = vpop.f32.mrf.mxu0 }
 0x76c   :  { %v8293_v38 = vrot.slane %v8265_v10, %v13560_v25  ;;  %v8859_v2 = vcombine.low %v8272_v22, %v8286_v43  ;;  %v9758_v21 = vcombine.high %v8272_v22, %v8286_v43  ;;  %v8312_v7 = vrot.slane %v8298_v12, %v13560_v25 }
 0x76d   :  { %v8313_v24 = vcombine.high %v8305_v63, %v8305_v63  ;;  %v8321_v61 = vrot.slane %v8305_v63, %v13560_v25  ;;  %v8191_v57 = vadd.f32 %v13129_v1, %v8190_v41  ;;  %v10127_v60 = vpop.f32.mrf.mxu0 }
 0x76e   :  { %v8861_v16 = vcombine.low %v8279_v31, %v8293_v38  ;;  %v9759_v6 = vcombine.high %v8279_v31, %v8293_v38  ;;  %v8869_v46 = vrot.slane %v8859_v2, %v13560_v25  ;;  %v8876_v28 = vrot.slane %v9758_v21, %v13560_v25 }
 0x76f   :  { %v8314_v19 = vcombine.high %v8312_v7, %v8312_v7  ;;  %v8328_v17 = vrot.slane %v8312_v7, %v13560_v25  ;;  %v8335_v58 = vrot.slane %v8313_v24, %v13560_v25  ;;  %v8347_v62 = vcombine.high %v8191_v57, %v8191_v57  ;;  %v8193_v40 = vpop.f32.mrf.mxu0 }
 0x770   :  { %v8883_v50 = vrot.slane %v8861_v16, %v13560_v25  ;;  %v8890_v4 = vrot.slane %v9759_v6, %v13560_v25  ;;  %v8891_v36 = vcombine.low %v8869_v46, %v8876_v28  ;;  %v8354_v33 = vrot.slane %v8191_v57, %v13560_v25 }
 0x771   :  { %v8342_v18 = vrot.slane %v8314_v19, %v13560_v25  ;;  %v8908_v54 = vcombine.low %v8321_v61, %v8335_v58  ;;  %v9760_v9 = vcombine.high %v8321_v61, %v8335_v58  ;;  %v8361_v8 = vrot.slane %v8347_v62, %v13560_v25  ;;  %v10128_v15 = vpop.f32.mrf.mxu0 }
 0x772   :  { %v8362_v23 = vcombine.high %v8354_v33, %v8354_v33  ;;  %v8370_v39 = vrot.slane %v8354_v33, %v13560_v25  ;;  %v8194_v37 = vadd.f32 %v13129_v1, %v8193_v40  ;;  %v8892_v5 = vcombine.low %v8883_v50, %v8890_v4 }
 0x773   :  { %v8910_v53 = vcombine.low %v8328_v17, %v8342_v18  ;;  %v9761_v56 = vcombine.high %v8328_v17, %v8342_v18  ;;  %v13155_v13 = vrot.slane %v8908_v54, %v13560_v25  ;;  %v13158_v51 = vrot.slane %v9760_v9, %v13560_v25  ;;  %v8198_v27 = vpop.f32.mrf.mxu0 }
 0x774   :  { %v8363_v20 = vcombine.high %v8361_v8, %v8361_v8  ;;  %v8377_v48 = vrot.slane %v8361_v8, %v13560_v25  ;;  %v8384_v44 = vrot.slane %v8362_v23, %v13560_v25  ;;  %v8396_v30 = vcombine.high %v8194_v37, %v8194_v37 }
 0x775   :  { %v13163_v42 = vrot.slane %v8910_v53, %v13560_v25  ;;  %v13166_v32 = vrot.slane %v9761_v56, %v13560_v25  ;;  %v8940_v34 = vcombine.low %v13155_v13, %v13158_v51  ;;  %v8403_v11 = vrot.slane %v8194_v37, %v13560_v25  ;;  %v10131_v45 = vpop.f32.mrf.mxu0 }
 0x776   :  { %v8391_v29 = vrot.slane %v8363_v20, %v13560_v25  ;;  %v8957_v49 = vcombine.low %v8370_v39, %v8384_v44  ;;  %v9762_v52 = vcombine.high %v8370_v39, %v8384_v44  ;;  %v8410_v3 = vrot.slane %v8396_v30, %v13560_v25 }
 0x777   :  { %v8411_v14 = vcombine.high %v8403_v11, %v8403_v11  ;;  %v8419_v47 = vrot.slane %v8403_v11, %v13560_v25  ;;  %v8199_v26 = vadd.f32 %v13129_v1, %v8198_v27  ;;  %v8201_v35 = vpop.f32.mrf.mxu0  ;;  %v8899_v55 = vrot.slane %v8891_v36, %v13560_v25 }
 0x778   :  { %v8959_v22 = vcombine.low %v8377_v48, %v8391_v29  ;;  %v9763_v59 = vcombine.high %v8377_v48, %v8391_v29  ;;  %v8967_v0 = vrot.slane %v8957_v49, %v13560_v25  ;;  %v8974_v10 = vrot.slane %v9762_v52, %v13560_v25 }
 0x779   :  { %v8412_v31 = vcombine.high %v8410_v3, %v8410_v3  ;;  %v8426_v43 = vrot.slane %v8410_v3, %v13560_v25  ;;  %v8433_v12 = vrot.slane %v8411_v14, %v13560_v25  ;;  %v8445_v63 = vcombine.high %v8199_v26, %v8199_v26  ;;  %v10132_v41 = vpop.f32.mrf.mxu0 }
 0x77a   :  { %v8981_v38 = vrot.slane %v8959_v22, %v13560_v25  ;;  %v8988_v2 = vrot.slane %v9763_v59, %v13560_v25  ;;  %v8989_v21 = vcombine.low %v8967_v0, %v8974_v10  ;;  %v8452_v7 = vrot.slane %v8199_v26, %v13560_v25 }
 0x77b   :  { %v8440_v24 = vrot.slane %v8412_v31, %v13560_v25  ;;  %v9006_v61 = vcombine.low %v8419_v47, %v8433_v12  ;;  %v9764_v57 = vcombine.high %v8419_v47, %v8433_v12  ;;  %v8459_v60 = vrot.slane %v8445_v63, %v13560_v25 }
 0x77c   :  { %v8460_v16 = vcombine.high %v8452_v7, %v8452_v7  ;;  %v8468_v6 = vrot.slane %v8452_v7, %v13560_v25  ;;  %v8202_v46 = vadd.f32 %v13129_v1, %v8201_v35  ;;  %v8906_v28 = vrot.slane %v8892_v5, %v13560_v25 }
 0x77d   :  { %v9008_v19 = vcombine.low %v8426_v43, %v8440_v24  ;;  %v9765_v17 = vcombine.high %v8426_v43, %v8440_v24  ;;  %v9016_v58 = vrot.slane %v9006_v61, %v13560_v25  ;;  %v9023_v62 = vrot.slane %v9764_v57, %v13560_v25 }
 0x77e   :  { %v8461_v40 = vcombine.high %v8459_v60, %v8459_v60  ;;  %v8475_v50 = vrot.slane %v8459_v60, %v13560_v25  ;;  %v8482_v4 = vrot.slane %v8460_v16, %v13560_v25  ;;  %v8494_v36 = vcombine.high %v8202_v46, %v8202_v46 }
 0x77f   :  { %v9030_v33 = vrot.slane %v9008_v19, %v13560_v25  ;;  %v9037_v18 = vrot.slane %v9765_v17, %v13560_v25  ;;  %v9038_v54 = vcombine.low %v9016_v58, %v9023_v62  ;;  %v8501_v9 = vrot.slane %v8202_v46, %v13560_v25 }
 0x780   :  { %v8489_v8 = vrot.slane %v8461_v40, %v13560_v25  ;;  %v9055_v15 = vcombine.low %v8468_v6, %v8482_v4  ;;  %v9766_v23 = vcombine.high %v8468_v6, %v8482_v4  ;;  %v8508_v39 = vrot.slane %v8494_v36, %v13560_v25 }
 0x781   :  { %v8509_v37 = vcombine.high %v8501_v9, %v8501_v9  ;;  %v8517_v5 = vrot.slane %v8501_v9, %v13560_v25  ;;  %v8907_v53 = vcombine.low %v8899_v55, %v8906_v28  ;;  %v8941_v56 = vcombine.low %v13163_v42, %v13166_v32 }
 0x782   :  { %v9057_v13 = vcombine.low %v8475_v50, %v8489_v8  ;;  %v9767_v51 = vcombine.high %v8475_v50, %v8489_v8  ;;  %v9065_v27 = vrot.slane %v9055_v15, %v13560_v25  ;;  %v9072_v20 = vrot.slane %v9766_v23, %v13560_v25 }
 0x783   :  { %v8510_v48 = vcombine.high %v8508_v39, %v8508_v39  ;;  %v8524_v44 = vrot.slane %v8508_v39, %v13560_v25  ;;  %v8531_v30 = vrot.slane %v8509_v37, %v13560_v25  ;;  %9489 = vxpose.xlu0.b32.start [1/7] (short) (narrow) %v8907_v53, 32  ;;  %v8948_v11 = vrot.slane %v8940_v34, %v13560_v25 }
 0x784   :  { %v9079_v45 = vrot.slane %v9057_v13, %v13560_v25  ;;  %v9086_v29 = vrot.slane %v9767_v51, %v13560_v25  ;;  %v8955_v42 = vrot.slane %v8941_v56, %v13560_v25  ;;  %v8990_v3 = vcombine.low %v8981_v38, %v8988_v2 }
 0x785   :  { %v8538_v32 = vrot.slane %v8510_v48, %v13560_v25  ;;  %v9104_v49 = vcombine.low %v8517_v5, %v8531_v30  ;;  %v9768_v52 = vcombine.high %v8517_v5, %v8531_v30  ;;  %v9087_v14 = vcombine.low %v9065_v27, %v9072_v20 }
 0x786   :  { %v8956_v47 = vcombine.low %v8948_v11, %v8955_v42  ;;  %v8997_v26 = vrot.slane %v8989_v21, %v13560_v25  ;;  %v9039_v35 = vcombine.low %v9030_v33, %v9037_v18  ;;  %v9046_v59 = vrot.slane %v9038_v54, %v13560_v25 }
 0x787   :  { %v9106_v55 = vcombine.low %v8524_v44, %v8538_v32  ;;  %v9769_v22 = vcombine.high %v8524_v44, %v8538_v32  ;;  %v9114_v34 = vrot.slane %v9104_v49, %v13560_v25  ;;  %v9121_v0 = vrot.slane %v9768_v52, %v13560_v25 }
 0x788   :  { %9490 = vxpose.xlu0.b32.cont [2/7] (short) (narrow) %v8956_v47, 32  ;;  %v9004_v10 = vrot.slane %v8990_v3, %v13560_v25  ;;  %v9053_v31 = vrot.slane %v9039_v35, %v13560_v25  ;;  %v9088_v43 = vcombine.low %v9079_v45, %v9086_v29  ;;  %v9095_v38 = vrot.slane %v9087_v14, %v13560_v25 }
 0x789   :  { %v9128_v12 = vrot.slane %v9106_v55, %v13560_v25  ;;  %v9135_v63 = vrot.slane %v9769_v22, %v13560_v25  ;;  %v9136_v2 = vcombine.low %v9114_v34, %v9121_v0 }
 0x78a   :  { %v9005_v41 = vcombine.low %v8997_v26, %v9004_v10  ;;  %v9054_v21 = vcombine.low %v9046_v59, %v9053_v31  ;;  %v9102_v7 = vrot.slane %v9088_v43, %v13560_v25 }
 0x78b   :  { %v9137_v24 = vcombine.low %v9128_v12, %v9135_v63  ;;  %v9144_v57 = vrot.slane %v9136_v2, %v13560_v25 }
 0x78c   :  { %9491 = vxpose.xlu0.b32.cont [3/7] (short) (narrow) %v9005_v41, 32  ;;  %v9103_v61 = vcombine.low %v9095_v38, %v9102_v7 }
 0x78d   :  { %v9151_v60 = vrot.slane %v9137_v24, %v13560_v25 }
 0x78f   :  { %v9152_v16 = vcombine.low %v9144_v57, %v9151_v60 }
 0x790   :  { %9492 = vxpose.xlu0.b32.cont [4/7] (short) (narrow) %v9054_v21, 32 }
 0x794   :  { %9493 = vxpose.xlu0.b32.cont [5/7] (short) (narrow) %v9103_v61, 32 }
 0x798   :  { %9494 = vxpose.xlu0.b32.cont [6/7] (short) (narrow) %v9152_v16, 32 }
 0x7f0   :  { %v8206_v6 = vpop.f32.mrf.mxu0 }
 0x7f1   :  { %v8207_v46 = vadd.f32 %v13129_v1, %v8206_v6 }
 0x7f2   :  { %v10135_v28 = vpop.f32.mrf.mxu0 }
 0x7f3   :  { %v8543_v19 = vcombine.high %v8207_v46, %v8207_v46  ;;  %v8550_v17 = vrot.slane %v8207_v46, %v13560_v25 }
 0x7f4   :  { %v8209_v58 = vpop.f32.mrf.mxu0 }
 0x7f5   :  { %v8557_v62 = vrot.slane %v8543_v19, %v13560_v25  ;;  %v8558_v40 = vcombine.high %v8550_v17, %v8550_v17  ;;  %v8566_v50 = vrot.slane %v8550_v17, %v13560_v25  ;;  %v8210_v4 = vadd.f32 %v13129_v1, %v8209_v58 }
 0x7f6   :  { %v10136_v36 = vpop.f32.mrf.mxu0 }
 0x7f7   :  { %v8559_v33 = vcombine.high %v8557_v62, %v8557_v62  ;;  %v8580_v18 = vrot.slane %v8558_v40, %v13560_v25  ;;  %v8573_v54 = vrot.slane %v8557_v62, %v13560_v25  ;;  %v9159_v9 = vrot.slane %v8566_v50, %v13560_v25 }
 0x7f8   :  { %v8592_v8 = vcombine.high %v8210_v4, %v8210_v4  ;;  %v8599_v15 = vrot.slane %v8210_v4, %v13560_v25  ;;  %v8214_v23 = vpop.f32.mrf.mxu0  ;;  %v8588_v37 = vcombine.high %v8566_v50, %v8566_v50 }
 0x7f9   :  { %v8587_v39 = vrot.slane %v8559_v33, %v13560_v25  ;;  %v8590_v5 = vcombine.high %v8580_v18, %v8580_v18  ;;  %v8215_v51 = vadd.f32 %v13129_v1, %v8214_v23  ;;  %v9166_v48 = vrot.slane %v9159_v9, %v13560_v25 }
 0x7fa   :  { %v8606_v53 = vrot.slane %v8592_v8, %v13560_v25  ;;  %v8607_v56 = vcombine.high %v8599_v15, %v8599_v15  ;;  %v8615_v13 = vrot.slane %v8599_v15, %v13560_v25  ;;  %v10139_v27 = vpop.f32.mrf.mxu0  ;;  %v8589_v44 = vcombine.high %v8573_v54, %v8573_v54 }
 0x7fb   :  { %v8591_v20 = vcombine.high %v8587_v39, %v8587_v39  ;;  %v8641_v42 = vcombine.high %v8215_v51, %v8215_v51  ;;  %v8648_v32 = vrot.slane %v8215_v51, %v13560_v25  ;;  %9495 = vxpose.xlu0.b32.end [7/7] (short) (narrow) %v9166_v48, 32  ;;  %v13239_v52 = vcombine.low %v8580_v18, %v8588_v37 }
 0x7fc   :  { %v8608_v30 = vcombine.high %v8606_v53, %v8606_v53  ;;  %v8622_v11 = vrot.slane %v8606_v53, %v13560_v25  ;;  %v8217_v45 = vpop.f32.mrf.mxu0  ;;  %v8629_v29 = vrot.slane %v8607_v56, %v13560_v25  ;;  %v13241_v3 = vcombine.low %v8590_v5, %v8573_v54 }
 0x7fd   :  { %v8218_v49 = vadd.f32 %v13129_v1, %v8217_v45  ;;  %v8637_v47 = vcombine.high %v8615_v13, %v8615_v13  ;;  %v13244_v35 = vcombine.low %v8591_v20, %v8615_v13  ;;  %v8655_v55 = vrot.slane %v8641_v42, %v13560_v25 }
 0x7fe   :  { %v8636_v14 = vrot.slane %v8608_v30, %v13560_v25  ;;  %v10140_v26 = vpop.f32.mrf.mxu0  ;;  %v8656_v22 = vcombine.high %v8648_v32, %v8648_v32  ;;  %v8664_v34 = vrot.slane %v8648_v32, %v13560_v25  ;;  %v13248_v59 = vcombine.low %v8587_v39, %v8589_v44 }
 0x7ff   :  { %v8638_v0 = vcombine.high %v8622_v11, %v8622_v11  ;;  %v8690_v31 = vcombine.high %v8218_v49, %v8218_v49  ;;  %v8639_v12 = vcombine.high %v8629_v29, %v8629_v29  ;;  %v8657_v63 = vcombine.high %v8655_v55, %v8655_v55 }
 0x800   :  { %v8640_v10 = vcombine.high %v8636_v14, %v8636_v14  ;;  %v8222_v43 = vpop.f32.mrf.mxu0  ;;  %v8671_v41 = vrot.slane %v8655_v55, %v13560_v25  ;;  %v8678_v38 = vrot.slane %v8656_v22, %v13560_v25  ;;  %v8686_v2 = vcombine.high %v8664_v34, %v8664_v34 }
 0x801   :  { %v8697_v21 = vrot.slane %v8218_v49, %v13560_v25  ;;  %v8704_v7 = vrot.slane %v8690_v31, %v13560_v25  ;;  %v8223_v24 = vadd.f32 %v13129_v1, %v8222_v43  ;;  %v9198_v57 = vrot.slane %v13244_v35, %v13560_v25 }
 0x802   :  { %v10143_v61 = vpop.f32.mrf.mxu0  ;;  %v13257_v60 = vcombine.low %v8629_v29, %v8637_v47  ;;  %v8685_v16 = vrot.slane %v8657_v63, %v13560_v25  ;;  %v13260_v6 = vcombine.low %v8640_v10, %v8664_v34  ;;  %v8688_v46 = vcombine.high %v8678_v38, %v8678_v38 }
 0x803   :  { %v8705_v28 = vcombine.high %v8697_v21, %v8697_v21  ;;  %v8706_v19 = vcombine.high %v8704_v7, %v8704_v7  ;;  %v8713_v17 = vrot.slane %v8697_v21, %v13560_v25  ;;  %v13263_v62 = vcombine.low %v8639_v12, %v8622_v11 }
 0x804   :  { %v8225_v58 = vpop.f32.mrf.mxu0  ;;  %v13265_v40 = vcombine.low %v8636_v14, %v8638_v0  ;;  %v8689_v50 = vcombine.high %v8685_v16, %v8685_v16  ;;  %v8720_v4 = vrot.slane %v8704_v7, %v13560_v25  ;;  %v8687_v36 = vcombine.high %v8671_v41, %v8671_v41 }
 0x805   :  { %v13268_v33 = vcombine.low %v8678_v38, %v8686_v2  ;;  %v8734_v18 = vrot.slane %v8706_v19, %v13560_v25  ;;  %v8739_v54 = vcombine.high %v8223_v24, %v8223_v24  ;;  %v8727_v8 = vrot.slane %v8705_v28, %v13560_v25 }
 0x806   :  { %v10144_v9 = vpop.f32.mrf.mxu0  ;;  %v8735_v15 = vcombine.high %v8713_v17, %v8713_v17  ;;  %v8746_v23 = vrot.slane %v8223_v24, %v13560_v25  ;;  %v8226_v39 = vadd.f32 %v13129_v1, %v8225_v58  ;;  %v9247_v37 = vrot.slane %v13260_v6, %v13560_v25 }
 0x807   :  { %v13276_v5 = vcombine.low %v8688_v46, %v8671_v41  ;;  %v8738_v53 = vcombine.high %v8734_v18, %v8734_v18  ;;  %v8753_v56 = vrot.slane %v8739_v54, %v13560_v25  ;;  %v8736_v51 = vcombine.high %v8720_v4, %v8720_v4 }
 0x808   :  { %v8230_v13 = vpop.f32.mrf.mxu0  ;;  %v13279_v27 = vcombine.low %v8689_v50, %v8713_v17  ;;  %v8754_v20 = vcombine.high %v8746_v23, %v8746_v23  ;;  %v8762_v48 = vrot.slane %v8746_v23, %v13560_v25  ;;  %v13282_v44 = vcombine.low %v8685_v16, %v8687_v36 }
 0x809   :  { %v8755_v30 = vcombine.high %v8753_v56, %v8753_v56  ;;  %v8769_v11 = vrot.slane %v8753_v56, %v13560_v25  ;;  %v8788_v45 = vcombine.high %v8226_v39, %v8226_v39  ;;  %v8737_v42 = vcombine.high %v8727_v8, %v8727_v8 }
 0x80a   :  { %v10147_v29 = vpop.f32.mrf.mxu0  ;;  %v13285_v32 = vcombine.low %v8727_v8, %v8735_v15  ;;  %v8776_v49 = vrot.slane %v8754_v20, %v13560_v25  ;;  %v8795_v14 = vrot.slane %v8226_v39, %v13560_v25  ;;  %v8784_v26 = vcombine.high %v8762_v48, %v8762_v48 }
 0x80b   :  { %v8783_v47 = vrot.slane %v8755_v30, %v13560_v25  ;;  %v9317_v55 = vcombine.low %v8738_v53, %v8762_v48  ;;  %v8802_v22 = vrot.slane %v8788_v45, %v13560_v25  ;;  %v9296_v0 = vrot.slane %v13279_v27, %v13560_v25 }
 0x80c   :  { %v8233_v34 = vpop.f32.mrf.mxu0  ;;  %v9316_v10 = vcombine.low %v8734_v18, %v8736_v51  ;;  %v8785_v31 = vcombine.high %v8769_v11, %v8769_v11  ;;  %v8803_v43 = vcombine.high %v8795_v14, %v8795_v14  ;;  %v8786_v12 = vcombine.high %v8776_v49, %v8776_v49 }
 0x80d   :  { %v8787_v63 = vcombine.high %v8783_v47, %v8783_v47  ;;  %v8804_v41 = vcombine.high %v8802_v22, %v8802_v22  ;;  %v8811_v38 = vrot.slane %v8795_v14, %v13560_v25  ;;  %v9315_v21 = vcombine.low %v8737_v42, %v8720_v4 }
 0x80e   :  { %v10148_v2 = vpop.f32.mrf.mxu0  ;;  %v8818_v7 = vrot.slane %v8802_v22, %v13560_v25  ;;  %v9177_v24 = vrot.slane %v13239_v52, %v13560_v25  ;;  %v9184_v61 = vrot.slane %v13241_v3, %v13560_v25  ;;  %v9345_v16 = vrot.slane %v9317_v55, %v13560_v25 }
 0x80f   :  { %v9363_v6 = vcombine.low %v8776_v49, %v8784_v26  ;;  %v8832_v46 = vrot.slane %v8804_v41, %v13560_v25  ;;  %v9191_v28 = vrot.slane %v13248_v59, %v13560_v25  ;;  %v9365_v19 = vcombine.low %v8783_v47, %v8785_v31 }
 0x810   :  { %v8825_v17 = vrot.slane %v8803_v43, %v13560_v25  ;;  %v9199_v58 = vcombine.low %v9177_v24, %v9184_v61  ;;  %v8231_v50 = vadd.f32 %v13129_v1, %v8230_v13  ;;  %v9364_v4 = vcombine.low %v8786_v12, %v8769_v11 }
 0x811   :  { %v8833_v36 = vcombine.high %v8811_v38, %v8811_v38  ;;  %v9366_v52 = vcombine.low %v8787_v63, %v8811_v38  ;;  %v9200_v3 = vcombine.low %v9191_v28, %v9198_v57  ;;  %v8834_v18 = vcombine.high %v8818_v7, %v8818_v7 }
 0x812   :  { %v9207_v54 = vrot.slane %v9199_v58, %v13560_v25  ;;  %v8836_v9 = vcombine.high %v8832_v46, %v8832_v46  ;;  %v8843_v8 = vrot.slane %v8231_v50, %v13560_v25  ;;  %v9226_v15 = vrot.slane %v13257_v60, %v13560_v25 }
 0x813   :  { %v9214_v59 = vrot.slane %v9200_v3, %v13560_v25  ;;  %v9233_v1 = vrot.slane %v13263_v62, %v13560_v25  ;;  %v9240_v23 = vrot.slane %v13265_v40, %v13560_v25  ;;  %v8835_v39 = vcombine.high %v8825_v17, %v8825_v17 }
 0x814   :  { %v8851_v35 = vrot.slane %v8843_v8, %v13560_v25  ;;  %v9275_v57 = vrot.slane %v13268_v33, %v13560_v25  ;;  %v9282_v53 = vrot.slane %v13276_v5, %v13560_v25  ;;  %v9289_v60 = vrot.slane %v13282_v44, %v13560_v25 }
 0x815   :  { %v9215_v56 = vcombine.low %v9207_v54, %v9214_v59  ;;  %v9248_v13 = vcombine.low %v9226_v15, %v9233_v1  ;;  %v9249_v51 = vcombine.low %v9240_v23, %v9247_v37  ;;  %v9394_v62 = vrot.slane %v9366_v52, %v13560_v25 }
 0x816   :  { %v9415_v27 = vcombine.low %v8836_v9, %v8851_v35  ;;  %v9297_v20 = vcombine.low %v9275_v57, %v9282_v53  ;;  %v9324_v40 = vrot.slane %v13285_v32, %v13560_v25  ;;  %v9298_v30 = vcombine.low %v9289_v60, %v9296_v0 }
 0x817   :  { %9521 = vxpose.xlu1.b32.start [1/7] (short) (narrow) %v9215_v56, 32  ;;  %v9256_v48 = vrot.slane %v9248_v13, %v13560_v25  ;;  %v9263_v33 = vrot.slane %v9249_v51, %v13560_v25  ;;  %v9331_v5 = vrot.slane %v9315_v21, %v13560_v25  ;;  %v9413_v11 = vcombine.low %v8835_v39, %v8818_v7 }
 0x818   :  { %v9414_v37 = vcombine.low %v8832_v46, %v8834_v18  ;;  %v9305_v45 = vrot.slane %v9297_v20, %v13560_v25  ;;  %v9338_v44 = vrot.slane %v9316_v10, %v13560_v25  ;;  %v9312_v42 = vrot.slane %v9298_v30, %v13560_v25 }
 0x819   :  { %v9264_v29 = vcombine.low %v9256_v48, %v9263_v33  ;;  %v9346_v49 = vcombine.low %v9324_v40, %v9331_v5  ;;  %v9380_v32 = vrot.slane %v9364_v4, %v13560_v25  ;;  %v9387_v47 = vrot.slane %v9365_v19, %v13560_v25 }
 0x81a   :  { %v9347_v14 = vcombine.low %v9338_v44, %v9345_v16  ;;  %v9412_v26 = vcombine.low %v8825_v17, %v8833_v36  ;;  %v9443_v55 = vrot.slane %v9415_v27, %v13560_v25  ;;  %v9313_v22 = vcombine.low %v9305_v45, %v9312_v42 }
 0x81b   :  { %9522 = vxpose.xlu1.b32.cont [2/7] (short) (narrow) %v9264_v29, 32  ;;  %v9373_v34 = vrot.slane %v9363_v6, %v13560_v25  ;;  %v9396_v31 = vcombine.low %v9387_v47, %v9394_v62  ;;  %v9354_v10 = vrot.slane %v9346_v49, %v13560_v25  ;;  %v9429_v12 = vrot.slane %v9413_v11, %v13560_v25 }
 0x81c   :  { %v9361_v0 = vrot.slane %v9347_v14, %v13560_v25  ;;  %v9436_v63 = vrot.slane %v9414_v37, %v13560_v25  ;;  %v9422_v2 = vrot.slane %v9412_v26, %v13560_v25  ;;  %v8844_v7 = vcombine.high %v8843_v8, %v8843_v8 }
 0x81d   :  { %v9395_v43 = vcombine.low %v9373_v34, %v9380_v32  ;;  %v9410_v38 = vrot.slane %v9396_v31, %v13560_v25 }
 0x81e   :  { %v9362_v41 = vcombine.low %v9354_v10, %v9361_v0  ;;  %v9445_v21 = vcombine.low %v9436_v63, %v9443_v55  ;;  %v9444_v61 = vcombine.low %v9422_v2, %v9429_v12  ;;  %v8858_v46 = vrot.slane %v8844_v7, %v13560_v25 }
 0x81f   :  { %9523 = vxpose.xlu1.b32.cont [3/7] (short) (narrow) %v9313_v22, 32  ;;  %v9403_v24 = vrot.slane %v9395_v43, %v13560_v25 }
 0x820   :  { %v9459_v6 = vrot.slane %v9445_v21, %v13560_v25  ;;  %v9452_v28 = vrot.slane %v9444_v61, %v13560_v25  ;;  %v9467_v17 = vrot.slane %v8858_v46, %v13560_v25 }
 0x821   :  { %v9411_v16 = vcombine.low %v9403_v24, %v9410_v38 }
 0x822   :  { %v9460_v19 = vcombine.low %v9452_v28, %v9459_v6  ;;  %v9474_v58 = vrot.slane %v9467_v17, %v13560_v25 }
 0x823   :  { %9524 = vxpose.xlu1.b32.cont [4/7] (short) (narrow) %v9362_v41, 32 }
 0x827   :  { %9525 = vxpose.xlu1.b32.cont [5/7] (short) (narrow) %v9411_v16, 32 }
 0x82b   :  { %9526 = vxpose.xlu1.b32.cont [6/7] (short) (narrow) %v9460_v19, 32 }
 0x82f   :  { %9527 = vxpose.xlu1.b32.end [7/7] (short) (narrow) %v9474_v58, 32 }
 0x85f   :  { %v9505_v50 = vpop.trf.xlu0 }
 0x860   :  { %9553 = vst.msk [vmem:[#allocation11] sm:$0xff] %vm6185_vm4, %v9505_v50 }
 0x863   :  { %v9506_v4 = vpop.trf.xlu0 }
 0x864   :  { %9554 = vst.msk [vmem:[#allocation11 + $0x8] sm:$0xff] %vm6185_vm4, %v9506_v4 }
 0x867   :  { %v9507_v36 = vpop.trf.xlu0 }
 0x868   :  { %9555 = vst.msk [vmem:[#allocation11 + $0x10] sm:$0xff] %vm6185_vm4, %v9507_v36 }
 0x86b   :  { %v9508_v52 = vpop.trf.xlu0 }
 0x86c   :  { %9556 = vst.msk [vmem:[#allocation11 + $0x18] sm:$0xff] %vm6185_vm4, %v9508_v52 }
 0x893   :  { %v9537_v3 = vpop.trf.xlu1 }
 0x894   :  { %9557 = vst.msk [vmem:[#allocation11 + $0x20] sm:$0xff] %vm6185_vm4, %v9537_v3 }
 0x897   :  { %v9538_v18 = vpop.trf.xlu1 }
 0x898   :  { %9558 = vst.msk [vmem:[#allocation11 + $0x28] sm:$0xff] %vm6185_vm4, %v9538_v18 }
 0x89b   :  { %v9539_v25 = vpop.trf.xlu1 }
 0x89c   :  { %9559 = vst.msk [vmem:[#allocation11 + $0x30] sm:$0xff] %vm6185_vm4, %v9539_v25 }
 0x89f   :  { %v9540_v54 = vpop.trf.xlu1 }
 0x8a0   :  { %9560 = vst.msk [vmem:[#allocation11 + $0x38] sm:$0xff] %vm6185_vm4, %v9540_v54 }
 0x8a1   :  { %10673 = shalt.err (!%p10670_p1)
}
 0x8a2   :  { %s10702_s13 = smov 128   ;;  %s10703_s2 = smov 8  }
 0x8a3   :  { %9572 = dma.vmem_to_hbm [thread:$0]  %s9567_s30, 1024, %s13371_s11, [#allocation4], %s10702_s13, %s10702_s13, %s10703_s2  }
 0x8a4   :  { %10688 = dma.done.wait [#allocation4], 1024  }
 0x8a5   :  { %10689 = vsyncadd [#allocation4], 4294966272 }
 0x8a6   :  { %9576 = vsyncpa [#allocation3], 1 }
 0x8a7   :  { %9577 = vsyncpa [#allocation6], 1 }
 0x8a8   :  { %9578 = vsyncpa [#allocation9], 1 }
 0x8a9   :  { %9579 = vsyncpa [#allocation4], 1 }

</bundles_post_ra>
